<compile_context>
chip_gen: v6e
topology: v6e:2x2x1
jax: 0.10.0
libtpu: 0.0.40
codegen_flags: <defaults>
</compile_context>

<pallas_src>
import jax
import jax.numpy as jnp
from jax import lax
import numpy as np
from jax.experimental import pallas as pl
from jax.experimental.pallas import tpu as pltpu

EPS = 1e-5                      # PyTorch BatchNorm3d default eps
TILE_M = 1024                   # target lane tile (rounded up to halo block)
VMEM_LIMIT = 48 * 1024 * 1024   # <= v7x's 64 MiB/TC; raise on v5e/v6e sweeps


def _round_up(x, m):
    return (x + m - 1) // m * m


def _geometry(N, D, H, W, tile_m_target=TILE_M):
    """Static geometry of the flat padded-grid layout (no guard columns)."""
    Dp, Hp, Wp = D + 2, H + 2, W + 2
    halo = Hp * Wp + Wp + 1                       # max |tap column offset|
    halo_b = _round_up(halo, 128)                 # narrow halo block width
    tile_m = _round_up(tile_m_target, halo_b)     # multiple of halo_b (and 128)
    m_grid = N * Dp * Hp * Wp                     # flattened padded grid size
    n_tiles = -(-m_grid // tile_m)
    m_store = n_tiles * tile_m                    # stored activation columns
    offsets = tuple((kd - 1) * Hp * Wp + (kh - 1) * Wp + (kw - 1)
                    for kd in range(3) for kh in range(3) for kw in range(3))
    return dict(N=N, D=D, H=H, W=W, Dp=Dp, Hp=Hp, Wp=Wp,
                halo=halo, halo_b=halo_b, tile_m=tile_m,
                r=tile_m // halo_b, m_grid=m_grid,
                n_tiles=n_tiles, m_store=m_store, offsets=offsets)


# ---------------------------------------------------------------------------
# Pallas kernel: patch assembly + ONE big-K MXU dot + fused bias/BN/ReLU/mask
# ---------------------------------------------------------------------------
def _make_conv_bn_relu_kernel(c_in_pad, tile_m, halo_b, k_real, k_pad, offsets):
    def kernel(xl_ref, xm_ref, xr_ref, w_ref, scale_ref, shift_ref, mask_ref,
               o_ref, patch_ref):
        # xl/xm/xr: (c_in_pad, halo_b / tile_m / halo_b) bf16 activation window
        # w_ref:    (c_out_pad, k_pad) bf16  (taps folded into K, lane-dense)
        # scale/shift: (c_out_pad, 1) f32    (folded conv bias + BatchNorm)
        # mask_ref: (1, tile_m) f32          (1 at real voxels, 0 at padding)
        # o_ref:    (c_out_pad, tile_m) bf16 (directly the next layer's store)
        # patch_ref:(k_pad, tile_m) bf16 VMEM scratch
        if k_pad > k_real:
            # zero the K padding rows every step (megacore-safe: no reliance
            # on program_id==0 running on every core)
            patch_ref[k_real:, :] = jnp.zeros((k_pad - k_real, tile_m),
                                              patch_ref.dtype)
        # contiguous window [t*tile_m - halo_b, (t+1)*tile_m + halo_b)
        xw = jnp.concatenate([xl_ref[...], xm_ref[...], xr_ref[...]], axis=1)
        for k, off in enumerate(offsets):          # 27 shifts, done ONCE each
            s = halo_b + off                       # static per-tap lane shift
            patch_ref[k * c_in_pad:(k + 1) * c_in_pad, :] = xw[:, s:s + tile_m]
        acc = jnp.dot(w_ref[...], patch_ref[...],
                      preferred_element_type=jnp.float32)
        y = acc * scale_ref[...] + shift_ref[...]
        y = jnp.maximum(y, 0.0) * mask_ref[...]
        o_ref[...] = y.astype(o_ref.dtype)
    return kernel


def _conv_bn_relu_store(x_store, mask, w2d, scale, shift, geom):
    """One Conv3d(3x3x3)+bias+BN+ReLU layer on the flat bf16 store layout."""
    c_in_pad = x_store.shape[0]
    c_out_pad, k_pad = w2d.shape
    k_real = 27 * c_in_pad
    tile_m, halo_b, r = geom["tile_m"], geom["halo_b"], geom["r"]
    n_tiles, m_store = geom["n_tiles"], geom["m_store"]
    n_halo_blocks = m_store // halo_b

    kernel = _make_conv_bn_relu_kernel(c_in_pad, tile_m, halo_b, k_real, k_pad,
                                       geom["offsets"])
    flops = 2 * c_out_pad * k_pad * m_store
    bytes_accessed = (c_in_pad * (tile_m + 2 * halo_b) * n_tiles * 2
                      + w2d.size * 2 + m_store * 4 + c_out_pad * m_store * 2)

    grid_spec = pltpu.PrefetchScalarGridSpec(
        num_scalar_prefetch=0,
        grid=(n_tiles,),
        in_specs=[
            # left halo (narrow), clamped at the grid edge: clamped reads only
            # ever feed padded/tail output positions which the mask zeroes.
            pl.BlockSpec((c_in_pad, halo_b),
                         lambda t: (0, jnp.maximum(t * r - 1, 0))),
            # main tile
            pl.BlockSpec((c_in_pad, tile_m), lambda t: (0, t)),
            # right halo (narrow), clamped at the grid edge (same argument).
            pl.BlockSpec((c_in_pad, halo_b),
                         lambda t: (0, jnp.minimum((t + 1) * r,
                                                   n_halo_blocks - 1))),
            pl.BlockSpec((c_out_pad, k_pad), lambda t: (0, 0)),   # weights
            pl.BlockSpec((c_out_pad, 1), lambda t: (0, 0)),       # scale
            pl.BlockSpec((c_out_pad, 1), lambda t: (0, 0)),       # shift
            pl.BlockSpec((1, tile_m), lambda t: (0, t)),          # mask
        ],
        out_specs=pl.BlockSpec((c_out_pad, tile_m), lambda t: (0, t)),
        scratch_shapes=[pltpu.VMEM((k_pad, tile_m), jnp.bfloat16)],
    )
    return pl.pallas_call(
        kernel,
        out_shape=jax.ShapeDtypeStruct((c_out_pad, m_store), jnp.bfloat16),
        grid_spec=grid_spec,
        compiler_params=pltpu.CompilerParams(
            dimension_semantics=("parallel",),
            vmem_limit_bytes=VMEM_LIMIT),
        cost_estimate=pl.CostEstimate(flops=flops, transcendentals=0,
                                      bytes_accessed=bytes_accessed),
    )(x_store, x_store, x_store, w2d, scale, shift, mask)


# ---------------------------------------------------------------------------
# Plain-JAX glue: layout plumbing + parameter folding (no im2col, no bounce)
# ---------------------------------------------------------------------------
def _fold_layer_params(w, b, gamma, beta, rmean, rvar, c_in_pad, c_out_pad,
                       k_pad):
    C_out, C_in = w.shape[0], w.shape[1]
    scale = (gamma / jnp.sqrt(rvar + EPS)).astype(jnp.float32)
    shift = (scale * (b - rmean) + beta).astype(jnp.float32)
    # (C_out,C_in,3,3,3) -> (C_out,3,3,3,C_in) -> pad -> (c_out_pad, K_pad)
    w_t = jnp.transpose(w, (0, 2, 3, 4, 1))
    w_t = jnp.pad(w_t, ((0, c_out_pad - C_out), (0, 0), (0, 0), (0, 0),
                        (0, c_in_pad - C_in)))
    w2d = w_t.reshape(c_out_pad, 27 * c_in_pad)
    w2d = jnp.pad(w2d, ((0, 0), (0, k_pad - 27 * c_in_pad))).astype(jnp.bfloat16)
    scale = jnp.pad(scale, (0, c_out_pad - C_out)).reshape(c_out_pad, 1)
    shift = jnp.pad(shift, (0, c_out_pad - C_out)).reshape(c_out_pad, 1)
    return w2d, scale, shift


def _ncdhw_to_store(x, c_pad, geom):
    """(N,C,D,H,W) f32 -> (c_pad, m_store) bf16 flat padded-grid storage."""
    C = x.shape[1]
    xp = jnp.pad(x, ((0, 0), (0, c_pad - C), (1, 1), (1, 1), (1, 1)))
    flat = jnp.transpose(xp, (1, 0, 2, 3, 4)).reshape(c_pad, geom["m_grid"])
    flat = jnp.pad(flat, ((0, 0), (0, geom["m_store"] - geom["m_grid"])))
    return flat.astype(jnp.bfloat16)


def _build_mask(geom):
    Dp, Hp, Wp, N = geom["Dp"], geom["Hp"], geom["Wp"], geom["N"]
    m3 = jnp.zeros((Dp, Hp, Wp), jnp.float32).at[1:-1, 1:-1, 1:-1].set(1.0)
    m = jnp.tile(m3.reshape(-1), (N,))
    m = jnp.pad(m, (0, geom["m_store"] - geom["m_grid"]))
    return m.reshape(1, geom["m_store"])


def _store_to_ncdhw(y_store, c_out, geom):
    y = y_store[:c_out, :geom["m_grid"]].astype(jnp.float32)
    y = y.reshape(c_out, geom["N"], geom["Dp"], geom["Hp"], geom["Wp"])
    y = y[:, :, 1:-1, 1:-1, 1:-1]
    return jnp.transpose(y, (1, 0, 2, 3, 4))


@jax.jit
def conv3d_block_forward(x, params):
    """Conv3D_Block.forward with residual=None, is_2d1d=False."""
    N, C_in, D, H, W = x.shape
    C_mid = params["conv1"][0].shape[0]
    C_out = params["conv2"][0].shape[0]
    geom = _geometry(N, D, H, W, TILE_M)
    # pad channels to bf16 sublane granularity (16); at real echonet widths
    # pad C_out further (>=128) for MXU row occupancy.
    c_in_pad = _round_up(C_in, 16)
    c_mid_pad = _round_up(C_mid, 16)
    c_out_pad = _round_up(C_out, 16)
    k1_pad = _round_up(27 * c_in_pad, 128)
    k2_pad = _round_up(27 * c_mid_pad, 128)
    mask = _build_mask(geom)

    # ---- layer 1 ----
    w1, s1, sh1 = _fold_layer_params(*params["conv1"], c_in_pad, c_mid_pad,
                                     k1_pad)
    xs1 = _ncdhw_to_store(x, c_in_pad, geom)
    y1_store = _conv_bn_relu_store(xs1, mask, w1, s1, sh1, geom)

    # ---- layer 2: y1_store is ALREADY layer 2's flat bf16 input store ----
    w2, s2, sh2 = _fold_layer_params(*params["conv2"], c_mid_pad, c_out_pad,
                                     k2_pad)
    y2_store = _conv_bn_relu_store(y1_store, mask, w2, s2, sh2, geom)

    return _store_to_ncdhw(y2_store, C_out, geom)


# ---------------------------------------------------------------------------
# Pure-JAX reference (f32 conv on bf16-rounded streams) self-check
# ---------------------------------------------------------------------------
def _ref_layer(x, w, b, gamma, beta, rmean, rvar):
    xq = x.astype(jnp.bfloat16).astype(jnp.float32)
    wq = w.astype(jnp.bfloat16).astype(jnp.float32)
    y = lax.conv_general_dilated(
        xq, wq, window_strides=(1, 1, 1),
        padding=[(1, 1), (1, 1), (1, 1)],
        dimension_numbers=("NCDHW", "OIDHW", "NCDHW"),
        precision=lax.Precision.HIGHEST)
    c = lambda v: v.reshape(1, -1, 1, 1, 1)
    y = y + c(b)
    y = (y - c(rmean)) / jnp.sqrt(c(rvar) + EPS) * c(gamma) + c(beta)
    return jnp.maximum(y, 0.0)


def ref_forward(x, params):
    y1 = _ref_layer(x, *params["conv1"])
    # the Pallas path streams bf16 activations between layers and out of the
    # final layer; mirror that rounding here.
    y1 = y1.astype(jnp.bfloat16).astype(jnp.float32)
    y2 = _ref_layer(y1, *params["conv2"])
    return y2.astype(jnp.bfloat16).astype(jnp.float32)


# ---------------------------------------------------------------------------
# Deterministic parameter construction (synthetic, PyTorch-like shapes)
# ---------------------------------------------------------------------------
def make_layer_params(key, c_in, c_out):
    k_w, k_b, k_g, k_be, k_m, k_v = jax.random.split(key, 6)
    fan_in = c_in * 27
    bound = 1.0 / np.sqrt(fan_in)
    w = jax.random.uniform(k_w, (c_out, c_in, 3, 3, 3),
                           minval=-bound, maxval=bound, dtype=jnp.float32)
    b = jax.random.uniform(k_b, (c_out,), minval=-bound, maxval=bound,
                           dtype=jnp.float32)
    gamma = 1.0 + 0.1 * jax.random.normal(k_g, (c_out,), dtype=jnp.float32)
    beta = 0.1 * jax.random.normal(k_be, (c_out,), dtype=jnp.float32)
    rmean = 0.1 * jax.random.normal(k_m, (c_out,), dtype=jnp.float32)
    rvar = 0.5 + jnp.abs(jax.random.normal(k_v, (c_out,), dtype=jnp.float32))
    return (w, b, gamma, beta, rmean, rvar)


if __name__ == "__main__":
    # Small shapes: batch=2, inp_feat=4, out_feat=8, (D,H,W)=(6,8,8)
    N, C_IN, C_OUT, D, H, W = 2, 4, 8, 6, 8, 8

    root = jax.random.PRNGKey(0)
    kx, k1, k2 = jax.random.split(root, 3)
    x = jax.random.normal(kx, (N, C_IN, D, H, W), dtype=jnp.float32)

    params = {
        "conv1": make_layer_params(k1, C_IN, C_OUT),
        "conv2": make_layer_params(k2, C_OUT, C_OUT),
    }

    out = jax.block_until_ready(conv3d_block_forward(x, params))
    ref = jax.block_until_ready(ref_forward(x, params))

    assert out.shape == (N, C_OUT, D, H, W), out.shape
    # bf16 activation/weight streams (f32 accumulation) => loosened tolerance
    np.testing.assert_allclose(np.asarray(out), np.asarray(ref),
                               rtol=1e-2, atol=1e-2)
    print("KERNEL_OK")
</pallas_src>

<mosaic_0001>
module attributes {stable_mosaic.version = 11 : i64} {
  func.func @kernel(%arg0: i32, %arg1: memref<16x128xbf16, #tpu.memory_space<vmem>>, %arg2: memref<16x1024xbf16, #tpu.memory_space<vmem>>, %arg3: memref<16x128xbf16, #tpu.memory_space<vmem>>, %arg4: memref<16x512xbf16, #tpu.memory_space<vmem>>, %arg5: memref<16x1xf32, #tpu.memory_space<vmem>>, %arg6: memref<16x1xf32, #tpu.memory_space<vmem>>, %arg7: memref<1x1024xf32, #tpu.memory_space<vmem>>, %arg8: memref<16x1024xbf16, #tpu.memory_space<vmem>>, %arg9: memref<512x1024xbf16, #tpu.memory_space<vmem>>) attributes {dimension_semantics = [#tpu.dimension_semantics<parallel>], iteration_bounds = array<i64: 2>, scalar_prefetch = 0 : i64, scratch_operands = 1 : i64, tpu.core_type = #tpu.core_type<tc>, window_params = [{transform_indices = @transform_0, window_bounds = array<i64: 16, 128>}, {transform_indices = @transform_1, window_bounds = array<i64: 16, 1024>}, {transform_indices = @transform_2, window_bounds = array<i64: 16, 128>}, {pipeline_mode = #tpu.pipeline_mode<synchronous>, transform_indices = @transform_3, window_bounds = array<i64: 16, 512>}, {pipeline_mode = #tpu.pipeline_mode<synchronous>, transform_indices = @transform_4, window_bounds = array<i64: 16, 1>}, {pipeline_mode = #tpu.pipeline_mode<synchronous>, transform_indices = @transform_5, window_bounds = array<i64: 16, 1>}, {transform_indices = @transform_6, window_bounds = array<i64: 1, 1024>}, {transform_indices = @transform_7, window_bounds = array<i64: 16, 1024>}]} {
    %cst = arith.constant 0.000000e+00 : bf16
    %0 = vector.broadcast %cst : bf16 to vector<80x1024xbf16>
    %c432 = arith.constant 432 : index
    %c0 = arith.constant 0 : index
    %1 = vector.load %arg9[%c432, %c0] : memref<512x1024xbf16, #tpu.memory_space<vmem>>, vector<80x1024xbf16>
    tpu.vector_store %arg9[%c432, %c0], %0 {strides = array<i32>} : memref<512x1024xbf16, #tpu.memory_space<vmem>>, vector<80x1024xbf16>,
    %c0_0 = arith.constant 0 : index
    %c0_1 = arith.constant 0 : index
    %2 = vector.load %arg1[%c0_0, %c0_1] : memref<16x128xbf16, #tpu.memory_space<vmem>>, vector<16x128xbf16>
    %c0_2 = arith.constant 0 : index
    %c0_3 = arith.constant 0 : index
    %3 = vector.load %arg2[%c0_2, %c0_3] : memref<16x1024xbf16, #tpu.memory_space<vmem>>, vector<16x1024xbf16>
    %c0_4 = arith.constant 0 : index
    %c0_5 = arith.constant 0 : index
    %4 = vector.load %arg3[%c0_4, %c0_5] : memref<16x128xbf16, #tpu.memory_space<vmem>>, vector<16x128xbf16>
    %5 = tpu.concatenate %2, %3, %4 in 1 : vector<16x128xbf16>, vector<16x1024xbf16>, vector<16x128xbf16> -> vector<16x1280xbf16>
    %6 = vector.extract_strided_slice %5 {offsets = [0, 17], sizes = [16, 1024], strides = [1, 1]} : vector<16x1280xbf16> to vector<16x1024xbf16>
    %c0_6 = arith.constant 0 : index
    %c0_7 = arith.constant 0 : index
    %7 = vector.load %arg9[%c0_6, %c0_7] : memref<512x1024xbf16, #tpu.memory_space<vmem>>, vector<16x1024xbf16>
    tpu.vector_store %arg9[%c0_6, %c0_7], %6 {strides = array<i32>} : memref<512x1024xbf16, #tpu.memory_space<vmem>>, vector<16x1024xbf16>,
    %8 = vector.extract_strided_slice %5 {offsets = [0, 18], sizes = [16, 1024], strides = [1, 1]} : vector<16x1280xbf16> to vector<16x1024xbf16>
    %c16 = arith.constant 16 : index
    %c0_8 = arith.constant 0 : index
    %9 = vector.load %arg9[%c16, %c0_8] : memref<512x1024xbf16, #tpu.memory_space<vmem>>, vector<16x1024xbf16>
    tpu.vector_store %arg9[%c16, %c0_8], %8 {strides = array<i32>} : memref<512x1024xbf16, #tpu.memory_space<vmem>>, vector<16x1024xbf16>,
    %10 = vector.extract_strided_slice %5 {offsets = [0, 19], sizes = [16, 1024], strides = [1, 1]} : vector<16x1280xbf16> to vector<16x1024xbf16>
    %c32 = arith.constant 32 : index
    %c0_9 = arith.constant 0 : index
    %11 = vector.load %arg9[%c32, %c0_9] : memref<512x1024xbf16, #tpu.memory_space<vmem>>, vector<16x1024xbf16>
    tpu.vector_store %arg9[%c32, %c0_9], %10 {strides = array<i32>} : memref<512x1024xbf16, #tpu.memory_space<vmem>>, vector<16x1024xbf16>,
    %12 = vector.extract_strided_slice %5 {offsets = [0, 27], sizes = [16, 1024], strides = [1, 1]} : vector<16x1280xbf16> to vector<16x1024xbf16>
    %c48 = arith.constant 48 : index
    %c0_10 = arith.constant 0 : index
    %13 = vector.load %arg9[%c48, %c0_10] : memref<512x1024xbf16, #tpu.memory_space<vmem>>, vector<16x1024xbf16>
    tpu.vector_store %arg9[%c48, %c0_10], %12 {strides = array<i32>} : memref<512x1024xbf16, #tpu.memory_space<vmem>>, vector<16x1024xbf16>,
    %14 = vector.extract_strided_slice %5 {offsets = [0, 28], sizes = [16, 1024], strides = [1, 1]} : vector<16x1280xbf16> to vector<16x1024xbf16>
    %c64 = arith.constant 64 : index
    %c0_11 = arith.constant 0 : index
    %15 = vector.load %arg9[%c64, %c0_11] : memref<512x1024xbf16, #tpu.memory_space<vmem>>, vector<16x1024xbf16>
    tpu.vector_store %arg9[%c64, %c0_11], %14 {strides = array<i32>} : memref<512x1024xbf16, #tpu.memory_space<vmem>>, vector<16x1024xbf16>,
    %16 = vector.extract_strided_slice %5 {offsets = [0, 29], sizes = [16, 1024], strides = [1, 1]} : vector<16x1280xbf16> to vector<16x1024xbf16>
    %c80 = arith.constant 80 : index
    %c0_12 = arith.constant 0 : index
    %17 = vector.load %arg9[%c80, %c0_12] : memref<512x1024xbf16, #tpu.memory_space<vmem>>, vector<16x1024xbf16>
    tpu.vector_store %arg9[%c80, %c0_12], %16 {strides = array<i32>} : memref<512x1024xbf16, #tpu.memory_space<vmem>>, vector<16x1024xbf16>,
    %18 = vector.extract_strided_slice %5 {offsets = [0, 37], sizes = [16, 1024], strides = [1, 1]} : vector<16x1280xbf16> to vector<16x1024xbf16>
    %c96 = arith.constant 96 : index
    %c0_13 = arith.constant 0 : index
    %19 = vector.load %arg9[%c96, %c0_13] : memref<512x1024xbf16, #tpu.memory_space<vmem>>, vector<16x1024xbf16>
    tpu.vector_store %arg9[%c96, %c0_13], %18 {strides = array<i32>} : memref<512x1024xbf16, #tpu.memory_space<vmem>>, vector<16x1024xbf16>,
    %20 = vector.extract_strided_slice %5 {offsets = [0, 38], sizes = [16, 1024], strides = [1, 1]} : vector<16x1280xbf16> to vector<16x1024xbf16>
    %c112 = arith.constant 112 : index
    %c0_14 = arith.constant 0 : index
    %21 = vector.load %arg9[%c112, %c0_14] : memref<512x1024xbf16, #tpu.memory_space<vmem>>, vector<16x1024xbf16>
    tpu.vector_store %arg9[%c112, %c0_14], %20 {strides = array<i32>} : memref<512x1024xbf16, #tpu.memory_space<vmem>>, vector<16x1024xbf16>,
    %22 = vector.extract_strided_slice %5 {offsets = [0, 39], sizes = [16, 1024], strides = [1, 1]} : vector<16x1280xbf16> to vector<16x1024xbf16>
    %c128 = arith.constant 128 : index
    %c0_15 = arith.constant 0 : index
    %23 = vector.load %arg9[%c128, %c0_15] : memref<512x1024xbf16, #tpu.memory_space<vmem>>, vector<16x1024xbf16>
    tpu.vector_store %arg9[%c128, %c0_15], %22 {strides = array<i32>} : memref<512x1024xbf16, #tpu.memory_space<vmem>>, vector<16x1024xbf16>,
    %24 = vector.extract_strided_slice %5 {offsets = [0, 117], sizes = [16, 1024], strides = [1, 1]} : vector<16x1280xbf16> to vector<16x1024xbf16>
    %c144 = arith.constant 144 : index
    %c0_16 = arith.constant 0 : index
    %25 = vector.load %arg9[%c144, %c0_16] : memref<512x1024xbf16, #tpu.memory_space<vmem>>, vector<16x1024xbf16>
    tpu.vector_store %arg9[%c144, %c0_16], %24 {strides = array<i32>} : memref<512x1024xbf16, #tpu.memory_space<vmem>>, vector<16x1024xbf16>,
    %26 = vector.extract_strided_slice %5 {offsets = [0, 118], sizes = [16, 1024], strides = [1, 1]} : vector<16x1280xbf16> to vector<16x1024xbf16>
    %c160 = arith.constant 160 : index
    %c0_17 = arith.constant 0 : index
    %27 = vector.load %arg9[%c160, %c0_17] : memref<512x1024xbf16, #tpu.memory_space<vmem>>, vector<16x1024xbf16>
    tpu.vector_store %arg9[%c160, %c0_17], %26 {strides = array<i32>} : memref<512x1024xbf16, #tpu.memory_space<vmem>>, vector<16x1024xbf16>,
    %28 = vector.extract_strided_slice %5 {offsets = [0, 119], sizes = [16, 1024], strides = [1, 1]} : vector<16x1280xbf16> to vector<16x1024xbf16>
    %c176 = arith.constant 176 : index
    %c0_18 = arith.constant 0 : index
    %29 = vector.load %arg9[%c176, %c0_18] : memref<512x1024xbf16, #tpu.memory_space<vmem>>, vector<16x1024xbf16>
    tpu.vector_store %arg9[%c176, %c0_18], %28 {strides = array<i32>} : memref<512x1024xbf16, #tpu.memory_space<vmem>>, vector<16x1024xbf16>,
    %30 = vector.extract_strided_slice %5 {offsets = [0, 127], sizes = [16, 1024], strides = [1, 1]} : vector<16x1280xbf16> to vector<16x1024xbf16>
    %c192 = arith.constant 192 : index
    %c0_19 = arith.constant 0 : index
    %31 = vector.load %arg9[%c192, %c0_19] : memref<512x1024xbf16, #tpu.memory_space<vmem>>, vector<16x1024xbf16>
    tpu.vector_store %arg9[%c192, %c0_19], %30 {strides = array<i32>} : memref<512x1024xbf16, #tpu.memory_space<vmem>>, vector<16x1024xbf16>,
    %32 = vector.extract_strided_slice %5 {offsets = [0, 128], sizes = [16, 1024], strides = [1, 1]} : vector<16x1280xbf16> to vector<16x1024xbf16>
    %c208 = arith.constant 208 : index
    %c0_20 = arith.constant 0 : index
    %33 = vector.load %arg9[%c208, %c0_20] : memref<512x1024xbf16, #tpu.memory_space<vmem>>, vector<16x1024xbf16>
    tpu.vector_store %arg9[%c208, %c0_20], %32 {strides = array<i32>} : memref<512x1024xbf16, #tpu.memory_space<vmem>>, vector<16x1024xbf16>,
    %34 = vector.extract_strided_slice %5 {offsets = [0, 129], sizes = [16, 1024], strides = [1, 1]} : vector<16x1280xbf16> to vector<16x1024xbf16>
    %c224 = arith.constant 224 : index
    %c0_21 = arith.constant 0 : index
    %35 = vector.load %arg9[%c224, %c0_21] : memref<512x1024xbf16, #tpu.memory_space<vmem>>, vector<16x1024xbf16>
    tpu.vector_store %arg9[%c224, %c0_21], %34 {strides = array<i32>} : memref<512x1024xbf16, #tpu.memory_space<vmem>>, vector<16x1024xbf16>,
    %36 = vector.extract_strided_slice %5 {offsets = [0, 137], sizes = [16, 1024], strides = [1, 1]} : vector<16x1280xbf16> to vector<16x1024xbf16>
    %c240 = arith.constant 240 : index
    %c0_22 = arith.constant 0 : index
    %37 = vector.load %arg9[%c240, %c0_22] : memref<512x1024xbf16, #tpu.memory_space<vmem>>, vector<16x1024xbf16>
    tpu.vector_store %arg9[%c240, %c0_22], %36 {strides = array<i32>} : memref<512x1024xbf16, #tpu.memory_space<vmem>>, vector<16x1024xbf16>,
    %38 = vector.extract_strided_slice %5 {offsets = [0, 138], sizes = [16, 1024], strides = [1, 1]} : vector<16x1280xbf16> to vector<16x1024xbf16>
    %c256 = arith.constant 256 : index
    %c0_23 = arith.constant 0 : index
    %39 = vector.load %arg9[%c256, %c0_23] : memref<512x1024xbf16, #tpu.memory_space<vmem>>, vector<16x1024xbf16>
    tpu.vector_store %arg9[%c256, %c0_23], %38 {strides = array<i32>} : memref<512x1024xbf16, #tpu.memory_space<vmem>>, vector<16x1024xbf16>,
    %40 = vector.extract_strided_slice %5 {offsets = [0, 139], sizes = [16, 1024], strides = [1, 1]} : vector<16x1280xbf16> to vector<16x1024xbf16>
    %c272 = arith.constant 272 : index
    %c0_24 = arith.constant 0 : index
    %41 = vector.load %arg9[%c272, %c0_24] : memref<512x1024xbf16, #tpu.memory_space<vmem>>, vector<16x1024xbf16>
    tpu.vector_store %arg9[%c272, %c0_24], %40 {strides = array<i32>} : memref<512x1024xbf16, #tpu.memory_space<vmem>>, vector<16x1024xbf16>,
    %42 = vector.extract_strided_slice %5 {offsets = [0, 217], sizes = [16, 1024], strides = [1, 1]} : vector<16x1280xbf16> to vector<16x1024xbf16>
    %c288 = arith.constant 288 : index
    %c0_25 = arith.constant 0 : index
    %43 = vector.load %arg9[%c288, %c0_25] : memref<512x1024xbf16, #tpu.memory_space<vmem>>, vector<16x1024xbf16>
    tpu.vector_store %arg9[%c288, %c0_25], %42 {strides = array<i32>} : memref<512x1024xbf16, #tpu.memory_space<vmem>>, vector<16x1024xbf16>,
    %44 = vector.extract_strided_slice %5 {offsets = [0, 218], sizes = [16, 1024], strides = [1, 1]} : vector<16x1280xbf16> to vector<16x1024xbf16>
    %c304 = arith.constant 304 : index
    %c0_26 = arith.constant 0 : index
    %45 = vector.load %arg9[%c304, %c0_26] : memref<512x1024xbf16, #tpu.memory_space<vmem>>, vector<16x1024xbf16>
    tpu.vector_store %arg9[%c304, %c0_26], %44 {strides = array<i32>} : memref<512x1024xbf16, #tpu.memory_space<vmem>>, vector<16x1024xbf16>,
    %46 = vector.extract_strided_slice %5 {offsets = [0, 219], sizes = [16, 1024], strides = [1, 1]} : vector<16x1280xbf16> to vector<16x1024xbf16>
    %c320 = arith.constant 320 : index
    %c0_27 = arith.constant 0 : index
    %47 = vector.load %arg9[%c320, %c0_27] : memref<512x1024xbf16, #tpu.memory_space<vmem>>, vector<16x1024xbf16>
    tpu.vector_store %arg9[%c320, %c0_27], %46 {strides = array<i32>} : memref<512x1024xbf16, #tpu.memory_space<vmem>>, vector<16x1024xbf16>,
    %48 = vector.extract_strided_slice %5 {offsets = [0, 227], sizes = [16, 1024], strides = [1, 1]} : vector<16x1280xbf16> to vector<16x1024xbf16>
    %c336 = arith.constant 336 : index
    %c0_28 = arith.constant 0 : index
    %49 = vector.load %arg9[%c336, %c0_28] : memref<512x1024xbf16, #tpu.memory_space<vmem>>, vector<16x1024xbf16>
    tpu.vector_store %arg9[%c336, %c0_28], %48 {strides = array<i32>} : memref<512x1024xbf16, #tpu.memory_space<vmem>>, vector<16x1024xbf16>,
    %50 = vector.extract_strided_slice %5 {offsets = [0, 228], sizes = [16, 1024], strides = [1, 1]} : vector<16x1280xbf16> to vector<16x1024xbf16>
    %c352 = arith.constant 352 : index
    %c0_29 = arith.constant 0 : index
    %51 = vector.load %arg9[%c352, %c0_29] : memref<512x1024xbf16, #tpu.memory_space<vmem>>, vector<16x1024xbf16>
    tpu.vector_store %arg9[%c352, %c0_29], %50 {strides = array<i32>} : memref<512x1024xbf16, #tpu.memory_space<vmem>>, vector<16x1024xbf16>,
    %52 = vector.extract_strided_slice %5 {offsets = [0, 229], sizes = [16, 1024], strides = [1, 1]} : vector<16x1280xbf16> to vector<16x1024xbf16>
    %c368 = arith.constant 368 : index
    %c0_30 = arith.constant 0 : index
    %53 = vector.load %arg9[%c368, %c0_30] : memref<512x1024xbf16, #tpu.memory_space<vmem>>, vector<16x1024xbf16>
    tpu.vector_store %arg9[%c368, %c0_30], %52 {strides = array<i32>} : memref<512x1024xbf16, #tpu.memory_space<vmem>>, vector<16x1024xbf16>,
    %54 = vector.extract_strided_slice %5 {offsets = [0, 237], sizes = [16, 1024], strides = [1, 1]} : vector<16x1280xbf16> to vector<16x1024xbf16>
    %c384 = arith.constant 384 : index
    %c0_31 = arith.constant 0 : index
    %55 = vector.load %arg9[%c384, %c0_31] : memref<512x1024xbf16, #tpu.memory_space<vmem>>, vector<16x1024xbf16>
    tpu.vector_store %arg9[%c384, %c0_31], %54 {strides = array<i32>} : memref<512x1024xbf16, #tpu.memory_space<vmem>>, vector<16x1024xbf16>,
    %56 = vector.extract_strided_slice %5 {offsets = [0, 238], sizes = [16, 1024], strides = [1, 1]} : vector<16x1280xbf16> to vector<16x1024xbf16>
    %c400 = arith.constant 400 : index
    %c0_32 = arith.constant 0 : index
    %57 = vector.load %arg9[%c400, %c0_32] : memref<512x1024xbf16, #tpu.memory_space<vmem>>, vector<16x1024xbf16>
    tpu.vector_store %arg9[%c400, %c0_32], %56 {strides = array<i32>} : memref<512x1024xbf16, #tpu.memory_space<vmem>>, vector<16x1024xbf16>,
    %58 = vector.extract_strided_slice %5 {offsets = [0, 239], sizes = [16, 1024], strides = [1, 1]} : vector<16x1280xbf16> to vector<16x1024xbf16>
    %c416 = arith.constant 416 : index
    %c0_33 = arith.constant 0 : index
    %59 = vector.load %arg9[%c416, %c0_33] : memref<512x1024xbf16, #tpu.memory_space<vmem>>, vector<16x1024xbf16>
    tpu.vector_store %arg9[%c416, %c0_33], %58 {strides = array<i32>} : memref<512x1024xbf16, #tpu.memory_space<vmem>>, vector<16x1024xbf16>,
    %c0_34 = arith.constant 0 : index
    %c0_35 = arith.constant 0 : index
    %60 = vector.load %arg4[%c0_34, %c0_35] : memref<16x512xbf16, #tpu.memory_space<vmem>>, vector<16x512xbf16>
    %c0_36 = arith.constant 0 : index
    %c0_37 = arith.constant 0 : index
    %61 = vector.load %arg9[%c0_36, %c0_37] : memref<512x1024xbf16, #tpu.memory_space<vmem>>, vector<512x1024xbf16>
    %cst_38 = arith.constant dense<0.000000e+00> : vector<16x1024xf32>
    %62 = tpu.matmul %60, %61, %cst_38 {dimension_numbers = #tpu.dot_dimension_numbers<[1], [0], [0], [1], [0, 0, 1, 1], [], []>} : vector<16x512xbf16>, vector<512x1024xbf16>, vector<16x1024xf32> -> vector<16x1024xf32>
    %c0_39 = arith.constant 0 : index
    %c0_40 = arith.constant 0 : index
    %63 = vector.load %arg5[%c0_39, %c0_40] : memref<16x1xf32, #tpu.memory_space<vmem>>, vector<16x1xf32>
    %64 = vector.broadcast %63 : vector<16x1xf32> to vector<16x1024xf32>
    %65 = arith.mulf %62, %64 : vector<16x1024xf32>
    %c0_41 = arith.constant 0 : index
    %c0_42 = arith.constant 0 : index
    %66 = vector.load %arg6[%c0_41, %c0_42] : memref<16x1xf32, #tpu.memory_space<vmem>>, vector<16x1xf32>
    %67 = vector.broadcast %66 : vector<16x1xf32> to vector<16x1024xf32>
    %68 = arith.addf %65, %67 : vector<16x1024xf32>
    %cst_43 = arith.constant 0.000000e+00 : f32
    %69 = vector.broadcast %cst_43 : f32 to vector<16x1024xf32>
    %70 = arith.maximumf %68, %69 : vector<16x1024xf32>
    %c0_44 = arith.constant 0 : index
    %c0_45 = arith.constant 0 : index
    %71 = vector.load %arg7[%c0_44, %c0_45] : memref<1x1024xf32, #tpu.memory_space<vmem>>, vector<1x1024xf32>
    %72 = vector.broadcast %71 : vector<1x1024xf32> to vector<16x1024xf32>
    %73 = arith.mulf %70, %72 : vector<16x1024xf32>
    %74 = arith.truncf %73 : vector<16x1024xf32> to vector<16x1024xbf16>
    %c0_46 = arith.constant 0 : index
    %c0_47 = arith.constant 0 : index
    %75 = vector.load %arg8[%c0_46, %c0_47] : memref<16x1024xbf16, #tpu.memory_space<vmem>>, vector<16x1024xbf16>
    tpu.vector_store %arg8[%c0_46, %c0_47], %74 {strides = array<i32>} : memref<16x1024xbf16, #tpu.memory_space<vmem>>, vector<16x1024xbf16>,
    return
  }
  func.func @transform_0(%arg0: i32) -> (i32, i32) {
    %c8_i32 = arith.constant 8 : i32
    %0 = arith.muli %arg0, %c8_i32 : i32
    %c1_i32 = arith.constant 1 : i32
    %1 = arith.subi %0, %c1_i32 : i32
    %c0_i32 = arith.constant 0 : i32
    %2 = arith.maxsi %1, %c0_i32 : i32
    %c0_i32_0 = arith.constant 0 : i32
    %c0_i32_1 = arith.constant 0 : i32
    return %c0_i32_0, %2 : i32, i32
  }
  func.func @transform_1(%arg0: i32) -> (i32, i32) {
    %c0_i32 = arith.constant 0 : i32
    %c0_i32_0 = arith.constant 0 : i32
    return %c0_i32, %arg0 : i32, i32
  }
  func.func @transform_2(%arg0: i32) -> (i32, i32) {
    %c1_i32 = arith.constant 1 : i32
    %0 = arith.addi %arg0, %c1_i32 : i32
    %c8_i32 = arith.constant 8 : i32
    %1 = arith.muli %0, %c8_i32 : i32
    %c15_i32 = arith.constant 15 : i32
    %2 = arith.minsi %1, %c15_i32 : i32
    %c0_i32 = arith.constant 0 : i32
    %c0_i32_0 = arith.constant 0 : i32
    return %c0_i32, %2 : i32, i32
  }
  func.func @transform_3(%arg0: i32) -> (i32, i32) {
    %c0_i32 = arith.constant 0 : i32
    %c0_i32_0 = arith.constant 0 : i32
    %c0_i32_1 = arith.constant 0 : i32
    return %c0_i32, %c0_i32_0 : i32, i32
  }
  func.func @transform_4(%arg0: i32) -> (i32, i32) {
    %c0_i32 = arith.constant 0 : i32
    %c0_i32_0 = arith.constant 0 : i32
    %c0_i32_1 = arith.constant 0 : i32
    return %c0_i32, %c0_i32_0 : i32, i32
  }
  func.func @transform_5(%arg0: i32) -> (i32, i32) {
    %c0_i32 = arith.constant 0 : i32
    %c0_i32_0 = arith.constant 0 : i32
    %c0_i32_1 = arith.constant 0 : i32
    return %c0_i32, %c0_i32_0 : i32, i32
  }
  func.func @transform_6(%arg0: i32) -> (i32, i32) {
    %c0_i32 = arith.constant 0 : i32
    %c0_i32_0 = arith.constant 0 : i32
    return %c0_i32, %arg0 : i32, i32
  }
  func.func @transform_7(%arg0: i32) -> (i32, i32) {
    %c0_i32 = arith.constant 0 : i32
    %c0_i32_0 = arith.constant 0 : i32
    return %c0_i32, %arg0 : i32, i32
  }
}

</mosaic_0001>

<bundles_post_ra>
// kernel: tile.5
= control target key start
LH: loop header
LB: loop body
LE: loop exit
PB: predicated region body
PF: predicated region fallthrough
CT: control target
= control target key end

     0   :  { %vm10_vm0 = vcmask 15360   ;;  %vm28_vm1 = vcmask 48128   ;;  %vm24_vm2 = vcmask 31744   ;;  %s664_s18 = smov 126   ;;  %vm14_vm3 = vcmask 64512   ;;  %s49_s19 = smov 3  ;;  %s1153_s0 = inlined_call_operand.vmem [shape: f32[8,10,10], index: 0, kind: input, shape index: {}]   ;;  %s1154_s1 = inlined_call_operand.vmem [shape: f32[800], index: 1, kind: output, shape index: {}]  }
   0x1   :  { %v479_v0 = vld [vmem:[%s1153_s0 + $0x51] sm:$0x1]   ;;  %v487_v2 = vld [vmem:[%s1153_s0 + $0x25] sm:$0x1]   ;;  %v483_v5 = vld [vmem:[%s1153_s0 + $0x38] sm:$0x1]  }
   0x2   :  { %v480_v1 = vld [vmem:[%s1153_s0 + $0x51] sm:$0x1]   ;;  %v488_v4 = vld [vmem:[%s1153_s0 + $0x25] sm:$0x1]   ;;  %v484_v6 = vld [vmem:[%s1153_s0 + $0x38] sm:$0x1]  }
   0x3   :  { %v11_v3 = vsel %vm10_vm0, %v480_v1, %v479_v0  ;;  %v39_v7 = vsel %vm28_vm1, %v488_v4, %v487_v2  ;;  %s665_s20 = smov 122   ;;  %v25_v8 = vsel %vm24_vm2, %v484_v6, %v483_v5  ;;  %v491_v9 = vld [vmem:[%s1153_s0 + $0x12] ss:$100 sm:%s49_s19]   ;;  %s52_s23 = smov 3  ;;  %v494_v12 = vld [vmem:[%s1153_s0 + $0x63] sm:$0x1]  }
   0x4   :  { %12 = vrot.lane.b32.xlu0 %v11_v3, %s664_s18  ;;  %40 = vrot.lane.b32.xlu1 %v39_v7, %s665_s20  ;;  %v492_v10 = vld [vmem:[%s1153_s0 + $0x12] ss:$100 sm:%s52_s23]   ;;  %s666_s26 = smov 124   ;;  %s667_s27 = smov 120   ;;  %vm4_vm4 = vcmask 80896   ;;  %vm17_vm5 = vcmask 1048560  }
   0x5   :  { %v55_v11 = vsel %vm14_vm3, %v492_v10, %v491_v9  ;;  %v496_v13 = vld [vmem:[%s1153_s0 + $0x50] sm:$0x1]   ;;  %s668_s3 = smov 118   ;;  %s669_s4 = smov 116   ;;  %v498_v14 = vld [vmem:[%s1153_s0 + $0x37] sm:$0x1]  }
   0x6   :  { %v500_v15 = vld [vmem:[%s1153_s0 + $0x24] sm:$0x1]   ;;  %s92_s9 = smov 3  ;;  %s670_s10 = smov 114   ;;  %v503_v17 = vld [vmem:[%s1153_s0 + $0x62] sm:$0x1]  }
   0x7   :  { %s671_s11 = smov 112   ;;  %v502_v16 = vld [vmem:[%s1153_s0 + $0x11] ss:$100 sm:%s92_s9]   ;;  %s672_s16 = smov 110   ;;  %v507_v19 = vld [vmem:[%s1153_s0 + $0x36] sm:$0x1]  }
   0x8   :  { %26 = vrot.lane.b32.xlu0 %v25_v8, %s666_s26  ;;  %56 = vrot.lane.b32.xlu1 %v55_v11, %s667_s27  ;;  %s673_s17 = smov 108   ;;  %v505_v18 = vld [vmem:[%s1153_s0 + $0x49] sm:$0x1]   ;;  %s127_s22 = smov 3  ;;  %v509_v20 = vld [vmem:[%s1153_s0 + $0x23] sm:$0x1]  }
   0x9   :  { %s674_s23 = smov 106   ;;  %s675_s24 = smov 104   ;;  %v511_v21 = vld [vmem:[%s1153_s0 + $0x10] ss:$100 sm:%s127_s22]   ;;  %v512_v22 = vld [vmem:[%s1153_s0 + $0x61] sm:$0x1]  }
   0xa   :  { %s676_s29 = smov 102   ;;  %s677_s30 = smov 100   ;;  %v514_v23 = vld [vmem:[%s1153_s0 + $0x48] sm:$0x1]   ;;  %v516_v24 = vld [vmem:[%s1153_s0 + $0x35] sm:$0x1]  }
   0xb   :  { %s678_s6 = smov 98   ;;  %s679_s7 = smov 96   ;;  %v518_v25 = vld [vmem:[%s1153_s0 + $0x22] sm:$0x1]   ;;  %v521_v27 = vld [vmem:[%s1153_s0 + $0x60] sm:$0x1]  }
   0xc   :  { %65 = vrot.lane.b32.xlu0 %v494_v12, %s668_s3  ;;  %72 = vrot.lane.b32.xlu1 %v496_v13, %s669_s4  ;;  %s162_s12 = smov 3  ;;  %s680_s13 = smov 94   ;;  %v523_v28 = vld [vmem:[%s1153_s0 + $0x47] sm:$0x1]   ;;  %v525_v29 = vld [vmem:[%s1153_s0 + $0x34] sm:$0x1]  }
   0xd   :  { %s681_s14 = smov 92   ;;  %v520_v26 = vld [vmem:[%s1153_s0 + $0x9] ss:$106 sm:%s162_s12]   ;;  %s682_s19 = smov 90   ;;  %v527_v31 = vld [vmem:[%s1153_s0 + $0x21] sm:$0x1]  }
   0xe   :  { %s683_s20 = smov 88   ;;  %s197_s28 = smov 3  ;;  %v530_v33 = vld [vmem:[%s1153_s0 + $0x59] sm:$0x1]   ;;  %v532_v34 = vld [vmem:[%s1153_s0 + $0x46] sm:$0x1]  }
   0xf   :  { %s684_s2 = smov 86   ;;  %s685_s3 = smov 84   ;;  %v529_v32 = vld [vmem:[%s1153_s0 + $0x8] ss:$106 sm:%s197_s28]   ;;  %v534_v35 = vld [vmem:[%s1153_s0 + $0x33] sm:$0x1]  }
  0x10   :  { %79 = vrot.lane.b32.xlu0 %v498_v14, %s670_s10  ;;  %86 = vrot.lane.b32.xlu1 %v500_v15, %s671_s11  ;;  %s686_s8 = smov 82   ;;  %s687_s9 = smov 80   ;;  %v536_v36 = vld [vmem:[%s1153_s0 + $0x20] sm:$0x1]   ;;  %v539_v38 = vld [vmem:[%s1153_s0 + $0x58] sm:$0x1]  }
  0x11   :  { %s689_s15 = smov 76   ;;  %s690_s21 = smov 74   ;;  %v541_v39 = vld [vmem:[%s1153_s0 + $0x45] sm:$0x1]   ;;  %v543_v40 = vld [vmem:[%s1153_s0 + $0x32] sm:$0x1]  }
  0x12   :  { %s691_s22 = smov 72   ;;  %s692_s27 = smov 70   ;;  %v545_v41 = vld [vmem:[%s1153_s0 + $0x19] sm:$0x1]   ;;  %v548_v43 = vld [vmem:[%s1153_s0 + $0x57] sm:$0x1]  }
  0x13   :  { %s693_s28 = smov 68   ;;  %s267_s4 = smov 3  ;;  %v550_v44 = vld [vmem:[%s1153_s0 + $0x44] sm:$0x1]   ;;  %v552_v45 = vld [vmem:[%s1153_s0 + $0x31] sm:$0x1]  }
  0x14   :  { %94 = vrot.lane.b32.xlu0 %v502_v16, %s672_s16  ;;  %100 = vrot.lane.b32.xlu1 %v503_v17, %s673_s17  ;;  %s694_s5 = smov 66   ;;  %v547_v42 = vld [vmem:[%s1153_s0 + $0x6] ss:$106 sm:%s267_s4]   ;;  %s696_s11 = smov 62   ;;  %vm45_vm6 = vcmask 1048528   ;;  %vm31_vm7 = vcmask 1048544  }
  0x15   :  { %s697_s12 = smov 60   ;;  %s698_s17 = smov 58   ;;  %v554_v46 = vld [vmem:[%s1153_s0 + $0x18] sm:$0x1]   ;;  %v557_v48 = vld [vmem:[%s1153_s0 + $0x56] sm:$0x1]  }
  0x16   :  { %s699_s18 = smov 56   ;;  %s701_s25 = smov 52   ;;  %v559_v49 = vld [vmem:[%s1153_s0 + $0x43] sm:$0x1]   ;;  %v561_v50 = vld [vmem:[%s1153_s0 + $0x30] sm:$0x1]  }
  0x17   :  { %v563_v51 = vld [vmem:[%s1153_s0 + $0x17] sm:$0x1]   ;;  %v566_v53 = vld [vmem:[%s1153_s0 + $0x55] sm:$0x1]   ;;  %v568_v54 = vld [vmem:[%s1153_s0 + $0x42] sm:$0x1]  }
  0x18   :  { %107 = vrot.lane.b32.xlu0 %v505_v18, %s674_s23  ;;  %114 = vrot.lane.b32.xlu1 %v507_v19, %s675_s24  ;;  %s2_s23 = smov 3  ;;  %s700_s24 = smov 54   ;;  %v570_v55 = vld [vmem:[%s1153_s0 + $0x29] sm:$0x1]   ;;  %v572_v56 = vld [vmem:[%s1153_s0 + $0x16] sm:$0x1]  }
  0x19   :  { %v3_v30 = vld [vmem:[%s1153_s0] ss:$100 sm:%s2_s23]   ;;  %s302_s23 = smov 3  ;;  %s372_s26 = smov 3  ;;  %v577_v59 = vld [vmem:[%s1153_s0 + $0x41] sm:$0x1]  }
  0x1a   :  { %5 = vst.msk [vmem:[%s1154_s1] ss:$5 sm:$0x3] %vm4_vm4, %v3_v30   ;;  %v556_v47 = vld [vmem:[%s1153_s0 + $0x5] ss:$100 sm:%s302_s23]   ;;  %s712_s4 = smov 30  }
  0x1b   :  { %v574_v57 = vld [vmem:[%s1153_s0 + $0x3] ss:$100 sm:%s372_s26]   ;;  %v575_v58 = vld [vmem:[%s1153_s0 + $0x54] sm:$0x1]   ;;  %v579_v60 = vld [vmem:[%s1153_s0 + $0x28] sm:$0x1]  }
  0x1c   :  { %121 = vrot.lane.b32.xlu0 %v509_v20, %s676_s29  ;;  %129 = vrot.lane.b32.xlu1 %v511_v21, %s677_s30  ;;  %s702_s30 = smov 50   ;;  %s400_s10 = smov 3  ;;  %v584_v63 = vld [vmem:[%s1153_s0 + $0x53] sm:$0x1]   ;;  %v586_v0 = vld [vmem:[%s1153_s0 + $0x40] sm:$0x1]  }
  0x1d   :  { %v581_v61 = vld [vmem:[%s1153_s0 + $0x15] ss:$100 sm:%s400_s10]   ;;  %s719_s26 = smov 16   ;;  %v588_v1 = vld [vmem:[%s1153_s0 + $0x27] sm:$0x1]   ;;  %s723_s16 = smov 8  }
  0x1e   :  { %v593_v5 = vld [vmem:[%s1153_s0 + $0x52] sm:$0x1]   ;;  %v595_v7 = vld [vmem:[%s1153_s0 + $0x39] sm:$0x1]   ;;  %vm61_vm8 = vcmask 1048512   ;;  %vm67_vm9 = vcmask 1048496  }
  0x1f   :  { %v597_v9 = vld [vmem:[%s1153_s0 + $0x26] sm:$0x1]   ;;  %vm74_vm10 = vcmask 1032096   ;;  %vm81_vm11 = vcmask 1015696   ;;  %vm88_vm12 = vcmask 999296   ;;  %vm96_vm13 = vcmask 982896  }
  0x20   :  { %135 = vrot.lane.b32.xlu0 %v512_v22, %s678_s6  ;;  %142 = vrot.lane.b32.xlu1 %v514_v23, %s679_s7  ;;  %s695_s6 = smov 64   ;;  %s337_s7 = smov 3  ;;  %vm102_vm14 = vcmask 966496   ;;  %vm109_vm15 = vcmask 950096   ;;  %vm144_vm4 = vcmask 868096  }
  0x21   :  { %v565_v52 = vld [vmem:[%s1153_s0 + $0x4] ss:$100 sm:%s337_s7]  }
  0x24   :  { %149 = vrot.lane.b32.xlu0 %v516_v24, %s680_s13  ;;  %156 = vrot.lane.b32.xlu1 %v518_v25, %s681_s14  ;;  %s688_s14 = smov 78   ;;  %s715_s13 = smov 24  }
  0x28   :  { %164 = vrot.lane.b32.xlu0 %v520_v26, %s682_s19  ;;  %170 = vrot.lane.b32.xlu1 %v521_v27, %s683_s20  ;;  %s232_s20 = smov 3  ;;  %s717_s19 = smov 20  }
  0x29   :  { %v538_v37 = vld [vmem:[%s1153_s0 + $0x7] ss:$106 sm:%s232_s20]   ;;  %s708_s20 = smov 38  }
  0x2c   :  { %177 = vrot.lane.b32.xlu0 %v523_v28, %s684_s2  ;;  %184 = vrot.lane.b32.xlu1 %v525_v29, %s685_s3  ;;  %s703_s2 = smov 48   ;;  %s720_s3 = smov 14  }
  0x30   :  { %191 = vrot.lane.b32.xlu0 %v527_v31, %s686_s8  ;;  %199 = vrot.lane.b32.xlu1 %v529_v32, %s687_s9  ;;  %s704_s8 = smov 46   ;;  %s705_s9 = smov 44  }
  0x34   :  { %205 = vrot.lane.b32.xlu0 %v530_v33, %s688_s14  ;;  %212 = vrot.lane.b32.xlu1 %v532_v34, %s689_s15  ;;  %s706_s14 = smov 42   ;;  %s707_s15 = smov 40  }
  0x38   :  { %219 = vrot.lane.b32.xlu0 %v534_v35, %s690_s21  ;;  %226 = vrot.lane.b32.xlu1 %v536_v36, %s691_s22  ;;  %s709_s21 = smov 36  }
  0x3c   :  { %234 = vrot.lane.b32.xlu0 %v538_v37, %s692_s27  ;;  %240 = vrot.lane.b32.xlu1 %v539_v38, %s693_s28  ;;  %s710_s27 = smov 34   ;;  %s711_s28 = smov 32  }
  0x40   :  { %247 = vrot.lane.b32.xlu0 %v541_v39, %s694_s5  ;;  %254 = vrot.lane.b32.xlu1 %v543_v40, %s695_s6  ;;  %s713_s5 = smov 28  }
  0x44   :  { %261 = vrot.lane.b32.xlu0 %v545_v41, %s696_s11  ;;  %269 = vrot.lane.b32.xlu1 %v547_v42, %s697_s12  ;;  %s408_s11 = smov 3  ;;  %s714_s12 = smov 26  }
  0x45   :  { %v583_v62 = vld [vmem:[%s1153_s0 + $0x2] ss:$100 sm:%s408_s11]  }
  0x48   :  { %275 = vrot.lane.b32.xlu0 %v548_v43, %s698_s17  ;;  %282 = vrot.lane.b32.xlu1 %v550_v44, %s699_s18  ;;  %s716_s18 = smov 22  }
  0x4c   :  { %289 = vrot.lane.b32.xlu0 %v552_v45, %s700_s24  ;;  %296 = vrot.lane.b32.xlu1 %v554_v46, %s701_s25  ;;  %s436_s24 = smov 3  ;;  %s718_s25 = smov 18  }
  0x4d   :  { %v590_v2 = vld [vmem:[%s1153_s0 + $0x14] ss:$100 sm:%s436_s24]  }
  0x50   :  { %304 = vrot.lane.b32.xlu0 %v556_v47, %s702_s30  ;;  %310 = vrot.lane.b32.xlu1 %v557_v48, %s703_s2  ;;  %s444_s2 = smov 3 }
  0x51   :  { %v592_v3 = vld [vmem:[%s1153_s0 + $0x1] ss:$100 sm:%s444_s2]  }
  0x54   :  { %317 = vrot.lane.b32.xlu0 %v559_v49, %s704_s8  ;;  %324 = vrot.lane.b32.xlu1 %v561_v50, %s705_s9  ;;  %s726_s8 = smov 2  }
  0x58   :  { %331 = vrot.lane.b32.xlu0 %v563_v51, %s706_s14  ;;  %339 = vrot.lane.b32.xlu1 %v565_v52, %s707_s15 }
  0x5c   :  { %345 = vrot.lane.b32.xlu0 %v566_v53, %s708_s20  ;;  %352 = vrot.lane.b32.xlu1 %v568_v54, %s709_s21  ;;  %s472_s21 = smov 3 }
  0x5d   :  { %v599_v11 = vld [vmem:[%s1153_s0 + $0x13] ss:$100 sm:%s472_s21]  }
  0x60   :  { %359 = vrot.lane.b32.xlu0 %v570_v55, %s710_s27  ;;  %366 = vrot.lane.b32.xlu1 %v572_v56, %s711_s28  ;;  %s724_s28 = smov 6  }
  0x64   :  { %374 = vrot.lane.b32.xlu0 %v574_v57, %s712_s4  ;;  %380 = vrot.lane.b32.xlu1 %v575_v58, %s713_s5  ;;  %s721_s4 = smov 12  }
  0x68   :  { %387 = vrot.lane.b32.xlu0 %v577_v59, %s714_s12  ;;  %394 = vrot.lane.b32.xlu1 %v579_v60, %s715_s13  ;;  %s722_s13 = smov 10  }
  0x6c   :  { %402 = vrot.lane.b32.xlu0 %v581_v61, %s716_s18  ;;  %410 = vrot.lane.b32.xlu1 %v583_v62, %s717_s19 }
  0x70   :  { %416 = vrot.lane.b32.xlu0 %v584_v63, %s718_s25  ;;  %423 = vrot.lane.b32.xlu1 %v586_v0, %s719_s26 }
  0x74   :  { %430 = vrot.lane.b32.xlu0 %v588_v1, %s720_s3  ;;  %438 = vrot.lane.b32.xlu1 %v590_v2, %s721_s4  ;;  %s725_s4 = smov 4  }
  0x76   :  { %v13_v4 = vpop.permute.xlu0 %12   ;;  %v41_v6 = vpop.permute.xlu1 %40  }
  0x77   :  { %481 = vst.msk [vmem:[%s1154_s1 + $0x4] sm:$0x1] %vm14_vm3, %v13_v4   ;;  %vm137_vm3 = vcmask 884496  }
  0x78   :  { %482 = vst.msk [vmem:[%s1154_s1 + $0x3] sm:$0x1] %vm17_vm5, %v13_v4   ;;  %446 = vrot.lane.b32.xlu0 %v592_v3, %s722_s13  ;;  %452 = vrot.lane.b32.xlu1 %v593_v5, %s723_s16  ;;  %vm151_vm5 = vcmask 851696  }
  0x79   :  { %490 = vst.msk [vmem:[%s1154_s1 + $0x1] sm:$0x1] %vm45_vm6, %v41_v6   ;;  %vm158_vm6 = vcmask 835296  }
  0x7a   :  { %v27_v8 = vpop.permute.xlu0 %26   ;;  %v57_v10 = vpop.permute.xlu1 %56  }
  0x7b   :  { %485 = vst.msk [vmem:[%s1154_s1 + $0x3] sm:$0x1] %vm28_vm1, %v27_v8   ;;  %vm123_vm1 = vcmask 917296  }
  0x7c   :  { %486 = vst.msk [vmem:[%s1154_s1 + $0x2] sm:$0x1] %vm31_vm7, %v27_v8   ;;  %459 = vrot.lane.b32.xlu0 %v595_v7, %s724_s28  ;;  %466 = vrot.lane.b32.xlu1 %v597_v9, %s725_s4  ;;  %vm166_vm7 = vcmask 818896  }
  0x7d   :  { %489 = vst.msk [vmem:[%s1154_s1 + $0x2] sm:$0x1] %vm24_vm2, %v41_v6   ;;  %vm131_vm2 = vcmask 900896  }
  0x7e   :  { %493 = vst.msk [vmem:[%s1154_s1 + $0x1] ss:$5 sm:$0x3] %vm10_vm0, %v57_v10   ;;  %v66_v12 = vpop.permute.xlu0 %65   ;;  %v73_v13 = vpop.permute.xlu1 %72   ;;  %vm116_vm0 = vcmask 933696  }
  0x7f   :  { %62 = vst.msk [vmem:[%s1154_s1] ss:$5 sm:$0x3] %vm61_vm8, %v57_v10   ;;  %vm172_vm8 = vcmask 802496  }
  0x80   :  { %495 = vst.msk [vmem:[%s1154_s1 + $0x4] sm:$0x1] %vm67_vm9, %v66_v12   ;;  %474 = vrot.lane.b32.xlu0 %v599_v11, %s726_s8  ;;  %vm179_vm9 = vcmask 786096  }
  0x81   :  { %497 = vst.msk [vmem:[%s1154_s1 + $0x3] sm:$0x1] %vm74_vm10, %v73_v13   ;;  %vm186_vm10 = vcmask 769696  }
  0x82   :  { %v80_v14 = vpop.permute.xlu0 %79   ;;  %v87_v15 = vpop.permute.xlu1 %86  }
  0x83   :  { %499 = vst.msk [vmem:[%s1154_s1 + $0x2] sm:$0x1] %vm81_vm11, %v80_v14   ;;  %vm193_vm11 = vcmask 753296  }
  0x84   :  { %501 = vst.msk [vmem:[%s1154_s1 + $0x1] sm:$0x1] %vm88_vm12, %v87_v15   ;;  %vm201_vm12 = vcmask 736896  }
  0x86   :  { %v95_v16 = vpop.permute.xlu0 %94   ;;  %v101_v17 = vpop.permute.xlu1 %100  }
  0x87   :  { %97 = vst.msk [vmem:[%s1154_s1] ss:$5 sm:$0x3] %vm96_vm13, %v95_v16   ;;  %vm207_vm13 = vcmask 720496  }
  0x88   :  { %504 = vst.msk [vmem:[%s1154_s1 + $0x4] sm:$0x1] %vm102_vm14, %v101_v17   ;;  %vm214_vm14 = vcmask 704096  }
  0x8a   :  { %v108_v18 = vpop.permute.xlu0 %107   ;;  %v115_v19 = vpop.permute.xlu1 %114  }
  0x8b   :  { %506 = vst.msk [vmem:[%s1154_s1 + $0x3] sm:$0x1] %vm109_vm15, %v108_v18   ;;  %vm221_vm15 = vcmask 687696  }
  0x8c   :  { %508 = vst.msk [vmem:[%s1154_s1 + $0x2] sm:$0x1] %vm116_vm0, %v115_v19   ;;  %vm228_vm0 = vcmask 671296  }
  0x8e   :  { %v122_v20 = vpop.permute.xlu0 %121   ;;  %v130_v21 = vpop.permute.xlu1 %129  }
  0x8f   :  { %510 = vst.msk [vmem:[%s1154_s1 + $0x1] sm:$0x1] %vm123_vm1, %v122_v20   ;;  %vm236_vm1 = vcmask 654896  }
  0x90   :  { %132 = vst.msk [vmem:[%s1154_s1] ss:$5 sm:$0x3] %vm131_vm2, %v130_v21   ;;  %vm242_vm2 = vcmask 638496  }
  0x92   :  { %v136_v22 = vpop.permute.xlu0 %135   ;;  %v143_v23 = vpop.permute.xlu1 %142  }
  0x93   :  { %513 = vst.msk [vmem:[%s1154_s1 + $0x4] sm:$0x1] %vm137_vm3, %v136_v22   ;;  %vm249_vm3 = vcmask 622096  }
  0x94   :  { %515 = vst.msk [vmem:[%s1154_s1 + $0x3] sm:$0x1] %vm144_vm4, %v143_v23   ;;  %vm256_vm4 = vcmask 605696  }
  0x96   :  { %v150_v24 = vpop.permute.xlu0 %149   ;;  %v157_v25 = vpop.permute.xlu1 %156  }
  0x97   :  { %517 = vst.msk [vmem:[%s1154_s1 + $0x2] sm:$0x1] %vm151_vm5, %v150_v24   ;;  %vm263_vm5 = vcmask 589296  }
  0x98   :  { %519 = vst.msk [vmem:[%s1154_s1 + $0x1] sm:$0x1] %vm158_vm6, %v157_v25   ;;  %vm271_vm6 = vcmask 572896  }
  0x9a   :  { %v165_v26 = vpop.permute.xlu0 %164   ;;  %v171_v27 = vpop.permute.xlu1 %170  }
  0x9b   :  { %167 = vst.msk [vmem:[%s1154_s1] ss:$5 sm:$0x3] %vm166_vm7, %v165_v26   ;;  %vm277_vm7 = vcmask 556496  }
  0x9c   :  { %522 = vst.msk [vmem:[%s1154_s1 + $0x4] sm:$0x1] %vm172_vm8, %v171_v27   ;;  %vm284_vm8 = vcmask 540096  }
  0x9e   :  { %v178_v28 = vpop.permute.xlu0 %177   ;;  %v185_v29 = vpop.permute.xlu1 %184  }
  0x9f   :  { %524 = vst.msk [vmem:[%s1154_s1 + $0x3] sm:$0x1] %vm179_vm9, %v178_v28   ;;  %vm291_vm9 = vcmask 523696  }
  0xa0   :  { %526 = vst.msk [vmem:[%s1154_s1 + $0x2] sm:$0x1] %vm186_vm10, %v185_v29   ;;  %vm298_vm10 = vcmask 507296  }
  0xa2   :  { %v192_v30 = vpop.permute.xlu0 %191   ;;  %v200_v31 = vpop.permute.xlu1 %199  }
  0xa3   :  { %528 = vst.msk [vmem:[%s1154_s1 + $0x1] sm:$0x1] %vm193_vm11, %v192_v30   ;;  %vm306_vm11 = vcmask 490896  }
  0xa4   :  { %202 = vst.msk [vmem:[%s1154_s1] ss:$5 sm:$0x3] %vm201_vm12, %v200_v31   ;;  %vm312_vm12 = vcmask 474496  }
  0xa6   :  { %v206_v32 = vpop.permute.xlu0 %205   ;;  %v213_v33 = vpop.permute.xlu1 %212  }
  0xa7   :  { %531 = vst.msk [vmem:[%s1154_s1 + $0x4] sm:$0x1] %vm207_vm13, %v206_v32   ;;  %vm319_vm13 = vcmask 458096  }
  0xa8   :  { %533 = vst.msk [vmem:[%s1154_s1 + $0x3] sm:$0x1] %vm214_vm14, %v213_v33   ;;  %vm326_vm14 = vcmask 441696  }
  0xaa   :  { %v220_v34 = vpop.permute.xlu0 %219   ;;  %v227_v35 = vpop.permute.xlu1 %226  }
  0xab   :  { %535 = vst.msk [vmem:[%s1154_s1 + $0x2] sm:$0x1] %vm221_vm15, %v220_v34   ;;  %vm333_vm15 = vcmask 425296  }
  0xac   :  { %537 = vst.msk [vmem:[%s1154_s1 + $0x1] sm:$0x1] %vm228_vm0, %v227_v35   ;;  %vm341_vm0 = vcmask 408896  }
  0xae   :  { %v235_v36 = vpop.permute.xlu0 %234   ;;  %v241_v37 = vpop.permute.xlu1 %240  }
  0xaf   :  { %237 = vst.msk [vmem:[%s1154_s1] ss:$5 sm:$0x3] %vm236_vm1, %v235_v36   ;;  %vm347_vm1 = vcmask 392496  }
  0xb0   :  { %540 = vst.msk [vmem:[%s1154_s1 + $0x4] sm:$0x1] %vm242_vm2, %v241_v37   ;;  %vm354_vm2 = vcmask 376096  }
  0xb2   :  { %v248_v38 = vpop.permute.xlu0 %247   ;;  %v255_v39 = vpop.permute.xlu1 %254  }
  0xb3   :  { %542 = vst.msk [vmem:[%s1154_s1 + $0x3] sm:$0x1] %vm249_vm3, %v248_v38   ;;  %vm361_vm3 = vcmask 359696  }
  0xb4   :  { %544 = vst.msk [vmem:[%s1154_s1 + $0x2] sm:$0x1] %vm256_vm4, %v255_v39   ;;  %vm368_vm4 = vcmask 343296  }
  0xb6   :  { %v262_v40 = vpop.permute.xlu0 %261   ;;  %v270_v41 = vpop.permute.xlu1 %269  }
  0xb7   :  { %546 = vst.msk [vmem:[%s1154_s1 + $0x1] sm:$0x1] %vm263_vm5, %v262_v40   ;;  %vm376_vm5 = vcmask 326896  }
  0xb8   :  { %272 = vst.msk [vmem:[%s1154_s1] ss:$5 sm:$0x3] %vm271_vm6, %v270_v41   ;;  %vm382_vm6 = vcmask 310496  }
  0xba   :  { %v276_v42 = vpop.permute.xlu0 %275   ;;  %v283_v43 = vpop.permute.xlu1 %282  }
  0xbb   :  { %549 = vst.msk [vmem:[%s1154_s1 + $0x4] sm:$0x1] %vm277_vm7, %v276_v42   ;;  %vm389_vm7 = vcmask 294096  }
  0xbc   :  { %551 = vst.msk [vmem:[%s1154_s1 + $0x3] sm:$0x1] %vm284_vm8, %v283_v43   ;;  %vm396_vm8 = vcmask 277696  }
  0xbe   :  { %v290_v44 = vpop.permute.xlu0 %289   ;;  %v297_v45 = vpop.permute.xlu1 %296  }
  0xbf   :  { %553 = vst.msk [vmem:[%s1154_s1 + $0x2] sm:$0x1] %vm291_vm9, %v290_v44   ;;  %vm404_vm9 = vcmask 261296  }
  0xc0   :  { %555 = vst.msk [vmem:[%s1154_s1 + $0x1] sm:$0x1] %vm298_vm10, %v297_v45   ;;  %vm412_vm10 = vcmask 244896  }
  0xc2   :  { %v305_v46 = vpop.permute.xlu0 %304   ;;  %v311_v47 = vpop.permute.xlu1 %310  }
  0xc3   :  { %307 = vst.msk [vmem:[%s1154_s1] ss:$5 sm:$0x3] %vm306_vm11, %v305_v46   ;;  %vm418_vm11 = vcmask 228496  }
  0xc4   :  { %558 = vst.msk [vmem:[%s1154_s1 + $0x4] sm:$0x1] %vm312_vm12, %v311_v47   ;;  %vm425_vm12 = vcmask 212096  }
  0xc6   :  { %v318_v48 = vpop.permute.xlu0 %317   ;;  %v325_v49 = vpop.permute.xlu1 %324  }
  0xc7   :  { %560 = vst.msk [vmem:[%s1154_s1 + $0x3] sm:$0x1] %vm319_vm13, %v318_v48   ;;  %vm432_vm13 = vcmask 195696  }
  0xc8   :  { %562 = vst.msk [vmem:[%s1154_s1 + $0x2] sm:$0x1] %vm326_vm14, %v325_v49   ;;  %vm440_vm14 = vcmask 179296  }
  0xca   :  { %v332_v50 = vpop.permute.xlu0 %331   ;;  %v340_v51 = vpop.permute.xlu1 %339  }
  0xcb   :  { %564 = vst.msk [vmem:[%s1154_s1 + $0x1] sm:$0x1] %vm333_vm15, %v332_v50   ;;  %vm448_vm15 = vcmask 162896  }
  0xcc   :  { %342 = vst.msk [vmem:[%s1154_s1] ss:$5 sm:$0x3] %vm341_vm0, %v340_v51   ;;  %vm454_vm0 = vcmask 146496  }
  0xce   :  { %v346_v52 = vpop.permute.xlu0 %345   ;;  %v353_v53 = vpop.permute.xlu1 %352  }
  0xcf   :  { %567 = vst.msk [vmem:[%s1154_s1 + $0x4] sm:$0x1] %vm347_vm1, %v346_v52   ;;  %vm461_vm1 = vcmask 130096  }
  0xd0   :  { %569 = vst.msk [vmem:[%s1154_s1 + $0x3] sm:$0x1] %vm354_vm2, %v353_v53   ;;  %vm468_vm2 = vcmask 113696  }
  0xd2   :  { %v360_v54 = vpop.permute.xlu0 %359   ;;  %v367_v55 = vpop.permute.xlu1 %366  }
  0xd3   :  { %571 = vst.msk [vmem:[%s1154_s1 + $0x2] sm:$0x1] %vm361_vm3, %v360_v54   ;;  %vm476_vm3 = vcmask 97296  }
  0xd4   :  { %573 = vst.msk [vmem:[%s1154_s1 + $0x1] sm:$0x1] %vm368_vm4, %v367_v55  }
  0xd6   :  { %v375_v56 = vpop.permute.xlu0 %374   ;;  %v381_v57 = vpop.permute.xlu1 %380  }
  0xd7   :  { %377 = vst.msk [vmem:[%s1154_s1] ss:$5 sm:$0x3] %vm376_vm5, %v375_v56  }
  0xd8   :  { %576 = vst.msk [vmem:[%s1154_s1 + $0x4] sm:$0x1] %vm382_vm6, %v381_v57  }
  0xda   :  { %v388_v58 = vpop.permute.xlu0 %387   ;;  %v395_v59 = vpop.permute.xlu1 %394  }
  0xdb   :  { %578 = vst.msk [vmem:[%s1154_s1 + $0x3] sm:$0x1] %vm389_vm7, %v388_v58  }
  0xdc   :  { %580 = vst.msk [vmem:[%s1154_s1 + $0x2] sm:$0x1] %vm396_vm8, %v395_v59  }
  0xde   :  { %v403_v60 = vpop.permute.xlu0 %402   ;;  %v411_v61 = vpop.permute.xlu1 %410  }
  0xdf   :  { %582 = vst.msk [vmem:[%s1154_s1 + $0x1] ss:$5 sm:$0x3] %vm404_vm9, %v403_v60  }
  0xe0   :  { %413 = vst.msk [vmem:[%s1154_s1] ss:$5 sm:$0x3] %vm412_vm10, %v411_v61  }
  0xe2   :  { %v417_v62 = vpop.permute.xlu0 %416   ;;  %v424_v63 = vpop.permute.xlu1 %423  }
  0xe3   :  { %585 = vst.msk [vmem:[%s1154_s1 + $0x4] sm:$0x1] %vm418_vm11, %v417_v62  }
  0xe4   :  { %587 = vst.msk [vmem:[%s1154_s1 + $0x3] sm:$0x1] %vm425_vm12, %v424_v63  }
  0xe6   :  { %v431_v0 = vpop.permute.xlu0 %430   ;;  %v439_v1 = vpop.permute.xlu1 %438  }
  0xe7   :  { %589 = vst.msk [vmem:[%s1154_s1 + $0x2] sm:$0x1] %vm432_vm13, %v431_v0  }
  0xe8   :  { %591 = vst.msk [vmem:[%s1154_s1 + $0x1] ss:$5 sm:$0x3] %vm440_vm14, %v439_v1  }
  0xea   :  { %v447_v2 = vpop.permute.xlu0 %446   ;;  %v453_v3 = vpop.permute.xlu1 %452  }
  0xeb   :  { %449 = vst.msk [vmem:[%s1154_s1] ss:$5 sm:$0x3] %vm448_vm15, %v447_v2  }
  0xec   :  { %594 = vst.msk [vmem:[%s1154_s1 + $0x4] sm:$0x1] %vm454_vm0, %v453_v3  }
  0xee   :  { %v460_v4 = vpop.permute.xlu0 %459   ;;  %v467_v5 = vpop.permute.xlu1 %466  }
  0xef   :  { %596 = vst.msk [vmem:[%s1154_s1 + $0x3] sm:$0x1] %vm461_vm1, %v460_v4  }
  0xf0   :  { %598 = vst.msk [vmem:[%s1154_s1 + $0x2] sm:$0x1] %vm468_vm2, %v467_v5  }
  0xf2   :  { %v475_v6 = vpop.permute.xlu0 %474  }
  0xf3   :  { %600 = vst.msk [vmem:[%s1154_s1 + $0x1] ss:$5 sm:$0x3] %vm476_vm3, %v475_v6  }

// kernel: tile.6
= control target key start
LH: loop header
LB: loop body
LE: loop exit
PB: predicated region body
PF: predicated region fallthrough
CT: control target
= control target key end

     0   :  { %s94_s0 = inlined_call_operand.vmem [shape: f32[800], index: 0, kind: input, shape index: {}]   ;;  %s95_s1 = inlined_call_operand.vmem [shape: f32[2,800], index: 1, kind: output, shape index: {}]  }
   0x1   :  { %v4_v0 = vld [vmem:[%s94_s0] ss:$0 sm:$0xff]  ;;  %v30_v1 = vld [vmem:[%s94_s0 + $0x1] ss:$0 sm:$0xff]  ;;  %v32_v2 = vld [vmem:[%s94_s0 + $0x2] ss:$0 sm:$0xff] }
   0x2   :  { %5 = vst [vmem:[%s95_s1] sm:$0x3] %v4_v0  ;;  %31 = vst [vmem:[%s95_s1 + $0x2] sm:$0x3] %v30_v1  ;;  %v34_v3 = vld [vmem:[%s94_s0 + $0x3] ss:$0 sm:$0xff] }
   0x3   :  { %33 = vst [vmem:[%s95_s1 + $0x4] sm:$0x3] %v32_v2  ;;  %v36_v4 = vld [vmem:[%s94_s0 + $0x4] ss:$0 sm:$0xff]  ;;  %v38_v5 = vld [vmem:[%s94_s0 + $0x5] ss:$0 sm:$0xff] }
   0x4   :  { %35 = vst [vmem:[%s95_s1 + $0x6] sm:$0x3] %v34_v3  ;;  %37 = vst [vmem:[%s95_s1 + $0x8] sm:$0x3] %v36_v4  ;;  %v40_v6 = vld [vmem:[%s94_s0 + $0x6] ss:$0 sm:$0xff] }
   0x5   :  { %39 = vst [vmem:[%s95_s1 + $0xa] sm:$0x3] %v38_v5  ;;  %41 = vst [vmem:[%s95_s1 + $0xc] sm:$0x3] %v40_v6 }

// kernel: tile.7
= control target key start
LH: loop header
LB: loop body
LE: loop exit
PB: predicated region body
PF: predicated region fallthrough
CT: control target
= control target key end

     0   :  { %vm44_vm0 = vcmask 1045508   ;;  %vm38_vm1 = vcmask 261120   ;;  %vm56_vm2 = vcmask 785408   ;;  %s42_s20 = smov 48  ;;  %s69_s21 = smov 48  ;;  %vm63_vm3 = vcmask 523520   ;;  %s146_s0 = inlined_call_operand.vmem [shape: f32[2,800], index: 0, kind: input, shape index: {}]   ;;  %s147_s1 = inlined_call_operand.vmem [shape: f32[1600], index: 1, kind: output, shape index: {}]  }
   0x1   :  { %v83_v0 = vld [vmem:[%s146_s0 + $0xc] sm:$0x3]  ;;  %v84_v1 = vld [vmem:[%s146_s0 + $0xa] sm:$0x3]  ;;  %v85_v2 = vld [vmem:[%s146_s0 + $0x8] sm:$0x3] }
   0x2   :  { %9 = vst [vmem:[#allocation0 + $0x30] sm:$0x3] %v83_v0  ;;  %14 = vst [vmem:[#allocation0 + $0x28] sm:$0x3] %v84_v1  ;;  %v86_v3 = vld [vmem:[%s146_s0 + $0x6] sm:$0x3] }
   0x3   :  { %19 = vst [vmem:[#allocation0 + $0x20] sm:$0x3] %v85_v2  ;;  %v87_v4 = vld [vmem:[%s146_s0 + $0x4] sm:$0x3]  ;;  %v88_v5 = vld [vmem:[%s146_s0 + $0x2] sm:$0x3] }
   0x4   :  { %24 = vst [vmem:[#allocation0 + $0x18] sm:$0x3] %v86_v3  ;;  %29 = vst [vmem:[#allocation0 + $0x10] sm:$0x3] %v87_v4  ;;  %v34_v6 = vld [vmem:[%s146_s0] sm:$0x3] }
   0x5   :  { %33 = vst [vmem:[#allocation0 + $0x8] sm:$0x3] %v88_v5  ;;  %35 = vst [vmem:[#allocation0] sm:$0x3] %v34_v6  ;;  %s50_s0 = smov 48  ;;  %s94_s24 = smov 32  }
   0x6   :  { %vm75_vm4 = vcmask 1047808  }
   0x9   :  { %v37_v7 = vld [vmem:[#allocation0 + $0x30] sm:$0x1]   ;;  %v55_v8 = vld [vmem:[#allocation0 + $0x31] sm:$0x1]  }
   0xa   :  { %89 = vst.msk [vmem:[%s147_s1 + $0x6] sm:$0x1] %vm38_vm1, %v37_v7  }
   0xc   :  { %v48_v9 = vld [vmem:[#allocation0 + $0x1] ss:$8 sm:$0xf]   ;;  %v41_v12 = vld [vmem:[#allocation0] ss:$8 sm:$0xf]  }
   0xd   :  { %v51_v10 = vld [vmem:[#allocation0 + $0x1] ss:$8 sm:%s50_s0]   ;;  %v43_v16 = vld [vmem:[#allocation0] ss:$8 sm:%s42_s20]  }
   0xe   :  { %v53_v11 = vsel %vm44_vm0, %v51_v10, %v48_v9  ;;  %v67_v13 = vld [vmem:[#allocation0 + $0x1] ss:$8 sm:$0xf]   ;;  %v45_v17 = vsel %vm44_vm0, %v43_v16, %v41_v12 }
   0xf   :  { %v57_v14 = vsel %vm56_vm2, %v55_v8, %v53_v11  ;;  %v70_v15 = vld [vmem:[#allocation0 + $0x1] ss:$8 sm:%s69_s21]   ;;  %46 = vst [vmem:[%s147_s1] sm:$0x3f] %v45_v17  }
  0x10   :  { %58 = vrot.lane.b32.xlu0 %v57_v14, %s94_s24  ;;  %v72_v18 = vsel %vm44_vm0, %v70_v15, %v67_v13 }
  0x14   :  { %73 = vrot.lane.b32.xlu0 %v72_v18, %s94_s24 }
  0x82   :  { %v59_v19 = vpop.permute.xlu0 %58  }
  0x83   :  { %90 = vst.msk [vmem:[%s147_s1 + $0x7] sm:$0x3f] %vm38_vm1, %v59_v19  }
  0x84   :  { %91 = vst.msk [vmem:[%s147_s1 + $0xc] sm:$0x1] %vm63_vm3, %v59_v19  }
  0x86   :  { %v74_v20 = vpop.permute.xlu0 %73  }
  0x87   :  { %92 = vst.msk [vmem:[%s147_s1 + $0x6] sm:$0x3f] %vm75_vm4, %v74_v20  }

// kernel: conv3d_block_forward.2
= control target key start
LH: loop header
LB: loop body
LE: loop exit
PB: predicated region body
PF: predicated region fallthrough
CT: control target
= control target key end

     0   :  { %s7727_s0 = inlined_call_operand.vmem [shape: bf16[16,2048], index: 0, kind: input, shape index: {}, may-alias: {0,1,2}]   ;;  %s7728_s1 = inlined_call_operand.vmem [shape: bf16[16,2048], index: 1, kind: input, shape index: {}, may-alias: {0,1,2}]   ;;  %s7729_s2 = inlined_call_operand.vmem [shape: bf16[16,2048], index: 2, kind: input, shape index: {}, may-alias: {0,1,2}]   ;;  %s7730_s3 = inlined_call_operand.vmem [shape: bf16[16,512], index: 3, kind: input, shape index: {}]   ;;  %s7731_s4 = inlined_call_operand.vmem [shape: f32[16,1], index: 4, kind: input, shape index: {}]   ;;  %s7732_s5 = inlined_call_operand.vmem [shape: f32[16,1], index: 5, kind: input, shape index: {}]   ;;  %s7733_s6 = inlined_call_operand.vmem [shape: f32[1,2048], index: 6, kind: input, shape index: {}]   ;;  %s7734_s7 = inlined_call_operand.vmem [shape: bf16[16,2048], index: 7, kind: output, shape index: {}]  }
   0x1   :  { %8029 = sst [smem:[#allocation33_spill]] %s7727_s0 }
   0x2   :  { %8030 = sst [smem:[#allocation34_spill]] %s7728_s1 }
   0x3   :  { %8031 = sst [smem:[#allocation35_spill]] %s7729_s2 }
   0x4   :  { %8032 = sst [smem:[#allocation36_spill]] %s7733_s6 }
   0x5   :  { %8033 = sst [smem:[#allocation37_spill]] %s7734_s7 }
   0x6   :  { %s5082_s24 = smov 0   ;;  %s5084_s25 = smov 0  }
   0x7   :  { %s5086_s26 = smov 0   ;;  %s5088_s27 = smov 0  }
   0x8   :  { %s5090_s28 = smov 0   ;;  %s5092_s29 = smov 0  }
   0x9   :  { %s5094_s30 = smov 0  }
   0xa LB: > { %8034 = sst [smem:[#allocation7_spill]] %s4993_s25  ;;  %s5118_s8 = sadd.s32 1, %s5013_s30   ;;  %s5013_s30 = sphi %s5094_s30, %s8385_s30   ;;  %s5009_s29 = sphi %s5092_s29, %s8391_s29   ;;  %s5005_s28 = sphi %s5090_s28, %s8390_s28   ;;  %s5001_s27 = sphi %s5088_s27, %s8389_s27   ;;  %s4997_s26 = sphi %s5086_s26, %s8388_s26   ;;  %s4993_s25 = sphi %s5084_s25, %s8387_s25   ;;  %s4989_s24 = sphi %s5082_s24, %s8386_s24  }
   0xb   : > { %8035 = sst [smem:[#allocation8_spill]] %s5001_s27  ;;  %s4488_s9 = sshll.u32 %s5013_s30, 3 }
   0xc   : > { %8036 = sst [smem:[#allocation9_spill]] %s5009_s29  ;;  %s32_s10 = sadd.s32 1, %s5009_s29 }
   0xd   : > { %8037 = sst [smem:[#allocation10_spill]] %s5118_s8  ;;  %s4489_s11 = sadd.s32 4294967295, %s4488_s9 }
   0xe   : > { %s4792_s12 = sadd.s32 8, %s4488_s9  ;;  %p23_p0 = scmp.gt.s32.totalorder %s4489_s11, 0 }
   0xf   : > { %s4491_s13 = sadd.s32 4294967295, %s4792_s12  ;;  %p39_p2 = scmp.ne.s32.totalorder %s5009_s29, %s5005_s28 }
  0x10   : > { %p27_p1 = scmp.gt.s32.totalorder %s4491_s13, 0  ;;  %s8393_s11 = smov (!%p23_p0, %s4489_s11), 0 }
  0x11   : > { %p40_p3 = scmp.eq.s32.totalorder %s5013_s30, 0  ;;  %s55_s14 = ssub.s32 %s5013_s30, %s5118_s8 }
  0x12   : > { %s8395_s13 = smov (!%p27_p1, %s4491_s13), 0  ;;  %p56_p4 = scmp.eq.s32.totalorder %s55_s14, 0 }
  0x13   : > { %s29_s15 = ssub.s32 %s8393_s11, %s8395_s13  ;;  %p5132_p6 = por %p40_p3, %p39_p2 }
  0x14   : > { %p30_p5 = scmp.eq.s32.totalorder %s29_s15, 0  ;;  %s58_s17 = sadd.s32 1, %s5001_s27 }
  0x15   : > { %p65_p7 = scmp.ne.s32.totalorder %s5001_s27, %s4997_s26  ;;  %p83_p9 = scmp.lt.s32.totalorder %s4792_s12, 15 }
  0x16   : > { %s5140_s18 = scalar_select %p30_p5, %s5009_s29, %s32_s10  }
  0x17   : > { %s5143_s19 = scalar_select %p56_p4, %s5001_s27, %s58_s17  }
  0x18   : > { %8039 = sst [smem:[#allocation11_spill]] %s5140_s18  ;;  %p5150_p8 = por %p65_p7, %p40_p3 }
  0x19   : > { %8040 = sst [smem:[#allocation12_spill]] %s5143_s19  ;;  %s5155_s21 = sadd.s32 4294967295, %s5013_s30  }
  0x1a   : > { %8042 = sst [smem:[#allocation13_spill]] %s5155_s21  ;;  %s4796_s22 = sadd.s32 8, %s4792_s12 }
  0x1b   : > { %s8397_s12 = smov (!%p83_p9, %s4792_s12), 15  ;;  %p87_p10 = scmp.lt.s32.totalorder %s4796_s22, 15 }
  0x1c   : > { %p99_p11 = scmp.ne.s32.totalorder %s4993_s25, %s4989_s24  ;;  %p218_p12 = scmp.eq.s32.totalorder %s5155_s21, 1 }
  0x1d   : > { %s8399_s22 = smov (!%p87_p10, %s4796_s22), 15  ;;  %s92_s13 = sadd.s32 1, %s4993_s25 }
  0x1e   : > { %p5164_p13 = por %p99_p11, %p40_p3  ;;  %p5171_p0 = por %p218_p12, %p65_p7 }
  0x1f   : > { %s89_s10 = ssub.s32 %s8397_s12, %s8399_s22  ;;  %p4495_p2 = scmp.ge.s32.totalorder %s5013_s30, 2 }
  0x20   : > { %s8044_s9 = scalar_select %p5171_p0, 1, 0 }
  0x21   : > { %p90_p1 = scmp.eq.s32.totalorder %s89_s10, 0  ;;  %249 = sbr.rel (%p4495_p2) target bundleno = 76 (0x4c), region = 28 }
  0x22   : > { %8045 = sst [smem:[#allocation14_spill]] %s8044_s9 }
  0x23   : > { %s5178_s14 = scalar_select %p90_p1, %s4993_s25, %s92_s13  }
  0x25   : > { %8046 = sst [smem:[#allocation15_spill]] %s5178_s14 }
  0x26   : > { %252 = sbr.rel (!%p5132_p6) target bundleno = 50 (0x32), region = 32  ;;  %s254_s15 = sand.u32 (%p5132_p6), 1, %s5009_s29  }
  0x27   : > { %s4499_s17 = sshll.u32 (%p5132_p6), %s8393_s11, 2  ;;  %s4496_s18 = sshll.u32 (%p5132_p6), %s254_s15, 3 }
  0x28   : > { %s8047_s0 = sld [smem:[#allocation33_spill]] (%p5132_p6)  ;;  %s256_s22 = scalar_lea.vmem (%p5132_p6), [#allocation3], %s4496_s18 }
  0x2e   : > { %s262_s7 = scalar_lea.vmem %s8047_s0, %s4499_s17 }
  0x2f   : > { %v279_v0 = vld [vmem:[%s262_s7] sm:$0xf] }
  0x30   : > { %v281_v1 = vld [vmem:[%s262_s7 + $0x40] sm:$0xf]  ;;  %280 = vst [vmem:[%s256_s22] sm:$0xf] %v279_v0 }
  0x31   : > { %282 = vst [vmem:[%s256_s22 + $0x4] sm:$0xf] %v281_v1 }
  0x32 PF: > { %310 = sbr.rel (!%p5150_p8) target bundleno = 64 (0x40), region = 73  ;;  %s312_s16 = sand.u32 (%p5150_p8), 1, %s5001_s27  }
  0x33   : > { %s4797_s10 = sshll.u32 (%p5150_p8), %s5013_s30, 5  ;;  %s4500_s13 = sshll.u32 (%p5150_p8), %s312_s16, 6 }
  0x34   : > { %s8048_s1 = sld [smem:[#allocation34_spill]] (%p5150_p8)  ;;  %s314_s7 = scalar_lea.vmem (%p5150_p8), [#allocation4], %s4500_s13 }
  0x3a   : > { %s317_s29 = scalar_lea.vmem %s8048_s1, %s4797_s10 }
  0x3b   : > { %v330_v2 = vld [vmem:[%s317_s29] sm:$0xff]  ;;  %v332_v3 = vld [vmem:[%s317_s29 + $0x8] sm:$0xff]  ;;  %v334_v4 = vld [vmem:[%s317_s29 + $0x10] sm:$0xff] }
  0x3c   : > { %331 = vst [vmem:[%s314_s7] sm:$0xff] %v330_v2  ;;  %333 = vst [vmem:[%s314_s7 + $0x8] sm:$0xff] %v332_v3  ;;  %v336_v5 = vld [vmem:[%s317_s29 + $0x18] sm:$0xff]  ;;  %v338_v6 = vld [vmem:[%s317_s29 + $0x40] sm:$0xff] }
  0x3d   : > { %335 = vst [vmem:[%s314_s7 + $0x10] sm:$0xff] %v334_v4  ;;  %v340_v7 = vld [vmem:[%s317_s29 + $0x48] sm:$0xff]  ;;  %337 = vst [vmem:[%s314_s7 + $0x18] sm:$0xff] %v336_v5  ;;  %v342_v8 = vld [vmem:[%s317_s29 + $0x50] sm:$0xff] }
  0x3e   : > { %339 = vst [vmem:[%s314_s7 + $0x20] sm:$0xff] %v338_v6  ;;  %341 = vst [vmem:[%s314_s7 + $0x28] sm:$0xff] %v340_v7  ;;  %v344_v9 = vld [vmem:[%s317_s29 + $0x58] sm:$0xff] }
  0x3f   : > { %343 = vst [vmem:[%s314_s7 + $0x30] sm:$0xff] %v342_v8  ;;  %345 = vst [vmem:[%s314_s7 + $0x38] sm:$0xff] %v344_v9 }
  0x40 PF: > { %351 = sbr.rel (!%p5164_p13) target bundleno = 76 (0x4c), region = 96  ;;  %s353_s8 = sand.u32 (%p5164_p13), 1, %s4993_s25  }
  0x41   : > { %s4505_s18 = sshll.u32 (%p5164_p13), %s8397_s12, 2  ;;  %s4503_s19 = sshll.u32 (%p5164_p13), %s353_s8, 3 }
  0x42   : > { %s8049_s2 = sld [smem:[#allocation35_spill]] (%p5164_p13)  ;;  %s355_s16 = scalar_lea.vmem (%p5164_p13), [#allocation5], %s4503_s19 }
  0x48   : > { %s361_s22 = scalar_lea.vmem %s8049_s2, %s4505_s18 }
  0x49   : > { %v378_v10 = vld [vmem:[%s361_s22] sm:$0xf] }
  0x4a   : > { %v380_v11 = vld [vmem:[%s361_s22 + $0x40] sm:$0xf]  ;;  %379 = vst [vmem:[%s355_s16] sm:$0xf] %v378_v10 }
  0x4b   : > { %381 = vst [vmem:[%s355_s16 + $0x4] sm:$0xf] %v380_v11 }
  0x4c PF: > { %p4506_p3 = scmp.ge.s32.totalorder %s5013_s30, 1  ;;  %p416_p4 = scmp.lt.s32.totalorder %s5013_s30, 3 }
  0x4e   : > { %p417_p5 = pnand %p4506_p3, %p416_p4 }
  0x50   : > { %420 = sbr.rel (%p417_p5) target bundleno = 957 (0x3bd), region = 141 }
  0x55   : > { %s430_s29 = sand.u32 1, %s4997_s26   ;;  %s423_s23 = sand.u32 1, %s5005_s28   ;;  %vm619_vm0 = vcmask 1043456   ;;  %vm1062_vm1 = vcmask 736256   ;;  %vm2033_vm2 = vcmask 220160   ;;  %vm999_vm3 = vcmask 744448  }
  0x56   : > { %s5205_s12 = sshll.u32 %s430_s29, 6  ;;  %s4507_s10 = sshll.u32 %s423_s23, 3  ;;  %v5034_v8 = vmov 0   ;;  %vm1970_vm4 = vcmask 228352   ;;  %vm936_vm5 = vcmask 809984   ;;  %vm1907_vm6 = vcmask 236544  }
  0x57   : > { %8050 = sst [smem:[#allocation16_spill]] %s5205_s12  ;;  %s5209_s13 = scalar_lea.vmem [#allocation4], %s5205_s12  ;;  %4937 = vset.pattern.permute.xlu1 %v5034_v8  ;;  %4936 = vset.pattern.permute.xlu0 %v5034_v8  ;;  %vm873_vm7 = vcmask 818176   ;;  %vm1844_vm8 = vcmask 302080   ;;  %vm810_vm9 = vcmask 826368   ;;  %vm1781_vm10 = vcmask 310272  }
  0x58   : > { %v5212_v12 = vld [vmem:[%s5209_s13 + $0xc] sm:$0xff]  ;;  %v5215_v13 = vld [vmem:[%s5209_s13] sm:$0xff]  ;;  %s425_s30 = scalar_lea.vmem [#allocation3], %s4507_s10  ;;  %s7760_s11 = smov 111   ;;  %vm747_vm11 = vcmask 891904   ;;  %vm1718_vm12 = vcmask 318464  }
  0x59   : > { %v535_v14 = vld [vmem:[%s425_s30] sm:$0xf]  ;;  %593 = vrot.lane.b32.xlu1 %v5212_v12, %s7760_s11  ;;  %v536_v16 = vld [vmem:[%s425_s30 + $0x4] sm:$0xf]  ;;  %v5223_v17 = vld [vmem:[%s5209_s13 + $0x20] sm:$0xff]  ;;  %s7865_s26 = smov 90  }
  0x5a   : > { %v5220_v15 = vcombine.low %v535_v14, %v5215_v13  ;;  %v5228_v18 = vld [vmem:[%s5209_s13 + $0x4] sm:$0xff]  ;;  %v5233_v19 = vcombine.low %v536_v16, %v5223_v17  ;;  %s7863_s28 = smov 27   ;;  %s7878_s15 = smov 91   ;;  %vm7911_vm13 = vcmask 900096   ;;  %vm7784_vm14 = vcmask 957440  }
  0x5b   : > { %v5242_v20 = vld [vmem:[%s5209_s13 + $0x24] sm:$0xff]  ;;  %s7832_s7 = smov 28   ;;  %s7828_s8 = smov 99   ;;  %vm7912_vm15 = vcmask 908288  }
  0x5c   : > { %589 = vrot.lane.b32.xlu0 %v5220_v15, %s7760_s11  ;;  %v5249_v21 = vld [vmem:[%s5209_s13 + $0x8] sm:$0xff]  ;;  %s7825_s18 = smov 29   ;;  %s7820_s19 = smov 100  }
  0x5d   : > { %1031 = vrot.lane.b32.xlu1 %v5220_v15, %s7865_s26  ;;  %v5256_v22 = vld [vmem:[%s5209_s13 + $0x28] sm:$0xff]  ;;  %s7818_s20 = smov 37   ;;  %s7815_s17 = smov 101  }
  0x5e   : > { %s7808_s22 = smov 38   ;;  %s7805_s16 = smov 109  }
  0x5f   : > { %s7801_s29 = smov 39   ;;  %s7798_s23 = smov 110  }
  0x60   : > { %591 = vrot.lane.b32.xlu0 %v5228_v18, %s7760_s11  ;;  %s7738_s10 = smov 117   ;;  %s7740_s30 = smov 118  }
  0x61   : > { %1041 = vrot.lane.b32.xlu1 %v5233_v19, %s7865_s26  ;;  %s8084_s0 = smov 29   ;;  %s8094_s1 = smov 101  }
  0x62   : > { %s8097_s2 = smov 38   ;;  %s8100_s27 = smov 109  }
  0x63   : > { %s8103_s14 = smov 39   ;;  %s8106_s25 = smov 110  }
  0x64   : > { %1033 = vrot.lane.b32.xlu0 %v5228_v18, %s7865_s26  ;;  %s8159_s9 = smov 19   ;;  %s8168_s12 = smov 90  }
  0x65   : > { %2002 = vrot.lane.b32.xlu1 %v5215_v13, %s7863_s28 }
  0x68   : > { %1043 = vrot.lane.b32.xlu0 %v5242_v20, %s7865_s26 }
  0x69   : > { %2012 = vrot.lane.b32.xlu1 %v5223_v17, %s7863_s28 }
  0x6c   : > { %2004 = vrot.lane.b32.xlu0 %v5249_v21, %s7863_s28 }
  0x6d   : > { %968 = vrot.lane.b32.xlu1 %v5220_v15, %s7878_s15 }
  0x70   : > { %2014 = vrot.lane.b32.xlu0 %v5256_v22, %s7863_s28 }
  0x71   : > { %978 = vrot.lane.b32.xlu1 %v5233_v19, %s7878_s15 }
  0x74   : > { %970 = vrot.lane.b32.xlu0 %v5228_v18, %s7878_s15 }
  0x75   : > { %1939 = vrot.lane.b32.xlu1 %v5215_v13, %s7832_s7 }
  0x78   : > { %980 = vrot.lane.b32.xlu0 %v5242_v20, %s7878_s15 }
  0x79   : > { %1949 = vrot.lane.b32.xlu1 %v5223_v17, %s7832_s7 }
  0x7c   : > { %1941 = vrot.lane.b32.xlu0 %v5249_v21, %s7832_s7 }
  0x7d   : > { %905 = vrot.lane.b32.xlu1 %v5220_v15, %s7828_s8 }
  0x80   : > { %1951 = vrot.lane.b32.xlu0 %v5256_v22, %s7832_s7 }
  0x81   : > { %915 = vrot.lane.b32.xlu1 %v5233_v19, %s7828_s8 }
  0x84   : > { %907 = vrot.lane.b32.xlu0 %v5228_v18, %s7828_s8 }
  0x85   : > { %1876 = vrot.lane.b32.xlu1 %v5215_v13, %s7825_s18 }
  0x88   : > { %917 = vrot.lane.b32.xlu0 %v5242_v20, %s7828_s8 }
  0x89   : > { %1886 = vrot.lane.b32.xlu1 %v5223_v17, %s7825_s18 }
  0x8c   : > { %1878 = vrot.lane.b32.xlu0 %v5249_v21, %s7825_s18 }
  0x8d   : > { %842 = vrot.lane.b32.xlu1 %v5220_v15, %s7820_s19 }
  0x90   : > { %1888 = vrot.lane.b32.xlu0 %v5256_v22, %s7825_s18 }
  0x91   : > { %852 = vrot.lane.b32.xlu1 %v5233_v19, %s7820_s19 }
  0x94   : > { %844 = vrot.lane.b32.xlu0 %v5228_v18, %s7820_s19 }
  0x95   : > { %1813 = vrot.lane.b32.xlu1 %v5215_v13, %s7818_s20 }
  0x98   : > { %854 = vrot.lane.b32.xlu0 %v5242_v20, %s7820_s19 }
  0x99   : > { %1823 = vrot.lane.b32.xlu1 %v5223_v17, %s7818_s20 }
  0x9c   : > { %1815 = vrot.lane.b32.xlu0 %v5249_v21, %s7818_s20 }
  0x9d   : > { %779 = vrot.lane.b32.xlu1 %v5220_v15, %s7815_s17 }
  0xa0   : > { %1825 = vrot.lane.b32.xlu0 %v5256_v22, %s7818_s20 }
  0xa1   : > { %789 = vrot.lane.b32.xlu1 %v5233_v19, %s7815_s17 }
  0xa4   : > { %781 = vrot.lane.b32.xlu0 %v5228_v18, %s7815_s17 }
  0xa5   : > { %1750 = vrot.lane.b32.xlu1 %v5215_v13, %s7808_s22 }
  0xa8   : > { %791 = vrot.lane.b32.xlu0 %v5242_v20, %s7815_s17 }
  0xa9   : > { %1760 = vrot.lane.b32.xlu1 %v5223_v17, %s7808_s22 }
  0xac   : > { %1752 = vrot.lane.b32.xlu0 %v5249_v21, %s7808_s22 }
  0xad   : > { %716 = vrot.lane.b32.xlu1 %v5220_v15, %s7805_s16 }
  0xb0   : > { %1762 = vrot.lane.b32.xlu0 %v5256_v22, %s7808_s22 }
  0xb1   : > { %726 = vrot.lane.b32.xlu1 %v5233_v19, %s7805_s16 }
  0xb4   : > { %718 = vrot.lane.b32.xlu0 %v5228_v18, %s7805_s16 }
  0xb5   : > { %1687 = vrot.lane.b32.xlu1 %v5215_v13, %s7801_s29 }
  0xb8   : > { %728 = vrot.lane.b32.xlu0 %v5242_v20, %s7805_s16 }
  0xb9   : > { %1697 = vrot.lane.b32.xlu1 %v5223_v17, %s7801_s29 }
  0xbc   : > { %1689 = vrot.lane.b32.xlu0 %v5249_v21, %s7801_s29 }
  0xbd   : > { %653 = vrot.lane.b32.xlu1 %v5220_v15, %s7798_s23 }
  0xc0   : > { %1699 = vrot.lane.b32.xlu0 %v5256_v22, %s7801_s29 }
  0xc1   : > { %663 = vrot.lane.b32.xlu1 %v5233_v19, %s7798_s23 }
  0xc4   : > { %655 = vrot.lane.b32.xlu0 %v5228_v18, %s7798_s23 }
  0xc5   : > { %1624 = vrot.lane.b32.xlu1 %v5215_v13, %s7738_s10 }
  0xc8   : > { %665 = vrot.lane.b32.xlu0 %v5242_v20, %s7798_s23 }
  0xc9   : > { %1634 = vrot.lane.b32.xlu1 %v5223_v17, %s7738_s10 }
  0xcb   : > { %v5354_v23 = vpop.permute.xlu1 %593 }
  0xcc   : > { %1626 = vrot.lane.b32.xlu0 %v5249_v21, %s7738_s10  ;;  %8051 = vst [vmem:[#allocation17_spill] sm:$0xff] %v5354_v23 }
  0xcd   : > { %599 = vrot.lane.b32.xlu1 %v5233_v19, %s7760_s11 }
  0xce   : > { %v5356_v24 = vpop.permute.xlu0 %589 }
  0xcf   : > { %v1032_v25 = vpop.permute.xlu1 %1031 }
  0xd0   : > { %1636 = vrot.lane.b32.xlu0 %v5256_v22, %s7738_s10  ;;  %v1051_v31 = vrot.slane %v1032_v25, 4  ;;  %s7742_s10 = smov 119  }
  0xd1   : > { %1561 = vrot.lane.b32.xlu1 %v5215_v13, %s7740_s30 }
  0xd2   : > { %v5362_v26 = vpop.permute.xlu0 %591 }
  0xd3   : > { %v1042_v27 = vpop.permute.xlu1 %1041 }
  0xd4   : > { %601 = vrot.lane.b32.xlu0 %v5242_v20, %s7760_s11  ;;  %v1056_v33 = vrot.slane %v1042_v27, 4  ;;  %s8052_s11 = smov 117  }
  0xd5   : > { %1571 = vrot.lane.b32.xlu1 %v5223_v17, %s7740_s30 }
  0xd6   : > { %v5368_v28 = vpop.permute.xlu0 %1033 }
  0xd7   : > { %v7813_v29 = vrot.slane %v5368_v28, 4  ;;  %v2003_v30 = vpop.permute.xlu1 %2002 }
  0xd8   : > { %1563 = vrot.lane.b32.xlu0 %v5249_v21, %s7740_s30  ;;  %v2022_v45 = vrot.slane %v2003_v30, 4 }
  0xd9   : > { %1498 = vrot.lane.b32.xlu1 %v5215_v13, %s7742_s10  ;;  %v1061_v35 = vsel %vm619_vm0, %v1051_v31, %v7813_v29 }
  0xda   : > { %v5375_v32 = vpop.permute.xlu0 %1043  ;;  %v1063_v39 = vsel %vm1062_vm1, %v1032_v25, %v1061_v35 }
  0xdb   : > { %v7812_v34 = vrot.slane %v5375_v32, 4  ;;  %v2013_v36 = vpop.permute.xlu1 %2012 }
  0xdc   : > { %1573 = vrot.lane.b32.xlu0 %v5256_v22, %s7740_s30  ;;  %s7744_s30 = smov 127   ;;  %v2027_v47 = vrot.slane %v2013_v36, 4 }
  0xdd   : > { %v1070_v37 = vsel %vm619_vm0, %v1056_v33, %v7812_v34  ;;  %1508 = vrot.lane.b32.xlu1 %v5223_v17, %s7742_s10  ;;  %v5855_v34 = vld [vmem:[%s5209_s13 + $0xc] sm:$0xff] }
  0xde   : > { %v5388_v38 = vpop.permute.xlu0 %2004  ;;  %v1071_v40 = vsel %vm1062_vm1, %v1042_v27, %v1070_v37 }
  0xdf   : > { %v7811_v41 = vrot.slane %v5388_v38, 4  ;;  %v4579_v42 = vcombine.high %v1063_v39, %v1071_v40  ;;  %v4578_v43 = vcombine.low %v1063_v39, %v1071_v40  ;;  %v969_v44 = vpop.permute.xlu1 %968 }
  0xe0   : > { %1500 = vrot.lane.b32.xlu0 %v5249_v21, %s7742_s10  ;;  %v988_v59 = vrot.slane %v969_v44, 4 }
  0xe1   : > { %3814 = vmatprep.subr.bf16.mxu0 %v4579_v42  ;;  %1435 = vrot.lane.b32.xlu1 %v5215_v13, %s7744_s30  ;;  %v2032_v49 = vsel %vm619_vm0, %v2022_v45, %v7811_v41 }
  0xe2   : > { %3815 = vmatpush1.bf16.msra.mxu0 %v4578_v43  ;;  %v5397_v46 = vpop.permute.xlu0 %2014  ;;  %v2034_v53 = vsel %vm2033_vm2, %v2003_v30, %v2032_v49 }
  0xe3   : > { %v7796_v48 = vrot.slane %v5397_v46, 4  ;;  %v979_v50 = vpop.permute.xlu1 %978 }
  0xe4   : > { %1510 = vrot.lane.b32.xlu0 %v5256_v22, %s7742_s10  ;;  %s7746_s10 = smov 1   ;;  %v993_v61 = vrot.slane %v979_v50, 4 }
  0xe5   : > { %v2041_v51 = vsel %vm619_vm0, %v2027_v47, %v7796_v48  ;;  %1445 = vrot.lane.b32.xlu1 %v5223_v17, %s7744_s30  ;;  %v4627_v48 = vcombine.high %v5215_v13, %v5223_v17 }
  0xe6   : > { %v5410_v52 = vpop.permute.xlu0 %970  ;;  %v2042_v54 = vsel %vm2033_vm2, %v2013_v36, %v2041_v51 }
  0xe7   : > { %v7795_v55 = vrot.slane %v5410_v52, 4  ;;  %v4707_v56 = vcombine.high %v2034_v53, %v2042_v54  ;;  %v4706_v57 = vcombine.low %v2034_v53, %v2042_v54  ;;  %v1940_v58 = vpop.permute.xlu1 %1939 }
  0xe8   : > { %1437 = vrot.lane.b32.xlu0 %v5249_v21, %s7744_s30  ;;  %v1959_v10 = vrot.slane %v1940_v58, 4 }
  0xe9   : > { %3857 = vmatprep.subr.bf16.mxu1 %v4707_v56  ;;  %1346 = vrot.lane.b32.xlu1 %v5220_v15, %s7746_s10  ;;  %v998_v63 = vsel %vm619_vm0, %v988_v59, %v7795_v55 }
  0xea   : > { %3858 = vmatpush1.bf16.msra.mxu1 %v4706_v57  ;;  %v5419_v60 = vpop.permute.xlu0 %980  ;;  %v1000_v3 = vsel %vm999_vm3, %v969_v44, %v998_v63 }
  0xeb   : > { %v7791_v62 = vrot.slane %v5419_v60, 4  ;;  %v1950_v0 = vpop.permute.xlu1 %1949 }
  0xec   : > { %1447 = vrot.lane.b32.xlu0 %v5256_v22, %s7744_s30  ;;  %s7748_s30 = smov 9   ;;  %v1964_v14 = vrot.slane %v1950_v0, 4 }
  0xed   : > { %v1007_v1 = vsel %vm619_vm0, %v993_v61, %v7791_v62  ;;  %1356 = vrot.lane.b32.xlu1 %v5233_v19, %s7746_s10 }
  0xee   : > { %v5432_v2 = vpop.permute.xlu0 %1941  ;;  %v1008_v4 = vsel %vm999_vm3, %v979_v50, %v1007_v1 }
  0xef   : > { %v7782_v5 = vrot.slane %v5432_v2, 4  ;;  %v4571_v6 = vcombine.high %v1000_v3, %v1008_v4  ;;  %v4570_v7 = vcombine.low %v1000_v3, %v1008_v4  ;;  %v906_v9 = vpop.permute.xlu1 %905 }
  0xf0   : > { %1348 = vrot.lane.b32.xlu0 %v5228_v18, %s7746_s10  ;;  %v925_v42 = vrot.slane %v906_v9, 4 }
  0xf1   : > { %3816 = vmatprep.subr.bf16.mxu0 %v4571_v6  ;;  %1283 = vrot.lane.b32.xlu1 %v5220_v15, %s7748_s30  ;;  %v1969_v25 = vsel %vm619_vm0, %v1959_v10, %v7782_v5 }
  0xf2   : > { %3817 = vmatpush1.bf16.msra.mxu0 %v4570_v7  ;;  %v5443_v11 = vpop.permute.xlu0 %1951  ;;  %v1971_v33 = vsel %vm1970_vm4, %v1940_v58, %v1969_v25 }
  0xf3   : > { %v7781_v16 = vrot.slane %v5443_v11, 4  ;;  %v916_v27 = vpop.permute.xlu1 %915 }
  0xf4   : > { %1358 = vrot.lane.b32.xlu0 %v5242_v20, %s7746_s10  ;;  %s7750_s10 = smov 10   ;;  %v930_v44 = vrot.slane %v916_v27, 4 }
  0xf5   : > { %v1978_v30 = vsel %vm619_vm0, %v1964_v14, %v7781_v16  ;;  %1293 = vrot.lane.b32.xlu1 %v5233_v19, %s7748_s30 }
  0xf6   : > { %v5456_v31 = vpop.permute.xlu0 %907  ;;  %v1979_v35 = vsel %vm1970_vm4, %v1950_v0, %v1978_v30 }
  0xf7   : > { %v7780_v36 = vrot.slane %v5456_v31, 4  ;;  %v4699_v37 = vcombine.high %v1971_v33, %v1979_v35  ;;  %v4698_v39 = vcombine.low %v1971_v33, %v1979_v35  ;;  %v1877_v40 = vpop.permute.xlu1 %1876 }
  0xf8   : > { %1285 = vrot.lane.b32.xlu0 %v5228_v18, %s7748_s30  ;;  %v1896_v61 = vrot.slane %v1877_v40, 4 }
  0xf9   : > { %3859 = vmatprep.subr.bf16.mxu1 %v4699_v37  ;;  %1220 = vrot.lane.b32.xlu1 %v5220_v15, %s7750_s10  ;;  %v935_v47 = vsel %vm619_vm0, %v925_v42, %v7780_v36 }
  0xfa   : > { %3860 = vmatpush1.bf16.msra.mxu1 %v4698_v39  ;;  %v5465_v43 = vpop.permute.xlu0 %917  ;;  %v937_v53 = vsel %vm936_vm5, %v906_v9, %v935_v47 }
  0xfb   : > { %v7779_v45 = vrot.slane %v5465_v43, 4  ;;  %v1887_v49 = vpop.permute.xlu1 %1886 }
  0xfc   : > { %1295 = vrot.lane.b32.xlu0 %v5242_v20, %s7748_s30  ;;  %s7752_s30 = smov 17   ;;  %v1901_v0 = vrot.slane %v1887_v49, 4 }
  0xfd   : > { %v944_v50 = vsel %vm619_vm0, %v930_v44, %v7779_v45  ;;  %1230 = vrot.lane.b32.xlu1 %v5233_v19, %s7750_s10 }
  0xfe   : > { %v5478_v51 = vpop.permute.xlu0 %1878  ;;  %v945_v54 = vsel %vm936_vm5, %v916_v27, %v944_v50 }
  0xff   : > { %v7776_v56 = vrot.slane %v5478_v51, 4  ;;  %v4563_v57 = vcombine.high %v937_v53, %v945_v54  ;;  %v4562_v58 = vcombine.low %v937_v53, %v945_v54  ;;  %v843_v59 = vpop.permute.xlu1 %842 }
 0x100   : > { %1222 = vrot.lane.b32.xlu0 %v5228_v18, %s7750_s10  ;;  %v862_v33 = vrot.slane %v843_v59, 4 }
 0x101   : > { %3818 = vmatprep.subr.bf16.mxu0 %v4563_v57  ;;  %2191 = vrot.lane.b32.xlu1 %v5215_v13, %s7752_s30  ;;  %v1906_v3 = vsel %vm619_vm0, %v1896_v61, %v7776_v56 }
 0x102   : > { %3819 = vmatpush1.bf16.msra.mxu0 %v4562_v58  ;;  %v5487_v63 = vpop.permute.xlu0 %1888  ;;  %v1908_v9 = vsel %vm1907_vm6, %v1877_v40, %v1906_v3 }
 0x103   : > { %v7775_v1 = vrot.slane %v5487_v63, 4  ;;  %v853_v4 = vpop.permute.xlu1 %852 }
 0x104   : > { %1232 = vrot.lane.b32.xlu0 %v5242_v20, %s7750_s10  ;;  %s7754_s10 = smov 11   ;;  %v867_v37 = vrot.slane %v853_v4, 4 }
 0x105   : > { %v1915_v6 = vsel %vm619_vm0, %v1901_v0, %v7775_v1  ;;  %2201 = vrot.lane.b32.xlu1 %v5223_v17, %s7752_s30 }
 0x106   : > { %v5500_v7 = vpop.permute.xlu0 %844  ;;  %v1916_v10 = vsel %vm1907_vm6, %v1887_v49, %v1915_v6 }
 0x107   : > { %v7772_v14 = vrot.slane %v5500_v7, 4  ;;  %v4691_v25 = vcombine.high %v1908_v9, %v1916_v10  ;;  %v4690_v27 = vcombine.low %v1908_v9, %v1916_v10  ;;  %v1814_v30 = vpop.permute.xlu1 %1813 }
 0x108   : > { %2193 = vrot.lane.b32.xlu0 %v5249_v21, %s7752_s30  ;;  %v1833_v61 = vrot.slane %v1814_v30, 4 }
 0x109   : > { %3861 = vmatprep.subr.bf16.mxu1 %v4691_v25  ;;  %1157 = vrot.lane.b32.xlu1 %v5220_v15, %s7754_s10  ;;  %v872_v40 = vsel %vm619_vm0, %v862_v33, %v7772_v14 }
 0x10a   : > { %3862 = vmatpush1.bf16.msra.mxu1 %v4690_v27  ;;  %v5509_v35 = vpop.permute.xlu0 %854  ;;  %v874_v49 = vsel %vm873_vm7, %v843_v59, %v872_v40 }
 0x10b   : > { %v7771_v39 = vrot.slane %v5509_v35, 4  ;;  %v1824_v42 = vpop.permute.xlu1 %1823 }
 0x10c   : > { %2203 = vrot.lane.b32.xlu0 %v5256_v22, %s7752_s30  ;;  %s7756_s30 = smov 18   ;;  %v1838_v59 = vrot.slane %v1824_v42, 4 }
 0x10d   : > { %v881_v44 = vsel %vm619_vm0, %v867_v37, %v7771_v39  ;;  %1167 = vrot.lane.b32.xlu1 %v5233_v19, %s7754_s10 }
 0x10e   : > { %v5522_v47 = vpop.permute.xlu0 %1815  ;;  %v882_v50 = vsel %vm873_vm7, %v853_v4, %v881_v44 }
 0x10f   : > { %v7770_v53 = vrot.slane %v5522_v47, 4  ;;  %v4555_v54 = vcombine.high %v874_v49, %v882_v50  ;;  %v4554_v57 = vcombine.low %v874_v49, %v882_v50  ;;  %v780_v58 = vpop.permute.xlu1 %779 }
 0x110   : > { %1159 = vrot.lane.b32.xlu0 %v5228_v18, %s7754_s10  ;;  %v799_v49 = vrot.slane %v780_v58, 4 }
 0x111   : > { %3820 = vmatprep.subr.bf16.mxu0 %v4555_v54  ;;  %2128 = vrot.lane.b32.xlu1 %v5215_v13, %s7756_s30  ;;  %v1843_v4 = vsel %vm619_vm0, %v1833_v61, %v7770_v53 }
 0x112   : > { %3821 = vmatpush1.bf16.msra.mxu0 %v4554_v57  ;;  %v5531_v0 = vpop.permute.xlu0 %1825  ;;  %v1845_v25 = vsel %vm1844_vm8, %v1814_v30, %v1843_v4 }
 0x113   : > { %v7768_v3 = vrot.slane %v5531_v0, 4  ;;  %v790_v6 = vpop.permute.xlu1 %789 }
 0x114   : > { %1169 = vrot.lane.b32.xlu0 %v5242_v20, %s7754_s10  ;;  %s7758_s10 = smov 89   ;;  %v804_v30 = vrot.slane %v790_v6, 4 }
 0x115   : > { %v1852_v9 = vsel %vm619_vm0, %v1838_v59, %v7768_v3  ;;  %2138 = vrot.lane.b32.xlu1 %v5223_v17, %s7756_s30 }
 0x116   : > { %v5544_v10 = vpop.permute.xlu0 %781  ;;  %v1853_v27 = vsel %vm1844_vm8, %v1824_v42, %v1852_v9 }
 0x117   : > { %v7766_v33 = vrot.slane %v5544_v10, 4  ;;  %v4683_v37 = vcombine.high %v1845_v25, %v1853_v27  ;;  %v4682_v40 = vcombine.low %v1845_v25, %v1853_v27  ;;  %v1751_v44 = vpop.permute.xlu1 %1750 }
 0x118   : > { %2130 = vrot.lane.b32.xlu0 %v5249_v21, %s7756_s30 }
 0x119   : > { %3863 = vmatprep.subr.bf16.mxu1 %v4683_v37  ;;  %1094 = vrot.lane.b32.xlu1 %v5220_v15, %s7758_s10  ;;  %v809_v54 = vsel %vm619_vm0, %v799_v49, %v7766_v33 }
 0x11a   : > { %3864 = vmatpush1.bf16.msra.mxu1 %v4682_v40  ;;  %v5553_v50 = vpop.permute.xlu0 %791  ;;  %v811_v15 = vsel %vm810_vm9, %v780_v58, %v809_v54  ;;  %v1770_v40 = vrot.slane %v1751_v44, 4 }
 0x11b   : > { %v7765_v42 = vrot.slane %v5553_v50, 4  ;;  %v1761_v57 = vpop.permute.xlu1 %1760 }
 0x11c   : > { %2140 = vrot.lane.b32.xlu0 %v5256_v22, %s7756_s30  ;;  %s7867_s30 = smov 19  }
 0x11d   : > { %v818_v61 = vsel %vm619_vm0, %v804_v30, %v7765_v42  ;;  %1104 = vrot.lane.b32.xlu1 %v5233_v19, %s7758_s10  ;;  %v1775_v19 = vrot.slane %v1761_v57, 4 }
 0x11e   : > { %v5566_v59 = vpop.permute.xlu0 %1752  ;;  %v819_v4 = vsel %vm810_vm9, %v790_v6, %v818_v61 }
 0x11f   : > { %v7764_v9 = vrot.slane %v5566_v59, 4  ;;  %v4547_v25 = vcombine.high %v811_v15, %v819_v4  ;;  %v4546_v27 = vcombine.low %v811_v15, %v819_v4  ;;  %v717_v37 = vpop.permute.xlu1 %716 }
 0x120   : > { %1096 = vrot.lane.b32.xlu0 %v5228_v18, %s7758_s10 }
 0x121   : > { %3822 = vmatprep.subr.bf16.mxu0 %v4547_v25  ;;  %2065 = vrot.lane.b32.xlu1 %v5215_v13, %s7867_s30  ;;  %v1780_v6 = vsel %vm619_vm0, %v1770_v40, %v7764_v9 }
 0x122   : > { %3823 = vmatpush1.bf16.msra.mxu0 %v4546_v27  ;;  %v5575_v49 = vpop.permute.xlu0 %1762  ;;  %v1782_v61 = vsel %vm1781_vm10, %v1751_v44, %v1780_v6 }
 0x123   : > { %v7763_v58 = vrot.slane %v5575_v49, 4  ;;  %v727_v18 = vpop.permute.xlu1 %726 }
 0x124   : > { %1106 = vrot.lane.b32.xlu0 %v5242_v20, %s7758_s10  ;;  %v5598_v20 = vld [vmem:[%s7730_s3 + $0x4] ss:$16 sps:$4 sm:$0xff]   ;;  %s8053_s10 = smov 111  }
 0x125   : > { %v1789_v30 = vsel %vm619_vm0, %v1775_v19, %v7763_v58  ;;  %2075 = vrot.lane.b32.xlu1 %v5223_v17, %s7867_s30  ;;  %v736_v19 = vrot.slane %v717_v37, 4  ;;  %3846 = vmatprep.mubr.bf16.mxu0 %v5598_v20 }
 0x126   : > { %v5588_v54 = vpop.permute.xlu0 %718  ;;  %v1790_v15 = vsel %vm1781_vm10, %v1761_v57, %v1789_v30  ;;  %v741_v57 = vrot.slane %v727_v18, 4  ;;  %v5609_v30 = vld [vmem:[%s5209_s13 + $0x10] sm:$0xff] }
 0x127   : > { %v7762_v4 = vrot.slane %v5588_v54, 4  ;;  %v4675_v25 = vcombine.high %v1782_v61, %v1790_v15  ;;  %v4674_v27 = vcombine.low %v1782_v61, %v1790_v15  ;;  %v1688_v40 = vpop.permute.xlu1 %1687  ;;  %v5617_v61 = vld [vmem:[%s7730_s3 + $0xc] ss:$16 sps:$4 sm:$0xff]  }
 0x128   : > { %2067 = vrot.lane.b32.xlu0 %v5249_v21, %s7867_s30  ;;  %3889 = vmatprep.mubr.bf16.mxu1 %v5617_v61 }
 0x129   : > { %3865 = vmatprep.subr.bf16.mxu1 %v4675_v25  ;;  %1035 = vrot.lane.b32.xlu1 %v5212_v12, %s7865_s26  ;;  %v746_v21 = vsel %vm619_vm0, %v736_v19, %v7762_v4  ;;  %v5622_v25 = vld [vmem:[%s5209_s13 + $0x2c] sm:$0xff] }
 0x12a   : > { %3866 = vmatpush1.bf16.msra.mxu1 %v4674_v27  ;;  %v5603_v44 = vpop.permute.xlu0 %728  ;;  %v748_v4 = vsel %vm747_vm11, %v717_v37, %v746_v21 }
 0x12b   : > { %v7767_v6 = vrot.slane %v5603_v44, 4  ;;  %v1698_v15 = vpop.permute.xlu1 %1697 }
 0x12c   : > { %2077 = vrot.lane.b32.xlu0 %v5256_v22, %s7867_s30  ;;  %v1712_v37 = vrot.slane %v1698_v15, 4 }
 0x12d   : > { %v755_v27 = vsel %vm619_vm0, %v741_v57, %v7767_v6  ;;  %2006 = vrot.lane.b32.xlu1 %v5609_v30, %s7863_s28  ;;  %v1707_v57 = vrot.slane %v1688_v40, 4  ;;  %v5638_v6 = vld [vmem:[%s5209_s13 + $0x30] sm:$0xff] }
 0x12e   : > { %v5628_v19 = vpop.permute.xlu0 %1689  ;;  %v756_v58 = vsel %vm747_vm11, %v727_v18, %v755_v27 }
 0x12f   : > { %v7769_v22 = vrot.slane %v5628_v19, 4  ;;  %v4539_v9 = vcombine.high %v748_v4, %v756_v58  ;;  %v4538_v42 = vcombine.low %v748_v4, %v756_v58  ;;  %v654_v33 = vpop.permute.xlu1 %653 }
 0x130   : > { %1045 = vrot.lane.b32.xlu0 %v5622_v25, %s7865_s26  ;;  %v673_v14 = vrot.slane %v654_v33, 4 }
 0x131   : > { %3824 = vmatprep.subr.bf16.mxu0 %v4539_v9  ;;  %972 = vrot.lane.b32.xlu1 %v5212_v12, %s7878_s15  ;;  %v1717_v58 = vsel %vm619_vm0, %v1707_v57, %v7769_v22 }
 0x132   : > { %3825 = vmatpush1.bf16.msra.mxu0 %v4538_v42  ;;  %v5640_v3 = vpop.permute.xlu0 %1699  ;;  %v1719_v21 = vsel %vm1718_vm12, %v1688_v40, %v1717_v58 }
 0x133   : > { %v7773_v18 = vrot.slane %v5640_v3, 4  ;;  %v664_v9 = vpop.permute.xlu1 %663 }
 0x134   : > { %2016 = vrot.lane.b32.xlu0 %v5638_v6, %s7863_s28 }
 0x135   : > { %v1726_v42 = vsel %vm619_vm0, %v1712_v37, %v7773_v18  ;;  %1943 = vrot.lane.b32.xlu1 %v5609_v30, %s7832_s7  ;;  %v678_v18 = vrot.slane %v664_v9, 4 }
 0x136   : > { %v5653_v4 = vpop.permute.xlu0 %655  ;;  %v1727_v27 = vsel %vm1718_vm12, %v1698_v15, %v1726_v42 }
 0x137   : > { %v7774_v57 = vrot.slane %v5653_v4, 4  ;;  %v4667_v22 = vcombine.high %v1719_v21, %v1727_v27  ;;  %v4666_v53 = vcombine.low %v1719_v21, %v1727_v27  ;;  %v1625_v39 = vpop.permute.xlu1 %1624 }
 0x138   : > { %982 = vrot.lane.b32.xlu0 %v5622_v25, %s7878_s15  ;;  %v1644_v56 = vrot.slane %v1625_v39, 4 }
 0x139   : > { %3867 = vmatprep.subr.bf16.mxu1 %v4667_v22  ;;  %909 = vrot.lane.b32.xlu1 %v5212_v12, %s7828_s8  ;;  %v683_v15 = vsel %vm619_vm0, %v673_v14, %v7774_v57 }
 0x13a   : > { %3868 = vmatpush1.bf16.msra.mxu1 %v4666_v53  ;;  %v5662_v37 = vpop.permute.xlu0 %665  ;;  %v685_v42 = vsel %vm7911_vm13, %v654_v33, %v683_v15 }
 0x13b   : > { %v7777_v40 = vrot.slane %v5662_v37, 4  ;;  %v1635_v58 = vpop.permute.xlu1 %1634 }
 0x13c   : > { %1953 = vrot.lane.b32.xlu0 %v5638_v6, %s7832_s7  ;;  %v1649_v33 = vrot.slane %v1635_v58, 4  ;;  %s8065_s7 = smov 17  }
 0x13d   : > { %v692_v53 = vsel %vm619_vm0, %v678_v18, %v7777_v40  ;;  %1880 = vrot.lane.b32.xlu1 %v5609_v30, %s7825_s18  ;;  %v7788_v18 = vrot.slane %v5362_v26, 4 }
 0x13e   : > { %v5675_v22 = vpop.permute.xlu0 %1626  ;;  %v693_v21 = vsel %vm7911_vm13, %v664_v9, %v692_v53  ;;  %v609_v53 = vrot.slane %v5356_v24, 4 }
 0x13f   : > { %v7778_v14 = vrot.slane %v5675_v22, 4  ;;  %v4531_v27 = vcombine.high %v685_v42, %v693_v21  ;;  %v4530_v57 = vcombine.low %v685_v42, %v693_v21  ;;  %v600_v1 = vpop.permute.xlu1 %599 }
 0x140   : > { %919 = vrot.lane.b32.xlu0 %v5622_v25, %s7828_s8  ;;  %v614_v45 = vrot.slane %v600_v1, 4  ;;  %s8071_s8 = smov 89  }
 0x141   : > { %3826 = vmatprep.subr.bf16.mxu0 %v4531_v27  ;;  %846 = vrot.lane.b32.xlu1 %v5212_v12, %s7820_s19  ;;  %v1654_v15 = vsel %vm619_vm0, %v1644_v56, %v7778_v14  ;;  %v620_v14 = vsel %vm619_vm0, %v609_v53, %v7788_v18 }
 0x142   : > { %3827 = vmatpush1.bf16.msra.mxu0 %v4530_v57  ;;  %v5685_v40 = vpop.permute.xlu0 %1636  ;;  %v1656_v27 = vsel %vm7784_vm14, %v1625_v39, %v1654_v15  ;;  %v622_v15 = vsel %vm7912_vm15, %v5356_v24, %v620_v14 }
 0x143   : > { %v7783_v9 = vrot.slane %v5685_v40, 4  ;;  %v1562_v42 = vpop.permute.xlu1 %1561 }
 0x144   : > { %1890 = vrot.lane.b32.xlu0 %v5638_v6, %s7825_s18 }
 0x145   : > { %v1663_v57 = vsel %vm619_vm0, %v1649_v33, %v7783_v9  ;;  %1817 = vrot.lane.b32.xlu1 %v5609_v30, %s7818_s20 }
 0x146   : > { %v5699_v21 = vpop.permute.xlu0 %601  ;;  %v1664_v56 = vsel %vm7784_vm14, %v1635_v58, %v1663_v57  ;;  %vm7789_vm14 = vcmask 965632  }
 0x147   : > { %v7786_v36 = vrot.slane %v5699_v21, 4  ;;  %v4659_v16 = vcombine.high %v1656_v27, %v1664_v56  ;;  %v4658_v5 = vcombine.low %v1656_v27, %v1664_v56  ;;  %v1572_v33 = vpop.permute.xlu1 %1571 }
 0x148   : > { %856 = vrot.lane.b32.xlu0 %v5622_v25, %s7820_s19  ;;  %v1586_v9 = vrot.slane %v1572_v33, 4  ;;  %s437_s19 = sand.u32 1, %s4989_s24   ;;  %s8067_s24 = smov 11  }
 0x149   : > { %3869 = vmatprep.subr.bf16.mxu1 %v4659_v16  ;;  %v629_v39 = vsel %vm619_vm0, %v614_v45, %v7786_v36  ;;  %783 = vrot.lane.b32.xlu1 %v5212_v12, %s7815_s17  ;;  %v1581_v45 = vrot.slane %v1562_v42, 4  ;;  %v5746_v36 = vcombine.high %v5034_v8, %v5034_v8  ;;  %s5880_s18 = sshll.u32 %s437_s19, 3  ;;  %s8069_s19 = smov 18  }
 0x14a   : > { %3870 = vmatpush1.bf16.msra.mxu1 %v4658_v5  ;;  %v5714_v58 = vpop.permute.xlu0 %1563  ;;  %v630_v53 = vsel %vm7912_vm15, %v600_v1, %v629_v39  ;;  %s8169_s6 = scalar_lea.vmem [#allocation5], %s5880_s18  ;;  %s8384_s18 = sld [smem:[#allocation37_spill]] (%p5171_p0) }
 0x14b   : > { %v7785_v57 = vrot.slane %v5714_v58, 4  ;;  %v4523_v27 = vcombine.high %v622_v15, %v630_v53  ;;  %v4522_v56 = vcombine.low %v622_v15, %v630_v53  ;;  %v1499_v16 = vpop.permute.xlu1 %1498  ;;  %s8173_s21 = smov %s8169_s6 }
 0x14c   : > { %1827 = vrot.lane.b32.xlu0 %v5638_v6, %s7818_s20  ;;  %s8063_s20 = smov 10  }
 0x14d   : > { %3828 = vmatprep.subr.bf16.mxu0 %v4523_v27  ;;  %1754 = vrot.lane.b32.xlu1 %v5609_v30, %s7808_s22  ;;  %v1591_v1 = vsel %vm619_vm0, %v1581_v45, %v7785_v57 }
 0x14e   : > { %3829 = vmatpush1.bf16.msra.mxu0 %v4522_v56  ;;  %v5724_v5 = vpop.permute.xlu0 %1573  ;;  %v1593_v53 = vsel %vm7789_vm14, %v1562_v42, %v1591_v1  ;;  %v5756_v42 = vcombine.low %v5034_v8, %v5034_v8 }
 0x14f   : > { %v7787_v24 = vrot.slane %v5724_v5, 4  ;;  %v1509_v14 = vpop.permute.xlu1 %1508 }
 0x150   : > { %793 = vrot.lane.b32.xlu0 %v5622_v25, %s7815_s17  ;;  %s8061_s17 = smov 9  }
 0x151   : > { %v1600_v39 = vsel %vm619_vm0, %v1586_v9, %v7787_v24  ;;  %720 = vrot.lane.b32.xlu1 %v5212_v12, %s7805_s16  ;;  %v1518_v24 = vrot.slane %v1499_v16, 4 }
 0x152   : > { %v5737_v15 = vpop.permute.xlu0 %1500  ;;  %v1601_v27 = vsel %vm7789_vm14, %v1572_v33, %v1600_v39  ;;  %v1523_v33 = vrot.slane %v1509_v14, 4  ;;  %vm7793_vm14 = vcmask 973824  }
 0x153   : > { %v7790_v56 = vrot.slane %v5737_v15, 4  ;;  %v4651_v45 = vcombine.high %v1593_v53, %v1601_v27  ;;  %v4650_v57 = vcombine.low %v1593_v53, %v1601_v27  ;;  %v1436_v9 = vpop.permute.xlu1 %1435 }
 0x154   : > { %1764 = vrot.lane.b32.xlu0 %v5638_v6, %s7808_s22  ;;  %s8059_s22 = smov 1  }
 0x155   : > { %3871 = vmatprep.subr.bf16.mxu1 %v4651_v45  ;;  %1691 = vrot.lane.b32.xlu1 %v5609_v30, %s7801_s29  ;;  %v1528_v39 = vsel %vm619_vm0, %v1518_v24, %v7790_v56 }
 0x156   : > { %3872 = vmatpush1.bf16.msra.mxu1 %v4650_v57  ;;  %v5750_v18 = vpop.permute.xlu0 %1510  ;;  %v1530_v27 = vsel %vm7793_vm14, %v1499_v16, %v1528_v39 }
 0x157   : > { %v7792_v1 = vrot.slane %v5750_v18, 4  ;;  %3873 = vmatprep.subr.bf16.mxu1 %v5746_v36  ;;  %v1446_v57 = vpop.permute.xlu1 %1445 }
 0x158   : > { %730 = vrot.lane.b32.xlu0 %v5622_v25, %s7805_s16  ;;  %v1460_v16 = vrot.slane %v1446_v57, 4  ;;  %s8057_s16 = smov 127  }
 0x159   : > { %v1537_v53 = vsel %vm619_vm0, %v1523_v33, %v7792_v1  ;;  %657 = vrot.lane.b32.xlu1 %v5212_v12, %s7798_s23  ;;  %v1455_v1 = vrot.slane %v1436_v9, 4 }
 0x15a   : > { %v5768_v8 = vpop.permute.xlu0 %1437  ;;  %v1538_v24 = vsel %vm7793_vm14, %v1509_v14, %v1537_v53  ;;  %3874 = vmatpush2.bf16.msra.mxu1 %v5756_v42  ;;  %vm7800_vm14 = vcmask 1039360  }
 0x15b   : > { %v7794_v45 = vrot.slane %v5768_v8, 4  ;;  %v4643_v56 = vcombine.high %v1530_v27, %v1538_v24  ;;  %v4642_v62 = vcombine.low %v1530_v27, %v1538_v24  ;;  %3875 = vmatprep.subr.bf16.mxu1 %v5746_v36  ;;  %v1347_v33 = vpop.permute.xlu1 %1346 }
 0x15c   : > { %1701 = vrot.lane.b32.xlu0 %v5638_v6, %s7801_s29  ;;  %s8056_s29 = smov 119  }
 0x15d   : > { %3830 = vmatprep.subr.bf16.mxu0 %v4643_v56  ;;  %1628 = vrot.lane.b32.xlu1 %v5609_v30, %s8052_s11  ;;  %v1465_v39 = vsel %vm619_vm0, %v1455_v1, %v7794_v45 }
 0x15e   : > { %3831 = vmatpush2.bf16.msra.mxu0 %v4642_v62  ;;  %v5779_v12 = vpop.permute.xlu0 %1447  ;;  %3876 = vmatpush2.bf16.msra.mxu1 %v5756_v42  ;;  %v1467_v1 = vsel %vm7800_vm14, %v1436_v9, %v1465_v39 }
 0x15f   : > { %v7797_v14 = vrot.slane %v5779_v12, 4  ;;  %v1357_v56 = vpop.permute.xlu1 %1356  ;;  %3877 = vmatprep.subr.bf16.mxu1 %v5746_v36 }
 0x160   : > { %667 = vrot.lane.b32.xlu0 %v5622_v25, %s7798_s23  ;;  %s8054_s23 = smov 118   ;;  %v1371_v39 = vrot.slane %v1357_v56, 4 }
 0x161   : > { %v1474_v62 = vsel %vm619_vm0, %v1460_v16, %v7797_v14  ;;  %603 = vrot.lane.b32.xlu1 %v5622_v25, %s8053_s10  ;;  %v1366_v14 = vrot.slane %v1347_v33, 4 }
 0x162   : > { %v5794_v53 = vpop.permute.xlu0 %1348  ;;  %v1475_v27 = vsel %vm7800_vm14, %v1446_v57, %v1474_v62  ;;  %3878 = vmatpush2.bf16.msra.mxu1 %v5756_v42  ;;  %v4626_v57 = vcombine.low %v5215_v13, %v5223_v17  ;;  %vm7807_vm14 = vcmask 7168  }
 0x163   : > { %v7803_v24 = vrot.slane %v5794_v53, 4  ;;  %v4635_v45 = vcombine.high %v1467_v1, %v1475_v27  ;;  %v4634_v55 = vcombine.low %v1467_v1, %v1475_v27  ;;  %v1284_v16 = vpop.permute.xlu1 %1283  ;;  %3879 = vmatprep.subr.bf16.mxu1 %v5746_v36 }
 0x164   : > { %1638 = vrot.lane.b32.xlu0 %v5638_v6, %s8052_s11 }
 0x165   : > { %3832 = vmatprep.subr.bf16.mxu0 %v4635_v45  ;;  %1575 = vrot.lane.b32.xlu1 %v5638_v6, %s8054_s23  ;;  %v1376_v1 = vsel %vm619_vm0, %v1366_v14, %v7803_v24 }
 0x166   : > { %3833 = vmatpush2.bf16.msra.mxu0 %v4634_v55  ;;  %v5807_v9 = vpop.permute.xlu0 %1358  ;;  %3880 = vmatpush2.bf16.msra.mxu1 %v5756_v42 }
 0x167   : > { %v7804_v62 = vrot.slane %v5807_v9, 4  ;;  %3834 = vmatprep.subr.bf16.mxu0 %v4627_v48  ;;  %v1294_v55 = vpop.permute.xlu1 %1293  ;;  %3881 = vmatprep.subr.bf16.mxu1 %v5746_v36  ;;  %v1378_v48 = vsel %vm7807_vm14, %v1347_v33, %v1376_v1 }
 0x168   : > { %1565 = vrot.lane.b32.xlu0 %v5609_v30, %s8054_s23  ;;  %v1308_v33 = vrot.slane %v1294_v55, 4 }
 0x169   : > { %v1385_v13 = vsel %vm619_vm0, %v1371_v39, %v7804_v62  ;;  %1512 = vrot.lane.b32.xlu1 %v5638_v6, %s8056_s29 }
 0x16a   : > { %3835 = vmatpush2.bf16.msra.mxu0 %v4626_v57  ;;  %v5824_v17 = vpop.permute.xlu0 %1285  ;;  %v1386_v45 = vsel %vm7807_vm14, %v1357_v56, %v1385_v13  ;;  %3882 = vmatpush2.bf16.msra.mxu1 %v5756_v42  ;;  %v1303_v57 = vrot.slane %v1284_v16, 4  ;;  %vm7817_vm14 = vcmask 72704  }
 0x16b   : > { %8055 = vst [vmem:[#allocation18_spill] sm:$0xff] %v5824_v17  ;;  %v7810_v14 = vrot.slane %v5824_v17, 4  ;;  %v4619_v27 = vcombine.high %v1378_v48, %v1386_v45  ;;  %v4618_v24 = vcombine.low %v1378_v48, %v1386_v45  ;;  %v1221_v39 = vpop.permute.xlu1 %1220 }
 0x16c   : > { %1502 = vrot.lane.b32.xlu0 %v5609_v30, %s8056_s29 }
 0x16d   : > { %3836 = vmatprep.subr.bf16.mxu0 %v4619_v27  ;;  %1449 = vrot.lane.b32.xlu1 %v5638_v6, %s8057_s16  ;;  %v1313_v1 = vsel %vm619_vm0, %v1303_v57, %v7810_v14 }
 0x16e   : > { %3837 = vmatpush2.bf16.msra.mxu0 %v4618_v24  ;;  %v5834_v62 = vpop.permute.xlu0 %1295  ;;  %v1315_v45 = vsel %vm7817_vm14, %v1284_v16, %v1313_v1 }
 0x16f   : > { %v7814_v56 = vrot.slane %v5834_v62, 4  ;;  %v1231_v13 = vpop.permute.xlu1 %1230 }
 0x170   : > { %1439 = vrot.lane.b32.xlu0 %v5609_v30, %s8057_s16  ;;  %v1245_v16 = vrot.slane %v1231_v13, 4 }
 0x171   : > { %v1322_v24 = vsel %vm619_vm0, %v1308_v33, %v7814_v56  ;;  %1360 = vrot.lane.b32.xlu1 %v5622_v25, %s8059_s22  ;;  %v1240_v33 = vrot.slane %v1221_v39, 4 }
 0x172   : > { %v5847_v48 = vpop.permute.xlu0 %1222  ;;  %v1323_v27 = vsel %vm7817_vm14, %v1294_v55, %v1322_v24  ;;  %vm7834_vm14 = vcmask 80896  }
 0x173   : > { %8058 = vst [vmem:[#allocation19_spill] sm:$0xff] %v5847_v48  ;;  %v7822_v57 = vrot.slane %v5847_v48, 4  ;;  %v4611_v14 = vcombine.high %v1315_v45, %v1323_v27  ;;  %v4610_v41 = vcombine.low %v1315_v45, %v1323_v27  ;;  %v2192_v29 = vpop.permute.xlu1 %2191 }
 0x174   : > { %1350 = vrot.lane.b32.xlu0 %v5855_v34, %s8059_s22 }
 0x175   : > { %3838 = vmatprep.subr.bf16.mxu0 %v4611_v14  ;;  %1297 = vrot.lane.b32.xlu1 %v5622_v25, %s8061_s17  ;;  %v1250_v1 = vsel %vm619_vm0, %v1240_v33, %v7822_v57 }
 0x176   : > { %3839 = vmatpush2.bf16.msra.mxu0 %v4610_v41  ;;  %v5859_v56 = vpop.permute.xlu0 %1232  ;;  %v1252_v45 = vsel %vm7834_vm14, %v1221_v39, %v1250_v1 }
 0x177   : > { %8060 = vst [vmem:[#allocation20_spill] sm:$0xff] %v5859_v56  ;;  %v7827_v55 = vrot.slane %v5859_v56, 4  ;;  %v2202_v24 = vpop.permute.xlu1 %2201 }
 0x178   : > { %1287 = vrot.lane.b32.xlu0 %v5855_v34, %s8061_s17  ;;  %v2216_v39 = vrot.slane %v2202_v24, 4 }
 0x179   : > { %v1259_v41 = vsel %vm619_vm0, %v1245_v16, %v7827_v55  ;;  %1234 = vrot.lane.b32.xlu1 %v5622_v25, %s8063_s20  ;;  %v2211_v55 = vrot.slane %v2192_v29, 4 }
 0x17a   : > { %v5872_v14 = vpop.permute.xlu0 %2193  ;;  %v1260_v27 = vsel %vm7834_vm14, %v1231_v13, %v1259_v41  ;;  %vm7843_vm14 = vcmask 138240  }
 0x17b   : > { %8062 = vst [vmem:[#allocation21_spill] sm:$0xff] %v5872_v14  ;;  %v7835_v33 = vrot.slane %v5872_v14, 4  ;;  %v4603_v57 = vcombine.high %v1252_v45, %v1260_v27  ;;  %v4602_v48 = vcombine.low %v1252_v45, %v1260_v27  ;;  %v1158_v16 = vpop.permute.xlu1 %1157 }
 0x17c   : > { %1224 = vrot.lane.b32.xlu0 %v5855_v34, %s8063_s20 }
 0x17d   : > { %3840 = vmatprep.subr.bf16.mxu0 %v4603_v57  ;;  %2205 = vrot.lane.b32.xlu1 %v5638_v6, %s8065_s7  ;;  %v2221_v1 = vsel %vm619_vm0, %v2211_v55, %v7835_v33 }
 0x17e   : > { %3841 = vmatpush2.bf16.msra.mxu0 %v4602_v48  ;;  %v5885_v56 = vpop.permute.xlu0 %2203  ;;  %v2223_v45 = vsel %vm7843_vm14, %v2192_v29, %v2221_v1 }
 0x17f   : > { %8064 = vst [vmem:[#allocation22_spill] sm:$0xff] %v5885_v56  ;;  %v7842_v13 = vrot.slane %v5885_v56, 4  ;;  %v1168_v41 = vpop.permute.xlu1 %1167  ;;  %v1177_v56 = vrot.slane %v1158_v16, 4 }
 0x180   : > { %2195 = vrot.lane.b32.xlu0 %v5609_v30, %s8065_s7 }
 0x181   : > { %v2230_v48 = vsel %vm619_vm0, %v2216_v39, %v7842_v13  ;;  %1171 = vrot.lane.b32.xlu1 %v5622_v25, %s8067_s24  ;;  %v1182_v13 = vrot.slane %v1168_v41, 4 }
 0x182   : > { %v5898_v57 = vpop.permute.xlu0 %1159  ;;  %v2231_v27 = vsel %vm7843_vm14, %v2202_v24, %v2230_v48  ;;  %vm7849_vm14 = vcmask 89088  }
 0x183   : > { %8066 = vst [vmem:[#allocation23_spill] sm:$0xff] %v5898_v57  ;;  %v7844_v55 = vrot.slane %v5898_v57, 4  ;;  %v4731_v33 = vcombine.high %v2223_v45, %v2231_v27  ;;  %v4730_v14 = vcombine.low %v2223_v45, %v2231_v27  ;;  %v2129_v17 = vpop.permute.xlu1 %2128 }
 0x184   : > { %1161 = vrot.lane.b32.xlu0 %v5855_v34, %s8067_s24 }
 0x185   : > { %3883 = vmatprep.subr.bf16.mxu1 %v4731_v33  ;;  %2142 = vrot.lane.b32.xlu1 %v5638_v6, %s8069_s19  ;;  %v1187_v24 = vsel %vm619_vm0, %v1177_v56, %v7844_v55 }
 0x186   : > { %3884 = vmatpush2.bf16.msra.mxu1 %v4730_v14  ;;  %v5907_v39 = vpop.permute.xlu0 %1169  ;;  %v1189_v48 = vsel %vm7849_vm14, %v1158_v16, %v1187_v24 }
 0x187   : > { %8068 = vst [vmem:[#allocation24_spill] sm:$0xff] %v5907_v39  ;;  %v7851_v29 = vrot.slane %v5907_v39, 4  ;;  %v2139_v1 = vpop.permute.xlu1 %2138  ;;  %v2148_v39 = vrot.slane %v2129_v17, 4 }
 0x188   : > { %2132 = vrot.lane.b32.xlu0 %v5609_v30, %s8069_s19  ;;  %v2153_v16 = vrot.slane %v2139_v1, 4 }
 0x189   : > { %v1196_v14 = vsel %vm619_vm0, %v1182_v13, %v7851_v29  ;;  %1108 = vrot.lane.b32.xlu1 %v5622_v25, %s8071_s8  ;;  %v5934_v25 = vld [vmem:[%s5209_s13 + $0x34] sm:$0xff] }
 0x18a   : > { %v5920_v33 = vpop.permute.xlu0 %2130  ;;  %v1197_v45 = vsel %vm7849_vm14, %v1168_v41, %v1196_v14  ;;  %vm7855_vm14 = vcmask 146432  }
 0x18b   : > { %8070 = vst [vmem:[#allocation25_spill] sm:$0xff] %v5920_v33  ;;  %v7850_v56 = vrot.slane %v5920_v33, 4  ;;  %v4595_v27 = vcombine.high %v1189_v48, %v1197_v45  ;;  %v4594_v55 = vcombine.low %v1189_v48, %v1197_v45  ;;  %v1095_v57 = vpop.permute.xlu1 %1094 }
 0x18c   : > { %1098 = vrot.lane.b32.xlu0 %v5855_v34, %s8071_s8 }
 0x18d   : > { %3842 = vmatprep.subr.bf16.mxu0 %v4595_v27  ;;  %2079 = vrot.lane.b32.xlu1 %v5638_v6, %s7867_s30  ;;  %v2158_v24 = vsel %vm619_vm0, %v2148_v39, %v7850_v56  ;;  %v5956_v56 = vld [vmem:[%s5209_s13 + $0x38] sm:$0xff] }
 0x18e   : > { %3843 = vmatpush2.bf16.msra.mxu0 %v4594_v55  ;;  %v5929_v13 = vpop.permute.xlu0 %2140  ;;  %v5943_v55 = vld [vmem:[%s5209_s13 + $0x14] sm:$0xff]  ;;  %v2160_v48 = vsel %vm7855_vm14, %v2129_v17, %v2158_v24 }
 0x18f   : > { %8072 = vst [vmem:[#allocation26_spill] sm:$0xff] %v5929_v13  ;;  %v7852_v41 = vrot.slane %v5929_v13, 4  ;;  %v1105_v34 = vpop.permute.xlu1 %1104 }
 0x190   : > { %2069 = vrot.lane.b32.xlu0 %v5609_v30, %s7867_s30  ;;  %v1119_v17 = vrot.slane %v1105_v34, 4  ;;  %s8079_s30 = smov 28  }
 0x191   : > { %v2167_v6 = vsel %vm619_vm0, %v2153_v16, %v7852_v41  ;;  %1047 = vrot.lane.b32.xlu1 %v5934_v25, %s7865_s26  ;;  %v1114_v16 = vrot.slane %v1095_v57, 4  ;;  %v5961_v41 = vld [vmem:[%s5209_s13 + $0x18] sm:$0xff] }
 0x192   : > { %v5948_v14 = vpop.permute.xlu0 %1096  ;;  %v2168_v39 = vsel %vm7855_vm14, %v2139_v1, %v2167_v6  ;;  %vm7869_vm14 = vcmask 728064  }
 0x193   : > { %8073 = vst [vmem:[#allocation27_spill] sm:$0xff] %v5948_v14  ;;  %v7856_v45 = vrot.slane %v5948_v14, 4  ;;  %v4723_v30 = vcombine.high %v2160_v48, %v2168_v39  ;;  %v4722_v27 = vcombine.low %v2160_v48, %v2168_v39  ;;  %v2066_v29 = vpop.permute.xlu1 %2065 }
 0x194   : > { %1037 = vrot.lane.b32.xlu0 %v5943_v55, %s7865_s26  ;;  %s8080_s26 = smov 99  }
 0x195   : > { %3885 = vmatprep.subr.bf16.mxu1 %v4723_v30  ;;  %2018 = vrot.lane.b32.xlu1 %v5956_v56, %s7863_s28  ;;  %v1124_v24 = vsel %vm619_vm0, %v1114_v16, %v7856_v45 }
 0x196   : > { %3886 = vmatpush2.bf16.msra.mxu1 %v4722_v27  ;;  %v5963_v33 = vpop.permute.xlu0 %1106  ;;  %v1126_v30 = vsel %vm7869_vm14, %v1095_v57, %v1124_v24 }
 0x197   : > { %8074 = vst [vmem:[#allocation28_spill] sm:$0xff] %v5963_v33  ;;  %v7870_v1 = vrot.slane %v5963_v33, 4  ;;  %v2076_v6 = vpop.permute.xlu1 %2075  ;;  %v2085_v33 = vrot.slane %v2066_v29, 4 }
 0x198   : > { %2008 = vrot.lane.b32.xlu0 %v5961_v41, %s7863_s28  ;;  %s8091_s28 = smov 37  }
 0x199   : > { %v1133_v48 = vsel %vm619_vm0, %v1119_v17, %v7870_v1  ;;  %984 = vrot.lane.b32.xlu1 %v5934_v25, %s7878_s15  ;;  %v5990_v17 = vld [vmem:[%s7730_s3] ss:$16 sps:$4 sm:$0xff]  }
 0x19a   : > { %v5976_v39 = vpop.permute.xlu0 %2067  ;;  %v1134_v27 = vsel %vm7869_vm14, %v1105_v34, %v1133_v48  ;;  %8077 = vst [vmem:[#allocation31_spill] sm:$0xff] %v5990_v17  ;;  %vm2096_vm14 = vcmask 154624   ;;  %v2090_v34 = vrot.slane %v2076_v6, 4 }
 0x19b   : > { %8075 = vst [vmem:[#allocation29_spill] sm:$0xff] %v5976_v39  ;;  %v7871_v16 = vrot.slane %v5976_v39, 4  ;;  %v4587_v45 = vcombine.high %v1126_v30, %v1134_v27  ;;  %v4586_v14 = vcombine.low %v1126_v30, %v1134_v27  ;;  %v5985_v13 = vpop.permute.xlu1 %1035 }
 0x19c   : > { %974 = vrot.lane.b32.xlu0 %v5943_v55, %s7878_s15  ;;  %8076 = vst [vmem:[#allocation30_spill] sm:$0xff] %v5985_v13  ;;  %s8088_s15 = smov 100  }
 0x19d   : > { %3844 = vmatprep.subr.bf16.mxu0 %v4587_v45  ;;  %1955 = vrot.lane.b32.xlu1 %v5956_v56, %s8079_s30  ;;  %v2095_v45 = vsel %vm619_vm0, %v2085_v33, %v7871_v16 }
 0x19e   : > { %3845 = vmatpush2.bf16.msra.mxu0 %v4586_v14  ;;  %v5992_v57 = vpop.permute.xlu0 %2077  ;;  %v2097_v33 = vsel %vm2096_vm14, %v2066_v29, %v2095_v45 }
 0x19f   : > { %8078 = vst [vmem:[#allocation32_spill] sm:$0xff] %v5992_v57  ;;  %v7876_v48 = vrot.slane %v5992_v57, 4  ;;  %v6003_v30 = vpop.permute.xlu1 %2006 }
 0x1a0   : > { %1945 = vrot.lane.b32.xlu0 %v5961_v41, %s8079_s30  ;;  %v8085_v45 = vrot.slane %v6003_v30, 4 }
 0x1a1   : > { %v2104_v14 = vsel %vm619_vm0, %v2090_v34, %v7876_v48  ;;  %3847 = vmatmul.mubr.bf16.vlgmr.msra.gmra.mxu0 %v5990_v17  ;;  %921 = vrot.lane.b32.xlu1 %v5934_v25, %s8080_s26  ;;  %v8081_v34 = vrot.slane %v5985_v13, 4  ;;  %v8082_v48 = vrot.slane %v5368_v28, 4 }
 0x1a2   : > { %v6010_v1 = vpop.permute.xlu0 %1045  ;;  %v2105_v16 = vsel %vm2096_vm14, %v2076_v6, %v2104_v14  ;;  %3932 = vmatprep.mubr.bf16.mxu0 %v5598_v20  ;;  %v8083_v20 = vrot.slane %v5375_v32, 4  ;;  %v6035_v6 = vld [vmem:[%s7730_s3 + $0x8] ss:$16 sps:$4 sm:$0xff]   ;;  %v8086_v14 = vrot.slane %v5388_v38, 4 }
 0x1a3   : > { %v7880_v24 = vrot.slane %v6010_v1, 4  ;;  %v4715_v39 = vcombine.high %v2097_v33, %v2105_v16  ;;  %v4714_v57 = vcombine.low %v2097_v33, %v2105_v16  ;;  %v1064_v27 = vsel %vm619_vm0, %v8082_v48, %v8081_v34  ;;  %v6025_v17 = vpop.permute.xlu1 %972 }
 0x1a4   : > { %911 = vrot.lane.b32.xlu0 %v5943_v55, %s8080_s26  ;;  %v2035_v33 = vsel %vm619_vm0, %v8086_v14, %v8085_v45  ;;  %v7884_v34 = vrot.slane %v6025_v17, 4 }
 0x1a5   : > { %3887 = vmatprep.subr.bf16.mxu1 %v4715_v39  ;;  %v1072_v29 = vsel %vm619_vm0, %v8083_v20, %v7880_v24  ;;  %1892 = vrot.lane.b32.xlu1 %v5956_v56, %s8084_s0  ;;  %v1065_v39 = vsel %vm1062_vm1, %v5368_v28, %v1064_v27  ;;  %v8087_v28 = vrot.slane %v5397_v46, 4 }
 0x1a6   : > { %3888 = vmatpush2.bf16.msra.mxu1 %v4714_v57  ;;  %v6037_v16 = vpop.permute.xlu0 %2016  ;;  %v1073_v48 = vsel %vm1062_vm1, %v5375_v32, %v1072_v29 }
 0x1a7   : > { %v7883_v57 = vrot.slane %v6037_v16, 4  ;;  %v4580_v20 = vcombine.low %v1065_v39, %v1073_v48  ;;  %v4581_v24 = vcombine.high %v1065_v39, %v1073_v48  ;;  %v6054_v13 = vpop.permute.xlu1 %1943  ;;  %v2036_v39 = vsel %vm2033_vm2, %v5388_v38, %v2035_v33 }
 0x1a8   : > { %1882 = vrot.lane.b32.xlu0 %v5961_v41, %s8084_s0  ;;  %v7885_v27 = vrot.slane %v6054_v13, 4  ;;  %v8090_v38 = vrot.slane %v5419_v60, 4 }
 0x1a9   : > { %3900 = vmatprep.subr.bf16.mxu0 %v4581_v24  ;;  %v2043_v32 = vsel %vm619_vm0, %v8087_v28, %v7883_v57  ;;  %3890 = vmatmul.mubr.bf16.vlgmr.msra.gmra.mxu1 %v6035_v6  ;;  %v8089_v28 = vrot.slane %v5410_v52, 4 }
 0x1aa   : > { %3901 = vmatpush1.bf16.msra.mxu0 %v4580_v20  ;;  %v6063_v29 = vpop.permute.xlu0 %982  ;;  %858 = vrot.lane.b32.xlu1 %v5934_v25, %s8088_s15  ;;  %v2044_v24 = vsel %vm2033_vm2, %v5397_v46, %v2043_v32 }
 0x1ab   : > { %v7905_v48 = vrot.slane %v6063_v29, 4  ;;  %v4708_v45 = vcombine.low %v2036_v39, %v2044_v24  ;;  %v4709_v14 = vcombine.high %v2036_v39, %v2044_v24  ;;  %v1001_v20 = vsel %vm619_vm0, %v8089_v28, %v7884_v34  ;;  %3975 = vmatprep.mubr.bf16.mxu1 %v5617_v61  ;;  %v6080_v57 = vpop.permute.xlu1 %909 }
 0x1ac   : > { %848 = vrot.lane.b32.xlu0 %v5943_v55, %s8088_s15  ;;  %v1002_v61 = vsel %vm999_vm3, %v5410_v52, %v1001_v20  ;;  %v8092_v39 = vrot.slane %v5432_v2, 4  ;;  %v8093_v52 = vrot.slane %v5443_v11, 4 }
 0x1ad   : > { %3943 = vmatprep.subr.bf16.mxu1 %v4709_v14  ;;  %v1009_v46 = vsel %vm619_vm0, %v8090_v38, %v7905_v48  ;;  %v7887_v14 = vrot.slane %v6080_v57, 4 }
 0x1ae   : > { %3944 = vmatpush1.bf16.msra.mxu1 %v4708_v45  ;;  %v6087_v33 = vpop.permute.xlu0 %1953  ;;  %1829 = vrot.lane.b32.xlu1 %v5956_v56, %s8091_s28  ;;  %v1010_v32 = vsel %vm999_vm3, %v5419_v60, %v1009_v46  ;;  %v1972_v24 = vsel %vm619_vm0, %v8092_v39, %v7885_v27 }
 0x1af   : > { %v7886_v45 = vrot.slane %v6087_v33, 4  ;;  %v4572_v28 = vcombine.low %v1002_v61, %v1010_v32  ;;  %v4573_v38 = vcombine.high %v1002_v61, %v1010_v32  ;;  %v6104_v34 = vpop.permute.xlu1 %1880  ;;  %v1973_v61 = vsel %vm1970_vm4, %v5432_v2, %v1972_v24 }
 0x1b0   : > { %1819 = vrot.lane.b32.xlu0 %v5961_v41, %s8091_s28  ;;  %v7890_v20 = vrot.slane %v6104_v34, 4  ;;  %v8096_v2 = vrot.slane %v5465_v43, 4 }
 0x1b1   : > { %3902 = vmatprep.subr.bf16.mxu0 %v4573_v38  ;;  %v1980_v60 = vsel %vm619_vm0, %v8093_v52, %v7886_v45  ;;  %v8095_v52 = vrot.slane %v5456_v31, 4 }
 0x1b2   : > { %3903 = vmatpush1.bf16.msra.mxu0 %v4572_v28  ;;  %v6112_v46 = vpop.permute.xlu0 %919  ;;  %795 = vrot.lane.b32.xlu1 %v5934_v25, %s8094_s1  ;;  %v1981_v32 = vsel %vm1970_vm4, %v5443_v11, %v1980_v60 }
 0x1b3   : > { %v7888_v39 = vrot.slane %v6112_v46, 4  ;;  %v4700_v38 = vcombine.low %v1973_v61, %v1981_v32  ;;  %v4701_v27 = vcombine.high %v1973_v61, %v1981_v32  ;;  %v938_v28 = vsel %vm619_vm0, %v8095_v52, %v7887_v14  ;;  %v6128_v45 = vpop.permute.xlu1 %846 }
 0x1b4   : > { %785 = vrot.lane.b32.xlu0 %v5943_v55, %s8094_s1  ;;  %v939_v60 = vsel %vm936_vm5, %v5456_v31, %v938_v28  ;;  %v7892_v52 = vrot.slane %v6128_v45, 4  ;;  %v8099_v31 = vrot.slane %v5487_v63, 4 }
 0x1b5   : > { %3945 = vmatprep.subr.bf16.mxu1 %v4701_v27  ;;  %v946_v11 = vsel %vm619_vm0, %v8096_v2, %v7888_v39  ;;  %v8098_v27 = vrot.slane %v5478_v51, 4 }
 0x1b6   : > { %3946 = vmatpush1.bf16.msra.mxu1 %v4700_v38  ;;  %v6135_v24 = vpop.permute.xlu0 %1890  ;;  %1766 = vrot.lane.b32.xlu1 %v5956_v56, %s8097_s2  ;;  %v947_v61 = vsel %vm936_vm5, %v5465_v43, %v946_v11 }
 0x1b7   : > { %v1909_v32 = vsel %vm619_vm0, %v8098_v27, %v7890_v20  ;;  %v7891_v38 = vrot.slane %v6135_v24, 4  ;;  %v4564_v2 = vcombine.low %v939_v60, %v947_v61  ;;  %v4565_v14 = vcombine.high %v939_v60, %v947_v61  ;;  %v6152_v39 = vpop.permute.xlu1 %1817 }
 0x1b8   : > { %1756 = vrot.lane.b32.xlu0 %v5961_v41, %s8097_s2  ;;  %v7895_v28 = vrot.slane %v6152_v39, 4  ;;  %v1910_v60 = vsel %vm1907_vm6, %v5478_v51, %v1909_v32  ;;  %v8102_v51 = vrot.slane %v5509_v35, 4 }
 0x1b9   : > { %3904 = vmatprep.subr.bf16.mxu0 %v4565_v14  ;;  %v1917_v43 = vsel %vm619_vm0, %v8099_v31, %v7891_v38  ;;  %v8101_v31 = vrot.slane %v5500_v7, 4 }
 0x1ba   : > { %3905 = vmatpush1.bf16.msra.mxu0 %v4564_v2  ;;  %v6160_v11 = vpop.permute.xlu0 %856  ;;  %732 = vrot.lane.b32.xlu1 %v5934_v25, %s8100_s27  ;;  %v1918_v14 = vsel %vm1907_vm6, %v5487_v63, %v1917_v43 }
 0x1bb   : > { %v7893_v61 = vrot.slane %v6160_v11, 4  ;;  %v4692_v27 = vcombine.low %v1910_v60, %v1918_v14  ;;  %v4693_v20 = vcombine.high %v1910_v60, %v1918_v14  ;;  %v875_v2 = vsel %vm619_vm0, %v8101_v31, %v7892_v52  ;;  %v6176_v38 = vpop.permute.xlu1 %783 }
 0x1bc   : > { %722 = vrot.lane.b32.xlu0 %v5943_v55, %s8100_s27  ;;  %v876_v43 = vsel %vm873_vm7, %v5500_v7, %v875_v2  ;;  %v7897_v31 = vrot.slane %v6176_v38, 4  ;;  %v8105_v7 = vrot.slane %v5531_v0, 4 }
 0x1bd   : > { %3947 = vmatprep.subr.bf16.mxu1 %v4693_v20  ;;  %v883_v63 = vsel %vm619_vm0, %v8102_v51, %v7893_v61  ;;  %v8104_v20 = vrot.slane %v5522_v47, 4 }
 0x1be   : > { %3948 = vmatpush1.bf16.msra.mxu1 %v4692_v27  ;;  %v6183_v32 = vpop.permute.xlu0 %1827  ;;  %1703 = vrot.lane.b32.xlu1 %v5956_v56, %s8103_s14  ;;  %v884_v60 = vsel %vm873_vm7, %v5509_v35, %v883_v63 }
 0x1bf   : > { %v1846_v14 = vsel %vm619_vm0, %v8104_v20, %v7895_v28  ;;  %v7896_v27 = vrot.slane %v6183_v32, 4  ;;  %v4556_v51 = vcombine.low %v876_v43, %v884_v60  ;;  %v4557_v52 = vcombine.high %v876_v43, %v884_v60  ;;  %v6200_v61 = vpop.permute.xlu1 %1754 }
 0x1c0   : > { %1693 = vrot.lane.b32.xlu0 %v5961_v41, %s8103_s14  ;;  %v7899_v2 = vrot.slane %v6200_v61, 4  ;;  %v1847_v43 = vsel %vm1844_vm8, %v5522_v47, %v1846_v14  ;;  %v8108_v47 = vrot.slane %v5553_v50, 4 }
 0x1c1   : > { %3906 = vmatprep.subr.bf16.mxu0 %v4557_v52  ;;  %v1854_v35 = vsel %vm619_vm0, %v8105_v7, %v7896_v27  ;;  %v8107_v7 = vrot.slane %v5544_v10, 4 }
 0x1c2   : > { %3907 = vmatpush1.bf16.msra.mxu0 %v4556_v51  ;;  %v6208_v63 = vpop.permute.xlu0 %793  ;;  %669 = vrot.lane.b32.xlu1 %v5934_v25, %s8106_s25  ;;  %v1855_v52 = vsel %vm1844_vm8, %v5531_v0, %v1854_v35 }
 0x1c3   : > { %v7898_v60 = vrot.slane %v6208_v63, 4  ;;  %v4684_v20 = vcombine.low %v1847_v43, %v1855_v52  ;;  %v4685_v28 = vcombine.high %v1847_v43, %v1855_v52  ;;  %v812_v51 = vsel %vm619_vm0, %v8107_v7, %v7897_v31  ;;  %v6224_v27 = vpop.permute.xlu1 %720 }
 0x1c4   : > { %659 = vrot.lane.b32.xlu0 %v5943_v55, %s8106_s25  ;;  %v813_v35 = vsel %vm810_vm9, %v5544_v10, %v812_v51  ;;  %v7901_v7 = vrot.slane %v6224_v27, 4  ;;  %v8110_v10 = vrot.slane %v5575_v49, 4 }
 0x1c5   : > { %3949 = vmatprep.subr.bf16.mxu1 %v4685_v28  ;;  %v820_v0 = vsel %vm619_vm0, %v8108_v47, %v7898_v60  ;;  %v8109_v28 = vrot.slane %v5566_v59, 4 }
 0x1c6   : > { %3950 = vmatpush1.bf16.msra.mxu1 %v4684_v20  ;;  %v6231_v14 = vpop.permute.xlu0 %1764  ;;  %1640 = vrot.lane.b32.xlu1 %v5956_v56, %s8052_s11  ;;  %v821_v43 = vsel %vm810_vm9, %v5553_v50, %v820_v0 }
 0x1c7   : > { %v1783_v52 = vsel %vm619_vm0, %v8109_v28, %v7899_v2  ;;  %v7900_v20 = vrot.slane %v6231_v14, 4  ;;  %v4548_v47 = vcombine.low %v813_v35, %v821_v43  ;;  %v4549_v31 = vcombine.high %v813_v35, %v821_v43  ;;  %v6248_v60 = vpop.permute.xlu1 %1691 }
 0x1c8   : > { %1630 = vrot.lane.b32.xlu0 %v5961_v41, %s8052_s11  ;;  %v7903_v51 = vrot.slane %v6248_v60, 4  ;;  %v1784_v35 = vsel %vm1781_vm10, %v5566_v59, %v1783_v52  ;;  %v8112_v59 = vrot.slane %v5603_v44, 4 }
 0x1c9   : > { %3908 = vmatprep.subr.bf16.mxu0 %v4549_v31  ;;  %v1791_v50 = vsel %vm619_vm0, %v8110_v10, %v7900_v20  ;;  %v8111_v10 = vrot.slane %v5588_v54, 4 }
 0x1ca   : > { %3909 = vmatpush1.bf16.msra.mxu0 %v4548_v47  ;;  %v6256_v0 = vpop.permute.xlu0 %730  ;;  %605 = vrot.lane.b32.xlu1 %v5934_v25, %s8053_s10  ;;  %v1792_v31 = vsel %vm1781_vm10, %v5575_v49, %v1791_v50 }
 0x1cb   : > { %v7902_v43 = vrot.slane %v6256_v0, 4  ;;  %v4676_v28 = vcombine.low %v1784_v35, %v1792_v31  ;;  %v4677_v2 = vcombine.high %v1784_v35, %v1792_v31  ;;  %v749_v47 = vsel %vm619_vm0, %v8111_v10, %v7901_v7  ;;  %v6272_v20 = vpop.permute.xlu1 %657 }
 0x1cc   : > { %595 = vrot.lane.b32.xlu0 %v5943_v55, %s8053_s10  ;;  %v750_v50 = vsel %vm747_vm11, %v5588_v54, %v749_v47  ;;  %v7907_v10 = vrot.slane %v6272_v20, 4  ;;  %v8114_v54 = vrot.slane %v5640_v3, 4  ;;  %v7906_v47 = vrot.slane %v5354_v23, 4 }
 0x1cd   : > { %3951 = vmatprep.subr.bf16.mxu1 %v4677_v2  ;;  %v757_v49 = vsel %vm619_vm0, %v8112_v59, %v7902_v43  ;;  %v8113_v2 = vrot.slane %v5628_v19, 4 }
 0x1ce   : > { %3952 = vmatpush1.bf16.msra.mxu1 %v4676_v28  ;;  %v6279_v52 = vpop.permute.xlu0 %1701  ;;  %1577 = vrot.lane.b32.xlu1 %v5956_v56, %s8054_s23  ;;  %v758_v35 = vsel %vm747_vm11, %v5603_v44, %v757_v49 }
 0x1cf   : > { %v1720_v31 = vsel %vm619_vm0, %v8113_v2, %v7903_v51  ;;  %v7904_v28 = vrot.slane %v6279_v52, 4  ;;  %v4540_v59 = vcombine.low %v750_v50, %v758_v35  ;;  %v4541_v7 = vcombine.high %v750_v50, %v758_v35  ;;  %v6296_v43 = vpop.permute.xlu1 %1628 }
 0x1d0   : > { %1567 = vrot.lane.b32.xlu0 %v5961_v41, %s8054_s23  ;;  %v7914_v49 = vrot.slane %v6296_v43, 4  ;;  %v1721_v50 = vsel %vm1718_vm12, %v5628_v19, %v1720_v31  ;;  %v8116_v19 = vrot.slane %v5362_v26, 4 }
 0x1d1   : > { %3910 = vmatprep.subr.bf16.mxu0 %v4541_v7  ;;  %v1728_v44 = vsel %vm619_vm0, %v8114_v54, %v7904_v28  ;;  %v8115_v28 = vrot.slane %v5653_v4, 4 }
 0x1d2   : > { %3911 = vmatpush1.bf16.msra.mxu0 %v4540_v59  ;;  %v6305_v2 = vpop.permute.xlu0 %667  ;;  %1514 = vrot.lane.b32.xlu1 %v5956_v56, %s8056_s29  ;;  %v1729_v7 = vsel %vm1718_vm12, %v5640_v3, %v1728_v44  ;;  %v623_v3 = vsel %vm619_vm0, %v8116_v19, %v7906_v47  ;;  %v8117_v44 = vrot.slane %v5662_v37, 4  ;;  %v8118_v19 = vrot.slane %v5675_v22, 4 }
 0x1d3   : > { %v7908_v35 = vrot.slane %v6305_v2, 4  ;;  %v4668_v51 = vcombine.low %v1721_v50, %v1729_v7  ;;  %v4669_v54 = vcombine.high %v1721_v50, %v1729_v7  ;;  %v686_v59 = vsel %vm619_vm0, %v8115_v28, %v7907_v10  ;;  %v6321_v48 = vpop.permute.xlu1 %603 }
 0x1d4   : > { %1504 = vrot.lane.b32.xlu0 %v5961_v41, %s8056_s29  ;;  %v7913_v31 = vrot.slane %v6321_v48, 4  ;;  %v687_v7 = vsel %vm7911_vm13, %v5653_v4, %v686_v59  ;;  %v1657_v47 = vsel %vm619_vm0, %v8118_v19, %v7914_v49  ;;  %v624_v4 = vsel %vm7912_vm15, %v5362_v26, %v623_v3 }
 0x1d5   : > { %3953 = vmatprep.subr.bf16.mxu1 %v4669_v54  ;;  %v694_v28 = vsel %vm619_vm0, %v8117_v44, %v7908_v35  ;;  %v8119_v35 = vrot.slane %v5699_v21, 4 }
 0x1d6   : > { %3954 = vmatpush1.bf16.msra.mxu1 %v4668_v51  ;;  %v6334_v50 = vpop.permute.xlu0 %1638  ;;  %1451 = vrot.lane.b32.xlu1 %v5956_v56, %s8057_s16  ;;  %v695_v54 = vsel %vm7911_vm13, %v5662_v37, %v694_v28  ;;  %vm8121_vm13 = vcmask 957440  }
 0x1d7   : > { %v7927_v44 = vrot.slane %v6334_v50, 4  ;;  %v4532_v51 = vcombine.low %v687_v7, %v695_v54  ;;  %v4533_v10 = vcombine.high %v687_v7, %v695_v54  ;;  %v631_v23 = vsel %vm619_vm0, %v8119_v35, %v7913_v31  ;;  %v6357_v37 = vpop.permute.xlu1 %1575 }
 0x1d8   : > { %1441 = vrot.lane.b32.xlu0 %v5961_v41, %s8057_s16  ;;  %v632_v59 = vsel %vm7912_vm15, %v5699_v21, %v631_v23  ;;  %v7924_v28 = vrot.slane %v6357_v37, 4  ;;  %v8120_v54 = vrot.slane %v5685_v40, 4  ;;  %v1658_v3 = vsel %vm8121_vm13, %v5675_v22, %v1657_v47  ;;  %vm8122_vm15 = vmmov %vm8121_vm13 }
 0x1d9   : > { %3912 = vmatprep.subr.bf16.mxu0 %v4533_v10  ;;  %v4525_v7 = vcombine.high %v624_v4, %v632_v59  ;;  %v4524_v31 = vcombine.low %v624_v4, %v632_v59  ;;  %vm8124_vm13 = vcmask 965632   ;;  %v8125_v47 = vrot.slane %v5714_v58, 4 }
 0x1da   : > { %v1665_v35 = vsel %vm619_vm0, %v8120_v54, %v7927_v44  ;;  %3913 = vmatpush1.bf16.msra.mxu0 %v4532_v51  ;;  %v6367_v26 = vpop.permute.xlu0 %1565  ;;  %1362 = vrot.lane.b32.xlu1 %v5934_v25, %s8059_s22  ;;  %v8123_v51 = vrot.slane %v5724_v5, 4 }
 0x1db   : > { %v1666_v23 = vsel %vm8122_vm15, %v5685_v40, %v1665_v35  ;;  %v7923_v21 = vrot.slane %v6367_v26, 4  ;;  %3914 = vmatprep.subr.bf16.mxu0 %v4525_v7  ;;  %v6383_v49 = vpop.permute.xlu1 %1512  ;;  %vm8126_vm15 = vmmov %vm8124_vm13 }
 0x1dc   : > { %v4660_v10 = vcombine.low %v1658_v3, %v1666_v23  ;;  %v4661_v19 = vcombine.high %v1658_v3, %v1666_v23  ;;  %v1602_v54 = vsel %vm619_vm0, %v8123_v51, %v7924_v28  ;;  %1352 = vrot.lane.b32.xlu0 %v5943_v55, %s8059_s22  ;;  %v7919_v22 = vrot.slane %v6383_v49, 4 }
 0x1dd   : > { %v1603_v40 = vsel %vm8124_vm13, %v5724_v5, %v1602_v54  ;;  %v1594_v7 = vsel %vm619_vm0, %v8125_v47, %v7923_v21  ;;  %v8127_v23 = vrot.slane %v5750_v18, 4  ;;  %vm8128_vm13 = vcmask 973824  }
 0x1de   : > { %3955 = vmatprep.subr.bf16.mxu1 %v4661_v19  ;;  %3915 = vmatpush1.bf16.msra.mxu0 %v4524_v31  ;;  %v6393_v35 = vpop.permute.xlu0 %1502  ;;  %v1595_v4 = vsel %vm8126_vm15, %v5714_v58, %v1594_v7  ;;  %v8129_v51 = vrot.slane %v5737_v15, 4  ;;  %vm8130_vm15 = vmmov %vm8128_vm13 }
 0x1df   : > { %3956 = vmatpush1.bf16.msra.mxu1 %v4660_v10  ;;  %v7916_v59 = vrot.slane %v6393_v35, 4  ;;  %1299 = vrot.lane.b32.xlu1 %v5934_v25, %s8061_s17  ;;  %v4652_v5 = vcombine.low %v1595_v4, %v1603_v40  ;;  %v4653_v3 = vcombine.high %v1595_v4, %v1603_v40  ;;  %v1539_v19 = vsel %vm619_vm0, %v8127_v23, %v7919_v22  ;;  %v6407_v31 = vpop.permute.xlu1 %1449 }
 0x1e0   : > { %1289 = vrot.lane.b32.xlu0 %v5943_v55, %s8061_s17  ;;  %v1540_v58 = vsel %vm8128_vm13, %v5750_v18, %v1539_v19  ;;  %v7915_v10 = vrot.slane %v6407_v31, 4  ;;  %vm8132_vm13 = vcmask 1039360  }
 0x1e1   : > { %3957 = vmatprep.subr.bf16.mxu1 %v4653_v3  ;;  %v1531_v54 = vsel %vm619_vm0, %v8129_v51, %v7916_v59 }
 0x1e2   : > { %v6417_v40 = vpop.permute.xlu0 %1439  ;;  %v1532_v47 = vsel %vm8130_vm15, %v5737_v15, %v1531_v54  ;;  %vm8134_vm15 = vmmov %vm8132_vm13 }
 0x1e3   : > { %3958 = vmatpush1.bf16.msra.mxu1 %v4652_v5  ;;  %v7917_v7 = vrot.slane %v6417_v40, 4  ;;  %1236 = vrot.lane.b32.xlu1 %v5934_v25, %s8063_s20  ;;  %v4644_v18 = vcombine.low %v1532_v47, %v1540_v58  ;;  %v4645_v4 = vcombine.high %v1532_v47, %v1540_v58  ;;  %v8131_v5 = vrot.slane %v5779_v12, 4  ;;  %v6432_v15 = vpop.permute.xlu1 %1360 }
 0x1e4   : > { %3959 = vmatprep.subr.bf16.mxu1 %v5746_v36  ;;  %1226 = vrot.lane.b32.xlu0 %v5943_v55, %s8063_s20  ;;  %v7918_v19 = vrot.slane %v6432_v15, 4  ;;  %v8133_v58 = vrot.slane %v5768_v8, 4 }
 0x1e5   : > { %v1476_v3 = vsel %vm619_vm0, %v8131_v5, %v7915_v10  ;;  %3916 = vmatprep.subr.bf16.mxu0 %v4645_v4  ;;  %v4949_v5 = vld [vmem:[%s5209_s13 + $0x8] sm:$0xff] }
 0x1e6   : > { %v1477_v23 = vsel %vm8132_vm13, %v5779_v12, %v1476_v3  ;;  %v1468_v51 = vsel %vm619_vm0, %v8133_v58, %v7917_v7  ;;  %3917 = vmatpush2.bf16.msra.mxu0 %v4644_v18  ;;  %v6443_v54 = vpop.permute.xlu0 %1350  ;;  %v4950_v10 = vld [vmem:[%s5209_s13 + $0x28] sm:$0xff]  ;;  %v8135_v18 = vrot.slane %v5807_v9, 4  ;;  %vm8137_vm13 = vcmask 7168  }
 0x1e7   : > { %3960 = vmatpush2.bf16.msra.mxu1 %v5756_v42  ;;  %v1469_v47 = vsel %vm8134_vm15, %v5768_v8, %v1468_v51  ;;  %v4629_v12 = vcombine.high %v4949_v5, %v4950_v10  ;;  %v7921_v4 = vrot.slane %v6443_v54, 4  ;;  %2207 = vrot.lane.b32.xlu1 %v5956_v56, %s8065_s7  ;;  %v6460_v8 = vpop.permute.xlu1 %1297  ;;  %vm8138_vm15 = vmmov %vm8137_vm13 }
 0x1e8   : > { %v4636_v3 = vcombine.low %v1469_v47, %v1477_v23  ;;  %v4637_v59 = vcombine.high %v1469_v47, %v1477_v23  ;;  %3961 = vmatprep.subr.bf16.mxu1 %v5746_v36  ;;  %v1387_v58 = vsel %vm619_vm0, %v8135_v18, %v7918_v19  ;;  %2197 = vrot.lane.b32.xlu0 %v5961_v41, %s8065_s7  ;;  %v7920_v51 = vrot.slane %v6460_v8, 4 }
 0x1e9   : > { %v8136_v23 = vrot.slane %v5794_v53, 4  ;;  %v4628_v18 = vcombine.low %v4949_v5, %v4950_v10  ;;  %v8140_v5 = vld [vmem:[#allocation18_spill] sm:$0xff] }
 0x1ea   : > { %3918 = vmatprep.subr.bf16.mxu0 %v4637_v59  ;;  %v6469_v7 = vpop.permute.xlu0 %1287  ;;  %v1388_v59 = vsel %vm8138_vm15, %v5807_v9, %v1387_v58 }
 0x1eb   : > { %v1379_v47 = vsel %vm619_vm0, %v8136_v23, %v7921_v4  ;;  %3919 = vmatpush2.bf16.msra.mxu0 %v4636_v3  ;;  %3962 = vmatpush2.bf16.msra.mxu1 %v5756_v42  ;;  %v7922_v22 = vrot.slane %v6469_v7, 4  ;;  %v8139_v3 = vrot.slane %v5834_v62, 4 }
 0x1ec   : > { %v1380_v19 = vsel %vm8137_vm13, %v5794_v53, %v1379_v47  ;;  %1173 = vrot.lane.b32.xlu1 %v5934_v25, %s8067_s24  ;;  %3920 = vmatprep.subr.bf16.mxu0 %v4629_v12  ;;  %v6486_v53 = vpop.permute.xlu1 %1234  ;;  %v8141_v12 = vrot.slane %v8140_v5, 4  ;;  %vm8142_vm13 = vcmask 72704  }
 0x1ed   : > { %v1324_v23 = vsel %vm619_vm0, %v8139_v3, %v7920_v51  ;;  %1163 = vrot.lane.b32.xlu0 %v5943_v55, %s8067_s24  ;;  %3963 = vmatprep.subr.bf16.mxu1 %v5746_v36  ;;  %v7925_v9 = vrot.slane %v6486_v53, 4  ;;  %v4621_v10 = vcombine.high %v1380_v19, %v1388_v59  ;;  %vm8143_vm15 = vmmov %vm8142_vm13  ;;  %v4620_v21 = vcombine.low %v1380_v19, %v1388_v59 }
 0x1ee   : > { %v1316_v58 = vsel %vm619_vm0, %v8141_v12, %v7922_v22  ;;  %v6495_v47 = vpop.permute.xlu0 %1224  ;;  %v1325_v51 = vsel %vm8143_vm15, %v5834_v62, %v1324_v23  ;;  %v8144_v12 = vld [vmem:[#allocation20_spill] sm:$0xff] }
 0x1ef   : > { %3921 = vmatpush2.bf16.msra.mxu0 %v4628_v18  ;;  %3964 = vmatpush2.bf16.msra.mxu1 %v5756_v42  ;;  %v1317_v3 = vsel %vm8142_vm13, %v8140_v5, %v1316_v58  ;;  %v7926_v4 = vrot.slane %v6495_v47, 4  ;;  %v8145_v18 = vrot.slane %v8144_v12, 4  ;;  %vm8149_vm13 = vcmask 80896  }
 0x1f0   : > { %3922 = vmatprep.subr.bf16.mxu0 %v4621_v10  ;;  %2144 = vrot.lane.b32.xlu1 %v5956_v56, %s8069_s19  ;;  %v6512_v5 = vpop.permute.xlu1 %2205  ;;  %v4613_v23 = vcombine.high %v1317_v3, %v1325_v51  ;;  %v8146_v10 = vld [vmem:[#allocation19_spill] sm:$0xff]  ;;  %vm8150_vm15 = vmmov %vm8149_vm13  ;;  %v4612_v44 = vcombine.low %v1317_v3, %v1325_v51 }
 0x1f1   : > { %v1261_v22 = vsel %vm619_vm0, %v8145_v18, %v7925_v9  ;;  %2134 = vrot.lane.b32.xlu0 %v5961_v41, %s8069_s19  ;;  %3965 = vmatprep.subr.bf16.mxu1 %v5746_v36  ;;  %v7930_v62 = vrot.slane %v6512_v5, 4  ;;  %v8147_v58 = vrot.slane %v8146_v10, 4 }
 0x1f2   : > { %v6521_v19 = vpop.permute.xlu0 %2195  ;;  %v1262_v18 = vsel %vm8150_vm15, %v8144_v12, %v1261_v22 }
 0x1f3   : > { %v1253_v28 = vsel %vm619_vm0, %v8147_v58, %v7926_v4  ;;  %3923 = vmatpush2.bf16.msra.mxu0 %v4620_v21  ;;  %3966 = vmatpush2.bf16.msra.mxu1 %v5756_v42  ;;  %8148 = vst [vmem:[#allocation18_spill] sm:$0xff] %v6521_v19  ;;  %v7929_v9 = vrot.slane %v6521_v19, 4  ;;  %v8151_v58 = vld [vmem:[#allocation22_spill] sm:$0xff] }
 0x1f4   : > { %v1254_v59 = vsel %vm8149_vm13, %v8146_v10, %v1253_v28  ;;  %3924 = vmatprep.subr.bf16.mxu0 %v4613_v23  ;;  %1110 = vrot.lane.b32.xlu1 %v5934_v25, %s8071_s8  ;;  %v8152_v21 = vrot.slane %v8151_v58, 4  ;;  %v6538_v28 = vpop.permute.xlu1 %1171  ;;  %vm8154_vm13 = vcmask 138240   ;;  %v8155_v23 = vld [vmem:[#allocation21_spill] sm:$0xff] }
 0x1f5   : > { %1100 = vrot.lane.b32.xlu0 %v5943_v55, %s8071_s8  ;;  %3967 = vmatprep.subr.bf16.mxu1 %v5746_v36  ;;  %8153 = vst [vmem:[#allocation20_spill] sm:$0xff] %v6538_v28  ;;  %v7936_v12 = vrot.slane %v6538_v28, 4  ;;  %v4605_v25 = vcombine.high %v1254_v59, %v1262_v18  ;;  %v8156_v10 = vrot.slane %v8155_v23, 4  ;;  %vm8158_vm15 = vmmov %vm8154_vm13  ;;  %v4604_v19 = vcombine.low %v1254_v59, %v1262_v18 }
 0x1f6   : > { %v2232_v4 = vsel %vm619_vm0, %v8152_v21, %v7930_v62  ;;  %v6549_v55 = vpop.permute.xlu0 %1161 }
 0x1f7   : > { %v2233_v22 = vsel %vm8154_vm13, %v8151_v58, %v2232_v4  ;;  %v2224_v21 = vsel %vm619_vm0, %v8156_v10, %v7929_v9  ;;  %3925 = vmatpush2.bf16.msra.mxu0 %v4612_v44  ;;  %3968 = vmatpush2.bf16.msra.mxu1 %v5756_v42  ;;  %8157 = vst [vmem:[#allocation19_spill] sm:$0xff] %v6549_v55  ;;  %v7935_v3 = vrot.slane %v6549_v55, 4  ;;  %v8160_v44 = vld [vmem:[#allocation24_spill] sm:$0xff]  ;;  %vm8163_vm13 = vcmask 89088  }
 0x1f8   : > { %v2225_v51 = vsel %vm8158_vm15, %v8155_v23, %v2224_v21  ;;  %v6555_v4 = vcombine.high %v5956_v56, %v5956_v56  ;;  %3926 = vmatprep.subr.bf16.mxu0 %v4605_v25  ;;  %2081 = vrot.lane.b32.xlu1 %v5956_v56, %s8159_s9  ;;  %v8161_v9 = vrot.slane %v8160_v44, 4  ;;  %v6567_v23 = vpop.permute.xlu1 %2142  ;;  %v6571_v25 = vcombine.high %v5961_v41, %v5961_v41  ;;  %vm8167_vm15 = vmmov %vm8163_vm13 }
 0x1f9   : > { %v4732_v58 = vcombine.low %v2225_v51, %v2233_v22  ;;  %v4733_v10 = vcombine.high %v2225_v51, %v2233_v22  ;;  %2071 = vrot.lane.b32.xlu0 %v5961_v41, %s8159_s9  ;;  %8162 = vst [vmem:[#allocation22_spill] sm:$0xff] %v6567_v23  ;;  %v7937_v22 = vrot.slane %v6567_v23, 4 }
 0x1fa   : > { %v1198_v62 = vsel %vm619_vm0, %v8161_v9, %v7936_v12  ;;  %v8164_v9 = vld [vmem:[#allocation23_spill] sm:$0xff]  ;;  %v6581_v21 = vpop.permute.xlu0 %2132 }
 0x1fb   : > { %v1199_v56 = vsel %vm8163_vm13, %v8160_v44, %v1198_v62  ;;  %3969 = vmatprep.subr.bf16.mxu1 %v4733_v10  ;;  %v8165_v59 = vrot.slane %v8164_v9, 4  ;;  %3927 = vmatpush2.bf16.msra.mxu0 %v4604_v19  ;;  %8166 = vst [vmem:[#allocation21_spill] sm:$0xff] %v6581_v21  ;;  %v7946_v51 = vrot.slane %v6581_v21, 4  ;;  %v6590_v44 = vld [vmem:[%s8169_s6 + $0x4] ss:$0 sps:$4 sm:$0xff]   ;;  %vm8174_vm13 = vcmask 146432  }
 0x1fc   : > { %3970 = vmatpush2.bf16.msra.mxu1 %v4732_v58  ;;  %1049 = vrot.lane.b32.xlu1 %v6555_v4, %s8168_s12  ;;  %s8179_s6 = smov 27  }
 0x1fd   : > { %v1190_v18 = vsel %vm619_vm0, %v8165_v59, %v7935_v3  ;;  %v8170_v59 = vld [vmem:[#allocation26_spill] sm:$0xff]  ;;  %1039 = vrot.lane.b32.xlu0 %v6571_v25, %s8168_s12  ;;  %v8175_v3 = vld [vmem:[#allocation25_spill] sm:$0xff] }
 0x1fe   : > { %v1191_v41 = vsel %vm8167_vm15, %v8164_v9, %v1190_v18  ;;  %v8171_v19 = vrot.slane %v8170_v59, 4  ;;  %v6599_v9 = vpop.permute.xlu1 %1108  ;;  %v6603_v18 = vld [vmem:[%s8173_s21] ss:$0 sps:$4 sm:$0xff]   ;;  %v8176_v12 = vrot.slane %v8175_v3, 4  ;;  %vm8178_vm15 = vmmov %vm8174_vm13  ;;  %s8187_s21 = smov 91  }
 0x1ff   : > { %v4596_v62 = vcombine.low %v1191_v41, %v1199_v56  ;;  %v4597_v10 = vcombine.high %v1191_v41, %v1199_v56  ;;  %8172 = vst [vmem:[#allocation24_spill] sm:$0xff] %v6599_v9  ;;  %v7947_v41 = vrot.slane %v6599_v9, 4 }
 0x200   : > { %v2169_v58 = vsel %vm619_vm0, %v8171_v19, %v7937_v22  ;;  %v2161_v19 = vsel %vm619_vm0, %v8176_v12, %v7946_v51  ;;  %v6613_v22 = vpop.permute.xlu0 %1098  ;;  %2020 = vrot.lane.b32.xlu1 %v6590_v44, %s8179_s6 }
 0x201   : > { %v2170_v56 = vsel %vm8174_vm13, %v8170_v59, %v2169_v58  ;;  %3928 = vmatprep.subr.bf16.mxu0 %v4597_v10  ;;  %8177 = vst [vmem:[#allocation23_spill] sm:$0xff] %v6613_v22  ;;  %v2162_v23 = vsel %vm8178_vm15, %v8175_v3, %v2161_v19  ;;  %v7952_v55 = vrot.slane %v6613_v22, 4  ;;  %v8180_v58 = vld [vmem:[#allocation28_spill] sm:$0xff]  ;;  %2010 = vrot.lane.b32.xlu0 %v6603_v18, %s8179_s6  ;;  %vm8182_vm13 = vcmask 728064  }
 0x202   : > { %3929 = vmatpush2.bf16.msra.mxu0 %v4596_v62  ;;  %v4724_v10 = vcombine.low %v2162_v23, %v2170_v56  ;;  %v4725_v59 = vcombine.high %v2162_v23, %v2170_v56  ;;  %v8181_v21 = vrot.slane %v8180_v58, 4  ;;  %v6627_v12 = vpop.permute.xlu1 %2079  ;;  %v8183_v23 = vld [vmem:[#allocation27_spill] sm:$0xff]  ;;  %vm8186_vm15 = vmmov %vm8182_vm13 }
 0x203   : > { %v7953_v62 = vrot.slane %v6627_v12, 4  ;;  %v8184_v56 = vrot.slane %v8183_v23, 4 }
 0x204   : > { %v1135_v28 = vsel %vm619_vm0, %v8181_v21, %v7947_v41  ;;  %3971 = vmatprep.subr.bf16.mxu1 %v4725_v59  ;;  %v6637_v51 = vpop.permute.xlu0 %2069  ;;  %986 = vrot.lane.b32.xlu1 %v6555_v4, %s8187_s21 }
 0x205   : > { %v1136_v3 = vsel %vm8182_vm13, %v8180_v58, %v1135_v28  ;;  %v1127_v19 = vsel %vm619_vm0, %v8184_v56, %v7952_v55  ;;  %3972 = vmatpush2.bf16.msra.mxu1 %v4724_v10  ;;  %8185 = vst [vmem:[#allocation26_spill] sm:$0xff] %v6637_v51  ;;  %v7956_v41 = vrot.slane %v6637_v51, 4  ;;  %v8188_v58 = vld [vmem:[#allocation32_spill] sm:$0xff]  ;;  %976 = vrot.lane.b32.xlu0 %v6571_v25, %s8187_s21  ;;  %vm8221_vm13 = vcmask 900096  }
 0x206   : > { %v1128_v21 = vsel %vm8186_vm15, %v8183_v23, %v1127_v19  ;;  %v8189_v22 = vrot.slane %v8188_v58, 4  ;;  %v6651_v10 = vpop.permute.xlu1 %1047  ;;  %vm8223_vm15 = vmmov %vm8221_vm13 }
 0x207   : > { %v4588_v28 = vcombine.low %v1128_v21, %v1136_v3  ;;  %v4589_v59 = vcombine.high %v1128_v21, %v1136_v3  ;;  %v7957_v56 = vrot.slane %v6651_v10, 4  ;;  %v8190_v3 = vld [vmem:[#allocation29_spill] sm:$0xff] }
 0x208   : > { %v2106_v9 = vsel %vm619_vm0, %v8189_v22, %v7953_v62  ;;  %v8191_v19 = vrot.slane %v8190_v3, 4  ;;  %v6661_v55 = vpop.permute.xlu0 %1037  ;;  %1957 = vrot.lane.b32.xlu1 %v6590_v44, %s8079_s30 }
 0x209   : > { %v2107_v23 = vsel %vm2096_vm14, %v8188_v58, %v2106_v9  ;;  %3930 = vmatprep.subr.bf16.mxu0 %v4589_v59  ;;  %v7958_v62 = vrot.slane %v6661_v55, 4  ;;  %v8192_v58 = vrot.slane %v6010_v1, 4  ;;  %1947 = vrot.lane.b32.xlu0 %v6603_v18, %s8079_s30 }
 0x20a   : > { %v2098_v21 = vsel %vm619_vm0, %v8191_v19, %v7956_v41  ;;  %3931 = vmatpush2.bf16.msra.mxu0 %v4588_v28  ;;  %v6675_v28 = vpop.permute.xlu1 %2018  ;;  %v8195_v41 = vld [vmem:[#allocation31_spill] sm:$0xff] }
 0x20b   : > { %v2099_v22 = vsel %vm2096_vm14, %v8190_v3, %v2098_v21  ;;  %v1074_v51 = vsel %vm619_vm0, %v8192_v58, %v7957_v56  ;;  %v7959_v19 = vrot.slane %v6675_v28, 4 }
 0x20c   : > { %v4716_v9 = vcombine.low %v2099_v22, %v2107_v23  ;;  %v4717_v59 = vcombine.high %v2099_v22, %v2107_v23  ;;  %v1075_v3 = vsel %vm1062_vm1, %v6010_v1, %v1074_v51  ;;  %v8193_v23 = vld [vmem:[#allocation30_spill] sm:$0xff]  ;;  %v6686_v58 = vpop.permute.xlu0 %2008  ;;  %v6693_v1 = vld [vmem:[%s7730_s3 + $0x4] ss:$16 sps:$4 sm:$0xff]   ;;  %923 = vrot.lane.b32.xlu1 %v6555_v4, %s8080_s26 }
 0x20d   : > { %v8194_v21 = vrot.slane %v8193_v23, 4  ;;  %3933 = vmatmul.mubr.bf16.vlgmr.msra.gmra.mxu0 %v8195_v41  ;;  %v7960_v51 = vrot.slane %v6686_v58, 4  ;;  %913 = vrot.lane.b32.xlu0 %v6571_v25, %s8080_s26 }
 0x20e   : > { %3973 = vmatprep.subr.bf16.mxu1 %v4717_v59  ;;  %4018 = vmatprep.mubr.bf16.mxu0 %v6693_v1 }
 0x20f   : > { %v1066_v22 = vsel %vm619_vm0, %v8194_v21, %v7958_v62  ;;  %3974 = vmatpush2.bf16.msra.mxu1 %v4716_v9  ;;  %v8196_v9 = vrot.slane %v6037_v16, 4  ;;  %v6706_v21 = vpop.permute.xlu1 %984 }
 0x210   : > { %v1067_v56 = vsel %vm1062_vm1, %v8193_v23, %v1066_v22  ;;  %8197 = vst [vmem:[#allocation25_spill] sm:$0xff] %v6706_v21  ;;  %v7963_v62 = vrot.slane %v6706_v21, 4  ;;  %1894 = vrot.lane.b32.xlu1 %v6590_v44, %s8084_s0 }
 0x211   : > { %v4582_v59 = vcombine.low %v1067_v56, %v1075_v3  ;;  %v4583_v41 = vcombine.high %v1067_v56, %v1075_v3  ;;  %v2045_v23 = vsel %vm619_vm0, %v8196_v9, %v7959_v19  ;;  %v8198_v56 = vrot.slane %v6003_v30, 4  ;;  %v6717_v9 = vpop.permute.xlu0 %974  ;;  %1884 = vrot.lane.b32.xlu0 %v6603_v18, %s8084_s0 }
 0x212   : > { %v2046_v22 = vsel %vm2033_vm2, %v6037_v16, %v2045_v23  ;;  %3976 = vmatmul.mubr.bf16.vlgmr.msra.gmra.mxu1 %v6035_v6  ;;  %8199 = vst [vmem:[#allocation28_spill] sm:$0xff] %v6717_v9  ;;  %v6724_v16 = vld [vmem:[%s7730_s3 + $0xc] ss:$16 sps:$4 sm:$0xff]  }
 0x213   : > { %3986 = vmatprep.subr.bf16.mxu0 %v4583_v41  ;;  %v2037_v3 = vsel %vm619_vm0, %v8198_v56, %v7960_v51  ;;  %4061 = vmatprep.mubr.bf16.mxu1 %v6724_v16  ;;  %v7967_v41 = vrot.slane %v6717_v9, 4  ;;  %v6737_v56 = vpop.permute.xlu1 %1955 }
 0x214   : > { %3987 = vmatpush1.bf16.msra.mxu0 %v4582_v59  ;;  %v2038_v19 = vsel %vm2033_vm2, %v6003_v30, %v2037_v3  ;;  %v8200_v59 = vrot.slane %v6063_v29, 4  ;;  %v7966_v51 = vrot.slane %v6737_v56, 4  ;;  %860 = vrot.lane.b32.xlu1 %v6555_v4, %s8088_s15 }
 0x215   : > { %v4710_v23 = vcombine.low %v2038_v19, %v2046_v22  ;;  %v4711_v6 = vcombine.high %v2038_v19, %v2046_v22  ;;  %v8201_v19 = vrot.slane %v6025_v17, 4  ;;  %v6747_v21 = vpop.permute.xlu0 %1945  ;;  %850 = vrot.lane.b32.xlu0 %v6571_v25, %s8088_s15 }
 0x216   : > { %v1011_v30 = vsel %vm619_vm0, %v8200_v59, %v7963_v62  ;;  %v7969_v62 = vrot.slane %v6747_v21, 4 }
 0x217   : > { %v1012_v3 = vsel %vm999_vm3, %v6063_v29, %v1011_v30  ;;  %4029 = vmatprep.subr.bf16.mxu1 %v4711_v6  ;;  %v1003_v22 = vsel %vm619_vm0, %v8201_v19, %v7967_v41  ;;  %v8202_v30 = vrot.slane %v6087_v33, 4 }
 0x218   : > { %4030 = vmatpush1.bf16.msra.mxu1 %v4710_v23  ;;  %v1004_v59 = vsel %vm999_vm3, %v6025_v17, %v1003_v22  ;;  %v6761_v23 = vpop.permute.xlu1 %921  ;;  %1831 = vrot.lane.b32.xlu1 %v6590_v44, %s8091_s28 }
 0x219   : > { %v4574_v29 = vcombine.low %v1004_v59, %v1012_v3  ;;  %v4575_v6 = vcombine.high %v1004_v59, %v1012_v3  ;;  %v1982_v9 = vsel %vm619_vm0, %v8202_v30, %v7966_v51  ;;  %v7968_v19 = vrot.slane %v6761_v23, 4  ;;  %v6771_v59 = vpop.permute.xlu0 %911  ;;  %1821 = vrot.lane.b32.xlu0 %v6603_v18, %s8091_s28  ;;  %s8383_s28 = sld [smem:[#allocation13_spill]] (%p5171_p0) }
 0x21a   : > { %v1983_v17 = vsel %vm1970_vm4, %v6087_v33, %v1982_v9  ;;  %v8203_v3 = vrot.slane %v6054_v13, 4  ;;  %v7989_v51 = vrot.slane %v6771_v59, 4 }
 0x21b   : > { %3988 = vmatprep.subr.bf16.mxu0 %v4575_v6  ;;  %v8204_v6 = vrot.slane %v6112_v46, 4 }
 0x21c   : > { %v1974_v22 = vsel %vm619_vm0, %v8203_v3, %v7969_v62  ;;  %3989 = vmatpush1.bf16.msra.mxu0 %v4574_v29  ;;  %v6785_v29 = vpop.permute.xlu1 %1892  ;;  %797 = vrot.lane.b32.xlu1 %v6555_v4, %s8094_s1 }
 0x21d   : > { %v1975_v30 = vsel %vm1970_vm4, %v6054_v13, %v1974_v22  ;;  %v948_v41 = vsel %vm619_vm0, %v8204_v6, %v7968_v19  ;;  %v7970_v3 = vrot.slane %v6785_v29, 4  ;;  %v8206_v19 = vrot.slane %v6135_v24, 4  ;;  %787 = vrot.lane.b32.xlu0 %v6571_v25, %s8094_s1 }
 0x21e   : > { %v4702_v33 = vcombine.low %v1975_v30, %v1983_v17  ;;  %v4703_v9 = vcombine.high %v1975_v30, %v1983_v17  ;;  %v949_v13 = vsel %vm936_vm5, %v6112_v46, %v948_v41  ;;  %v8205_v17 = vrot.slane %v6080_v57, 4  ;;  %v6795_v30 = vpop.permute.xlu0 %1882 }
 0x21f   : > { %v1919_v46 = vsel %vm619_vm0, %v8206_v19, %v7970_v3  ;;  %v7972_v41 = vrot.slane %v6795_v30, 4  ;;  %s4838_s6 = sshll.u32 (%p5171_p0), %s8383_s28, 5 }
 0x220   : > { %4031 = vmatprep.subr.bf16.mxu1 %v4703_v9  ;;  %v940_v22 = vsel %vm619_vm0, %v8205_v17, %v7989_v51  ;;  %v8207_v17 = vrot.slane %v6104_v34, 4  ;;  %1768 = vrot.lane.b32.xlu1 %v6590_v44, %s8097_s2  ;;  %s4353_s30 = scalar_lea.vmem (%p5171_p0), %s8384_s18, %s4838_s6 }
 0x221   : > { %4032 = vmatpush1.bf16.msra.mxu1 %v4702_v33  ;;  %v941_v6 = vsel %vm936_vm5, %v6080_v57, %v940_v22  ;;  %v6809_v33 = vpop.permute.xlu1 %858  ;;  %v1920_v57 = vsel %vm1907_vm6, %v6135_v24, %v1919_v46  ;;  %1758 = vrot.lane.b32.xlu0 %v6603_v18, %s8097_s2 }
 0x222   : > { %v4566_v9 = vcombine.low %v941_v6, %v949_v13  ;;  %v4567_v62 = vcombine.high %v941_v6, %v949_v13  ;;  %v1911_v19 = vsel %vm619_vm0, %v8207_v17, %v7972_v41  ;;  %v7971_v22 = vrot.slane %v6809_v33, 4  ;;  %v6819_v3 = vpop.permute.xlu0 %848 }
 0x223   : > { %v1912_v13 = vsel %vm1907_vm6, %v6104_v34, %v1911_v19  ;;  %v8208_v6 = vrot.slane %v6160_v11, 4  ;;  %v7974_v46 = vrot.slane %v6819_v3, 4  ;;  %v8209_v19 = vrot.slane %v6128_v45, 4 }
 0x224   : > { %3990 = vmatprep.subr.bf16.mxu0 %v4567_v62  ;;  %v4694_v62 = vcombine.low %v1912_v13, %v1920_v57  ;;  %v4695_v17 = vcombine.high %v1912_v13, %v1920_v57  ;;  %v8210_v13 = vrot.slane %v6183_v32, 4  ;;  %734 = vrot.lane.b32.xlu1 %v6555_v4, %s8100_s27 }
 0x225   : > { %3991 = vmatpush1.bf16.msra.mxu0 %v4566_v9  ;;  %v885_v24 = vsel %vm619_vm0, %v8208_v6, %v7971_v22  ;;  %v6833_v9 = vpop.permute.xlu1 %1829  ;;  %v877_v6 = vsel %vm619_vm0, %v8209_v19, %v7974_v46  ;;  %724 = vrot.lane.b32.xlu0 %v6571_v25, %s8100_s27 }
 0x226   : > { %v886_v34 = vsel %vm873_vm7, %v6160_v11, %v885_v24  ;;  %4033 = vmatprep.subr.bf16.mxu1 %v4695_v17  ;;  %v7973_v22 = vrot.slane %v6833_v9, 4  ;;  %v6843_v41 = vpop.permute.xlu0 %1819  ;;  %v878_v57 = vsel %vm873_vm7, %v6128_v45, %v877_v6  ;;  %v8211_v6 = vrot.slane %v6152_v39, 4 }
 0x227   : > { %4034 = vmatpush1.bf16.msra.mxu1 %v4694_v62  ;;  %v7976_v24 = vrot.slane %v6843_v41, 4  ;;  %v4558_v17 = vcombine.low %v878_v57, %v886_v34  ;;  %v4559_v19 = vcombine.high %v878_v57, %v886_v34  ;;  %v8212_v57 = vrot.slane %v6208_v63, 4 }
 0x228   : > { %v1856_v11 = vsel %vm619_vm0, %v8210_v13, %v7973_v22  ;;  %1705 = vrot.lane.b32.xlu1 %v6590_v44, %s8103_s14 }
 0x229   : > { %v6857_v62 = vpop.permute.xlu1 %795  ;;  %v1857_v45 = vsel %vm1844_vm8, %v6183_v32, %v1856_v11  ;;  %v1848_v13 = vsel %vm619_vm0, %v8211_v6, %v7976_v24  ;;  %3992 = vmatprep.subr.bf16.mxu0 %v4559_v19  ;;  %1695 = vrot.lane.b32.xlu0 %v6603_v18, %s8103_s14 }
 0x22a   : > { %v7975_v22 = vrot.slane %v6857_v62, 4  ;;  %3993 = vmatpush1.bf16.msra.mxu0 %v4558_v17  ;;  %v6867_v46 = vpop.permute.xlu0 %785  ;;  %v1849_v34 = vsel %vm1844_vm8, %v6152_v39, %v1848_v13  ;;  %v8213_v13 = vrot.slane %v6176_v38, 4 }
 0x22b   : > { %v7978_v11 = vrot.slane %v6867_v46, 4  ;;  %v4686_v19 = vcombine.low %v1849_v34, %v1857_v45  ;;  %v4687_v6 = vcombine.high %v1849_v34, %v1857_v45  ;;  %v8214_v34 = vrot.slane %v6231_v14, 4 }
 0x22c   : > { %v822_v32 = vsel %vm619_vm0, %v8212_v57, %v7975_v22  ;;  %671 = vrot.lane.b32.xlu1 %v6555_v4, %s8106_s25 }
 0x22d   : > { %v6881_v17 = vpop.permute.xlu1 %1766  ;;  %v823_v39 = vsel %vm810_vm9, %v6208_v63, %v822_v32  ;;  %v814_v57 = vsel %vm619_vm0, %v8213_v13, %v7978_v11  ;;  %4035 = vmatprep.subr.bf16.mxu1 %v4687_v6  ;;  %661 = vrot.lane.b32.xlu0 %v6571_v25, %s8106_s25 }
 0x22e   : > { %v7977_v22 = vrot.slane %v6881_v17, 4  ;;  %4036 = vmatpush1.bf16.msra.mxu1 %v4686_v19  ;;  %v6891_v24 = vpop.permute.xlu0 %1756  ;;  %v815_v45 = vsel %vm810_vm9, %v6176_v38, %v814_v57  ;;  %v8215_v57 = vrot.slane %v6200_v61, 4 }
 0x22f   : > { %v7980_v32 = vrot.slane %v6891_v24, 4  ;;  %v4550_v6 = vcombine.low %v815_v45, %v823_v39  ;;  %v4551_v13 = vcombine.high %v815_v45, %v823_v39  ;;  %v8216_v45 = vrot.slane %v6256_v0, 4 }
 0x230   : > { %v1793_v63 = vsel %vm619_vm0, %v8214_v34, %v7977_v22  ;;  %1642 = vrot.lane.b32.xlu1 %v6590_v44, %s8052_s11 }
 0x231   : > { %v6905_v19 = vpop.permute.xlu1 %732  ;;  %v1794_v38 = vsel %vm1781_vm10, %v6231_v14, %v1793_v63  ;;  %v1785_v34 = vsel %vm619_vm0, %v8215_v57, %v7980_v32  ;;  %3994 = vmatprep.subr.bf16.mxu0 %v4551_v13  ;;  %1632 = vrot.lane.b32.xlu0 %v6603_v18, %s8052_s11  ;;  %s8380_s11 = sld [smem:[#allocation36_spill]] }
 0x232   : > { %v7979_v22 = vrot.slane %v6905_v19, 4  ;;  %3995 = vmatpush1.bf16.msra.mxu0 %v4550_v6  ;;  %v6915_v11 = vpop.permute.xlu0 %722  ;;  %v1786_v39 = vsel %vm1781_vm10, %v6200_v61, %v1785_v34  ;;  %v8217_v34 = vrot.slane %v6224_v27, 4 }
 0x233   : > { %v7982_v63 = vrot.slane %v6915_v11, 4  ;;  %v4678_v13 = vcombine.low %v1786_v39, %v1794_v38  ;;  %v4679_v57 = vcombine.high %v1786_v39, %v1794_v38  ;;  %v8218_v39 = vrot.slane %v6279_v52, 4 }
 0x234   : > { %v759_v14 = vsel %vm619_vm0, %v8216_v45, %v7979_v22  ;;  %607 = vrot.lane.b32.xlu1 %v6555_v4, %s8053_s10 }
 0x235   : > { %v6929_v6 = vpop.permute.xlu1 %1703  ;;  %v760_v61 = vsel %vm747_vm11, %v6256_v0, %v759_v14  ;;  %v751_v45 = vsel %vm619_vm0, %v8217_v34, %v7982_v63  ;;  %4037 = vmatprep.subr.bf16.mxu1 %v4679_v57  ;;  %597 = vrot.lane.b32.xlu0 %v6571_v25, %s8053_s10 }
 0x236   : > { %v7981_v22 = vrot.slane %v6929_v6, 4  ;;  %4038 = vmatpush1.bf16.msra.mxu1 %v4678_v13  ;;  %v6939_v32 = vpop.permute.xlu0 %1693  ;;  %v752_v38 = vsel %vm747_vm11, %v6224_v27, %v751_v45  ;;  %v8219_v45 = vrot.slane %v6248_v60, 4 }
 0x237   : > { %v7984_v14 = vrot.slane %v6939_v32, 4  ;;  %v4542_v57 = vcombine.low %v752_v38, %v760_v61  ;;  %v4543_v34 = vcombine.high %v752_v38, %v760_v61  ;;  %v8220_v38 = vrot.slane %v6305_v2, 4 }
 0x238   : > { %v1730_v0 = vsel %vm619_vm0, %v8218_v39, %v7981_v22  ;;  %1579 = vrot.lane.b32.xlu1 %v6590_v44, %s8054_s23 }
 0x239   : > { %v6953_v13 = vpop.permute.xlu1 %669  ;;  %v1731_v27 = vsel %vm1718_vm12, %v6279_v52, %v1730_v0  ;;  %v1722_v39 = vsel %vm619_vm0, %v8219_v45, %v7984_v14  ;;  %3996 = vmatprep.subr.bf16.mxu0 %v4543_v34  ;;  %1569 = vrot.lane.b32.xlu0 %v6603_v18, %s8054_s23 }
 0x23a   : > { %v7983_v22 = vrot.slane %v6953_v13, 4  ;;  %3997 = vmatpush1.bf16.msra.mxu0 %v4542_v57  ;;  %v6963_v63 = vpop.permute.xlu0 %659  ;;  %v1723_v61 = vsel %vm1718_vm12, %v6248_v60, %v1722_v39  ;;  %v8222_v39 = vrot.slane %v6272_v20, 4 }
 0x23b   : > { %v7986_v0 = vrot.slane %v6963_v63, 4  ;;  %v4670_v34 = vcombine.low %v1723_v61, %v1731_v27  ;;  %v4671_v45 = vcombine.high %v1723_v61, %v1731_v27  ;;  %v8224_v61 = vrot.slane %v6334_v50, 4 }
 0x23c   : > { %v696_v52 = vsel %vm619_vm0, %v8220_v38, %v7983_v22  ;;  %1516 = vrot.lane.b32.xlu1 %v6590_v44, %s8056_s29 }
 0x23d   : > { %v6977_v57 = vpop.permute.xlu1 %1640  ;;  %v697_v60 = vsel %vm8221_vm13, %v6305_v2, %v696_v52  ;;  %v688_v38 = vsel %vm619_vm0, %v8222_v39, %v7986_v0  ;;  %4039 = vmatprep.subr.bf16.mxu1 %v4671_v45  ;;  %1506 = vrot.lane.b32.xlu0 %v6603_v18, %s8056_s29  ;;  %vm8225_vm13 = vcmask 957440  }
 0x23e   : > { %v7985_v22 = vrot.slane %v6977_v57, 4  ;;  %4040 = vmatpush1.bf16.msra.mxu1 %v4670_v34  ;;  %v6987_v14 = vpop.permute.xlu0 %1630  ;;  %v689_v27 = vsel %vm8223_vm15, %v6272_v20, %v688_v38  ;;  %v8226_v38 = vrot.slane %v6296_v43, 4  ;;  %vm8227_vm15 = vmmov %vm8225_vm13 }
 0x23f   : > { %v7987_v52 = vrot.slane %v6987_v14, 4  ;;  %v4534_v45 = vcombine.low %v689_v27, %v697_v60  ;;  %v4535_v39 = vcombine.high %v689_v27, %v697_v60  ;;  %v8228_v27 = vrot.slane %v6321_v48, 4 }
 0x240   : > { %v1667_v2 = vsel %vm619_vm0, %v8224_v61, %v7985_v22  ;;  %1453 = vrot.lane.b32.xlu1 %v6590_v44, %s8057_s16 }
 0x241   : > { %v7001_v34 = vpop.permute.xlu1 %605  ;;  %v1668_v20 = vsel %vm8225_vm13, %v6334_v50, %v1667_v2  ;;  %v1659_v61 = vsel %vm619_vm0, %v8226_v38, %v7987_v52  ;;  %3998 = vmatprep.subr.bf16.mxu0 %v4535_v39  ;;  %1443 = vrot.lane.b32.xlu0 %v6603_v18, %s8057_s16  ;;  %vm8229_vm13 = vcmask 908288  }
 0x242   : > { %v7988_v22 = vrot.slane %v7001_v34, 4  ;;  %3999 = vmatpush1.bf16.msra.mxu0 %v4534_v45  ;;  %v7011_v0 = vpop.permute.xlu0 %595  ;;  %v1660_v60 = vsel %vm8227_vm15, %v6296_v43, %v1659_v61  ;;  %v8230_v61 = vld [vmem:[#allocation17_spill] sm:$0xff]  ;;  %vm8232_vm15 = vmmov %vm8229_vm13 }
 0x243   : > { %v7991_v2 = vrot.slane %v7011_v0, 4  ;;  %v4662_v39 = vcombine.low %v1660_v60, %v1668_v20  ;;  %v4663_v38 = vcombine.high %v1660_v60, %v1668_v20  ;;  %v8231_v52 = vrot.slane %v8230_v61, 4 }
 0x244   : > { %v633_v50 = vsel %vm619_vm0, %v8228_v27, %v7988_v22  ;;  %v8233_v60 = vrot.slane %v6357_v37, 4  ;;  %1364 = vrot.lane.b32.xlu1 %v6555_v4, %s8059_s22 }
 0x245   : > { %v7025_v45 = vpop.permute.xlu1 %1577  ;;  %v634_v43 = vsel %vm8229_vm13, %v6321_v48, %v633_v50  ;;  %v625_v27 = vsel %vm619_vm0, %v8231_v52, %v7991_v2  ;;  %4041 = vmatprep.subr.bf16.mxu1 %v4663_v38  ;;  %1354 = vrot.lane.b32.xlu0 %v6571_v25, %s8059_s22  ;;  %vm8234_vm13 = vcmask 965632  }
 0x246   : > { %v7990_v22 = vrot.slane %v7025_v45, 4  ;;  %4042 = vmatpush1.bf16.msra.mxu1 %v4662_v39  ;;  %v7035_v51 = vpop.permute.xlu0 %1567  ;;  %v626_v20 = vsel %vm8232_vm15, %v8230_v61, %v625_v27  ;;  %v8235_v27 = vrot.slane %v6367_v26, 4  ;;  %vm8236_vm15 = vmmov %vm8234_vm13 }
 0x247   : > { %v7993_v50 = vrot.slane %v7035_v51, 4  ;;  %v4526_v52 = vcombine.low %v626_v20, %v634_v43  ;;  %v4527_v38 = vcombine.high %v626_v20, %v634_v43  ;;  %v8237_v20 = vrot.slane %v6383_v49, 4 }
 0x248   : > { %v1604_v48 = vsel %vm619_vm0, %v8233_v60, %v7990_v22  ;;  %1301 = vrot.lane.b32.xlu1 %v6555_v4, %s8061_s17 }
 0x249   : > { %v7049_v39 = vpop.permute.xlu1 %1514  ;;  %v1605_v61 = vsel %vm8234_vm13, %v6357_v37, %v1604_v48  ;;  %v1596_v60 = vsel %vm619_vm0, %v8235_v27, %v7993_v50  ;;  %4000 = vmatprep.subr.bf16.mxu0 %v4527_v38  ;;  %1291 = vrot.lane.b32.xlu0 %v6571_v25, %s8061_s17  ;;  %vm8239_vm13 = vcmask 973824  }
 0x24a   : > { %v7992_v22 = vrot.slane %v7049_v39, 4  ;;  %4001 = vmatpush1.bf16.msra.mxu0 %v4526_v52  ;;  %v7059_v2 = vpop.permute.xlu0 %1504  ;;  %v1597_v43 = vsel %vm8236_vm15, %v6367_v26, %v1596_v60  ;;  %v8240_v60 = vrot.slane %v6393_v35, 4  ;;  %vm8242_vm15 = vmmov %vm8239_vm13 }
 0x24b   : > { %v7995_v48 = vrot.slane %v7059_v2, 4  ;;  %v4654_v38 = vcombine.low %v1597_v43, %v1605_v61  ;;  %v4655_v27 = vcombine.high %v1597_v43, %v1605_v61  ;;  %v8243_v43 = vrot.slane %v6407_v31, 4 }
 0x24c   : > { %v1541_v37 = vsel %vm619_vm0, %v8237_v20, %v7992_v22  ;;  %1238 = vrot.lane.b32.xlu1 %v6555_v4, %s8063_s20 }
 0x24d   : > { %v7073_v52 = vpop.permute.xlu1 %1451  ;;  %v1542_v26 = vsel %vm8239_vm13, %v6383_v49, %v1541_v37  ;;  %v1533_v20 = vsel %vm619_vm0, %v8240_v60, %v7995_v48  ;;  %4043 = vmatprep.subr.bf16.mxu1 %v4655_v27  ;;  %1228 = vrot.lane.b32.xlu0 %v6571_v25, %s8063_s20  ;;  %vm8245_vm13 = vcmask 1039360   ;;  %v4953_v48 = vld [vmem:[%s5209_s13 + $0x10] sm:$0xff] }
 0x24e   : > { %8238 = vst [vmem:[#allocation27_spill] sm:$0xff] %v7073_v52  ;;  %v7994_v22 = vrot.slane %v7073_v52, 4  ;;  %4044 = vmatpush1.bf16.msra.mxu1 %v4654_v38  ;;  %v7083_v50 = vpop.permute.xlu0 %1441  ;;  %v1534_v61 = vsel %vm8242_vm15, %v6393_v35, %v1533_v20  ;;  %v8246_v20 = vrot.slane %v6417_v40, 4  ;;  %vm8248_vm15 = vmmov %vm8245_vm13  ;;  %v4954_v52 = vld [vmem:[%s5209_s13 + $0x30] sm:$0xff] }
 0x24f   : > { %8241 = vst [vmem:[#allocation32_spill] sm:$0xff] %v7083_v50  ;;  %v7998_v37 = vrot.slane %v7083_v50, 4  ;;  %v4646_v27 = vcombine.low %v1534_v61, %v1542_v26  ;;  %v4647_v38 = vcombine.high %v1534_v61, %v1542_v26  ;;  %4045 = vmatprep.subr.bf16.mxu1 %v5746_v36 }
 0x250   : > { %v1478_v49 = vsel %vm619_vm0, %v8243_v43, %v7994_v22  ;;  %2209 = vrot.lane.b32.xlu1 %v6590_v44, %s8065_s7 }
 0x251   : > { %v7098_v35 = vpop.permute.xlu1 %1362  ;;  %v1479_v60 = vsel %vm8245_vm13, %v6407_v31, %v1478_v49  ;;  %v1470_v43 = vsel %vm619_vm0, %v8246_v20, %v7998_v37  ;;  %4002 = vmatprep.subr.bf16.mxu0 %v4647_v38  ;;  %v4631_v31 = vcombine.high %v4953_v48, %v4954_v52  ;;  %v8249_v49 = vrot.slane %v6432_v15, 4  ;;  %2199 = vrot.lane.b32.xlu0 %v6603_v18, %s8065_s7 }
 0x252   : > { %8244 = vst [vmem:[#allocation29_spill] sm:$0xff] %v7098_v35  ;;  %v7999_v22 = vrot.slane %v7098_v35, 4  ;;  %4003 = vmatpush2.bf16.msra.mxu0 %v4646_v27  ;;  %4046 = vmatpush2.bf16.msra.mxu1 %v5756_v42  ;;  %v7109_v26 = vpop.permute.xlu0 %1352  ;;  %v1471_v61 = vsel %vm8248_vm15, %v6417_v40, %v1470_v43  ;;  %v8250_v40 = vrot.slane %v6443_v54, 4  ;;  %vm8251_vm13 = vcmask 7168  }
 0x253   : > { %8247 = vst [vmem:[#allocation30_spill] sm:$0xff] %v7109_v26  ;;  %v8016_v38 = vrot.slane %v7109_v26, 4  ;;  %v4638_v27 = vcombine.low %v1471_v61, %v1479_v60  ;;  %v4639_v37 = vcombine.high %v1471_v61, %v1479_v60  ;;  %4047 = vmatprep.subr.bf16.mxu1 %v5746_v36  ;;  %v4630_v61 = vcombine.low %v4953_v48, %v4954_v52  ;;  %vm8252_vm15 = vmmov %vm8251_vm13 }
 0x254   : > { %v1389_v20 = vsel %vm619_vm0, %v8249_v49, %v7999_v22  ;;  %1175 = vrot.lane.b32.xlu1 %v6555_v4, %s8067_s24 }
 0x255   : > { %v1381_v43 = vsel %vm619_vm0, %v8250_v40, %v8016_v38  ;;  %4004 = vmatprep.subr.bf16.mxu0 %v4639_v37  ;;  %v7131_v49 = vpop.permute.xlu1 %1299  ;;  %v1390_v26 = vsel %vm8252_vm15, %v6432_v15, %v1389_v20  ;;  %v8253_v37 = vrot.slane %v6460_v8, 4  ;;  %1165 = vrot.lane.b32.xlu0 %v6571_v25, %s8067_s24  ;;  %v8254_v15 = vrot.slane %v6469_v7, 4  ;;  %s8381_s24 = sld [smem:[#allocation16_spill]] }
 0x256   : > { %v8013_v22 = vrot.slane %v7131_v49, 4  ;;  %4005 = vmatpush2.bf16.msra.mxu0 %v4638_v27  ;;  %4048 = vmatpush2.bf16.msra.mxu1 %v5756_v42  ;;  %v7135_v60 = vpop.permute.xlu0 %1289  ;;  %v1382_v35 = vsel %vm8251_vm13, %v6443_v54, %v1381_v43  ;;  %vm8255_vm13 = vcmask 72704  }
 0x257   : > { %v8006_v50 = vrot.slane %v7135_v60, 4  ;;  %4006 = vmatprep.subr.bf16.mxu0 %v4631_v31  ;;  %4049 = vmatprep.subr.bf16.mxu1 %v5746_v36  ;;  %v4623_v52 = vcombine.high %v1382_v35, %v1390_v26  ;;  %vm8256_vm15 = vmmov %vm8255_vm13 }
 0x258   : > { %v1326_v27 = vsel %vm619_vm0, %v8253_v37, %v8013_v22  ;;  %2146 = vrot.lane.b32.xlu1 %v6590_v44, %s8069_s19 }
 0x259   : > { %v1318_v54 = vsel %vm619_vm0, %v8254_v15, %v8006_v50  ;;  %v7157_v48 = vpop.permute.xlu1 %1236  ;;  %v1327_v43 = vsel %vm8256_vm15, %v6460_v8, %v1326_v27  ;;  %v4622_v50 = vcombine.low %v1382_v35, %v1390_v26  ;;  %2136 = vrot.lane.b32.xlu0 %v6603_v18, %s8069_s19 }
 0x25a   : > { %v8007_v31 = vrot.slane %v7157_v48, 4  ;;  %4007 = vmatpush2.bf16.msra.mxu0 %v4630_v61  ;;  %4050 = vmatpush2.bf16.msra.mxu1 %v5756_v42  ;;  %v7161_v20 = vpop.permute.xlu0 %1226  ;;  %v1319_v40 = vsel %vm8255_vm13, %v6469_v7, %v1318_v54  ;;  %v8257_v61 = vrot.slane %v6486_v53, 4  ;;  %v8258_v7 = vrot.slane %v6495_v47, 4 }
 0x25b   : > { %v8008_v37 = vrot.slane %v7161_v20, 4  ;;  %4008 = vmatprep.subr.bf16.mxu0 %v4623_v52  ;;  %4051 = vmatprep.subr.bf16.mxu1 %v5746_v36  ;;  %v4615_v54 = vcombine.high %v1319_v40, %v1327_v43  ;;  %vm8259_vm13 = vcmask 80896   ;;  %s7657_s19 = scalar_lea.vmem [#allocation6], %s8381_s24 }
 0x25c   : > { %v1263_v15 = vsel %vm619_vm0, %v8257_v61, %v8007_v31  ;;  %vm8260_vm15 = vmmov %vm8259_vm13  ;;  %1112 = vrot.lane.b32.xlu1 %v6555_v4, %s8071_s8 }
 0x25d   : > { %v1255_v8 = vsel %vm619_vm0, %v8258_v7, %v8008_v37  ;;  %v7183_v27 = vpop.permute.xlu1 %2207  ;;  %v1264_v61 = vsel %vm8260_vm15, %v6486_v53, %v1263_v15  ;;  %v4614_v37 = vcombine.low %v1319_v40, %v1327_v43  ;;  %1102 = vrot.lane.b32.xlu0 %v6571_v25, %s8071_s8  ;;  %v8262_v53 = vld [vmem:[#allocation18_spill] sm:$0xff] }
 0x25e   : > { %v8010_v52 = vrot.slane %v7183_v27, 4  ;;  %4009 = vmatpush2.bf16.msra.mxu0 %v4622_v50  ;;  %4052 = vmatpush2.bf16.msra.mxu1 %v5756_v42  ;;  %v7187_v35 = vpop.permute.xlu0 %2197  ;;  %v1256_v26 = vsel %vm8259_vm13, %v6495_v47, %v1255_v8  ;;  %v8261_v50 = vrot.slane %v6512_v5, 4  ;;  %v8263_v47 = vrot.slane %v8262_v53, 4 }
 0x25f   : > { %v8009_v31 = vrot.slane %v7187_v35, 4  ;;  %4010 = vmatprep.subr.bf16.mxu0 %v4615_v54  ;;  %4053 = vmatprep.subr.bf16.mxu1 %v5746_v36  ;;  %v4607_v4 = vcombine.high %v1256_v26, %v1264_v61  ;;  %vm8264_vm13 = vcmask 138240  }
 0x260   : > { %v2234_v7 = vsel %vm619_vm0, %v8261_v50, %v8010_v52  ;;  %vm8265_vm15 = vmmov %vm8264_vm13  ;;  %2083 = vrot.lane.b32.xlu1 %v6590_v44, %s8159_s9  ;;  %v4606_v52 = vcombine.low %v1256_v26, %v1264_v61  ;;  %v4158_v26 = vld [vmem:[%s7731_s4] sm:$0xff] }
 0x261   : > { %v2226_v15 = vsel %vm619_vm0, %v8263_v47, %v8009_v31  ;;  %v7209_v8 = vpop.permute.xlu1 %1173  ;;  %v2235_v54 = vsel %vm8264_vm13, %v6512_v5, %v2234_v7  ;;  %v8266_v5 = vld [vmem:[#allocation20_spill] sm:$0xff]  ;;  %2073 = vrot.lane.b32.xlu0 %v6603_v18, %s8159_s9  ;;  %vm8270_vm13 = vcmask 89088  }
 0x262   : > { %v8012_v50 = vrot.slane %v7209_v8, 4  ;;  %4011 = vmatpush2.bf16.msra.mxu0 %v4614_v37  ;;  %4054 = vmatpush2.bf16.msra.mxu1 %v5756_v42  ;;  %v7215_v25 = vpop.permute.xlu0 %1163  ;;  %v2227_v40 = vsel %vm8265_vm15, %v8262_v53, %v2226_v15  ;;  %v8267_v7 = vrot.slane %v8266_v5, 4  ;;  %v4159_v53 = vld [vmem:[%s7731_s4 + $0x8] sm:$0xff]  ;;  %v8268_v15 = vld [vmem:[#allocation19_spill] sm:$0xff]  ;;  %vm8272_vm15 = vmmov %vm8270_vm13 }
 0x263   : > { %v8011_v43 = vrot.slane %v7215_v25, 4  ;;  %4012 = vmatprep.subr.bf16.mxu0 %v4607_v4  ;;  %v4734_v47 = vcombine.low %v2227_v40, %v2235_v54  ;;  %v4735_v31 = vcombine.high %v2227_v40, %v2235_v54  ;;  %v8269_v44 = vrot.slane %v8268_v15, 4 }
 0x264   : > { %v1200_v37 = vsel %vm619_vm0, %v8267_v7, %v8012_v50  ;;  %4167 = vperm.xlu1 %4937, %v4159_v53   ;;  %v8273_v50 = vld [vmem:[#allocation22_spill] sm:$0xff] }
 0x265   : > { %v1192_v4 = vsel %vm619_vm0, %v8269_v44, %v8011_v43  ;;  %4055 = vmatprep.subr.bf16.mxu1 %v4735_v31  ;;  %v7237_v54 = vpop.permute.xlu1 %2144  ;;  %v1201_v18 = vsel %vm8270_vm13, %v8266_v5, %v1200_v37  ;;  %v8274_v22 = vrot.slane %v8273_v50, 4  ;;  %4162 = vperm.xlu0 %4936, %v4158_v26   ;;  %vm8277_vm13 = vcmask 146432  }
 0x266   : > { %v8015_v61 = vrot.slane %v7237_v54, 4  ;;  %4013 = vmatpush2.bf16.msra.mxu0 %v4606_v52  ;;  %4056 = vmatpush2.bf16.msra.mxu1 %v4734_v47  ;;  %v7245_v40 = vpop.permute.xlu0 %2134  ;;  %v1193_v7 = vsel %vm8272_vm15, %v8268_v15, %v1192_v4  ;;  %v4186_v52 = vld [vmem:[%s7732_s5] sm:$0xff]  ;;  %v4187_v4 = vld [vmem:[%s7732_s5 + $0x8] sm:$0xff]  ;;  %vm8279_vm15 = vmmov %vm8277_vm13 }
 0x267   : > { %8271 = vst [vmem:[#allocation31_spill] sm:$0xff] %v7245_v40  ;;  %v8014_v31 = vrot.slane %v7245_v40, 4  ;;  %v4598_v44 = vcombine.low %v1193_v7, %v1201_v18  ;;  %v4599_v43 = vcombine.high %v1193_v7, %v1201_v18  ;;  %v8275_v47 = vld [vmem:[#allocation21_spill] sm:$0xff] }
 0x268   : > { %v2171_v5 = vsel %vm619_vm0, %v8274_v22, %v8015_v61  ;;  %v8276_v37 = vrot.slane %v8275_v47, 4  ;;  %4190 = vperm.xlu1 %4937, %v4186_v52   ;;  %v8280_v61 = vld [vmem:[#allocation24_spill] sm:$0xff] }
 0x269   : > { %4014 = vmatprep.subr.bf16.mxu0 %v4599_v43  ;;  %v7263_v53 = vpop.permute.xlu1 %1110  ;;  %v2172_v22 = vsel %vm8277_vm13, %v8273_v50, %v2171_v5  ;;  %v8281_v38 = vrot.slane %v8280_v61, 4  ;;  %4195 = vperm.xlu0 %4936, %v4187_v4   ;;  %v8282_v50 = vld [vmem:[#allocation23_spill] sm:$0xff]  ;;  %vm8285_vm13 = vcmask 728064  }
 0x26a   : > { %v2163_v15 = vsel %vm619_vm0, %v8276_v37, %v8014_v31  ;;  %v8019_v26 = vrot.slane %v7263_v53, 4  ;;  %4015 = vmatpush2.bf16.msra.mxu0 %v4598_v44  ;;  %v7271_v18 = vpop.permute.xlu0 %1100  ;;  %v8283_v44 = vrot.slane %v8282_v50, 4 }
 0x26b   : > { %8278 = vst [vmem:[#allocation17_spill] sm:$0xff] %v7271_v18  ;;  %v2164_v7 = vsel %vm8279_vm15, %v8275_v47, %v2163_v15  ;;  %v8020_v37 = vrot.slane %v7271_v18, 4  ;;  %vm8287_vm15 = vmmov %vm8285_vm13 }
 0x26c   : > { %v4726_v43 = vcombine.low %v2164_v7, %v2172_v22  ;;  %v4727_v31 = vcombine.high %v2164_v7, %v2172_v22  ;;  %v1137_v40 = vsel %vm619_vm0, %v8281_v38, %v8019_v26 }
 0x26d   : > { %v1129_v5 = vsel %vm619_vm0, %v8283_v44, %v8020_v37  ;;  %v7286_v47 = vpop.permute.xlu1 %2081  ;;  %v1138_v52 = vsel %vm8285_vm13, %v8280_v61, %v1137_v40  ;;  %v8289_v61 = vld [vmem:[#allocation26_spill] sm:$0xff]  ;;  %vm8347_vm13 = vcmask 7168  }
 0x26e   : > { %4057 = vmatprep.subr.bf16.mxu1 %v4727_v31  ;;  %8284 = vst [vmem:[#allocation18_spill] sm:$0xff] %v7286_v47  ;;  %v8025_v15 = vrot.slane %v7286_v47, 4  ;;  %v7291_v22 = vpop.permute.xlu0 %2071  ;;  %v1130_v38 = vsel %vm8287_vm15, %v8282_v50, %v1129_v5  ;;  %v8288_v31 = vrot.slane %v6627_v12, 4  ;;  %v8290_v40 = vrot.slane %v8289_v61, 4  ;;  %vm8348_vm15 = vmmov %vm8347_vm13 }
 0x26f   : > { %4058 = vmatpush2.bf16.msra.mxu1 %v4726_v43  ;;  %8286 = vst [vmem:[#allocation20_spill] sm:$0xff] %v7291_v22  ;;  %v8028_v4 = vrot.slane %v7291_v22, 4  ;;  %v4590_v7 = vcombine.low %v1130_v38, %v1138_v52  ;;  %v4591_v26 = vcombine.high %v1130_v38, %v1138_v52 }
 0x270   : > { %v2108_v44 = vsel %vm619_vm0, %v8288_v31, %v8025_v15  ;;  %v8291_v15 = vrot.slane %v6651_v10, 4 }
 0x271   : > { %v2100_v43 = vsel %vm619_vm0, %v8290_v40, %v8028_v4  ;;  %4016 = vmatprep.subr.bf16.mxu0 %v4591_v26  ;;  %v1050_v37 = vpop.permute.xlu1 %1049  ;;  %v2109_v50 = vsel %vm2096_vm14, %v6627_v12, %v2108_v44  ;;  %v8292_v40 = vrot.slane %v6661_v55, 4 }
 0x272   : > { %v1060_v5 = vrot.slane %v1050_v37, 4  ;;  %4017 = vmatpush2.bf16.msra.mxu0 %v4590_v7  ;;  %v1040_v52 = vpop.permute.xlu0 %1039  ;;  %v2101_v38 = vsel %vm2096_vm14, %v8289_v61, %v2100_v43  ;;  %v7321_v37 = vld [vmem:[%s7730_s3] ss:$16 sps:$4 sm:$0xff]  }
 0x273   : > { %v1055_v47 = vrot.slane %v1040_v52, 4  ;;  %v4718_v18 = vcombine.low %v2101_v38, %v2109_v50  ;;  %v4719_v31 = vcombine.high %v2101_v38, %v2109_v50  ;;  %v8294_v50 = vrot.slane %v6686_v58, 4 }
 0x274   : > { %v1076_v22 = vsel %vm619_vm0, %v8291_v15, %v1060_v5 }
 0x275   : > { %v1068_v26 = vsel %vm619_vm0, %v8292_v40, %v1055_v47  ;;  %4059 = vmatprep.subr.bf16.mxu1 %v4719_v31  ;;  %v2021_v4 = vpop.permute.xlu1 %2020  ;;  %v1077_v12 = vsel %vm1062_vm1, %v6651_v10, %v1076_v22  ;;  %4019 = vmatmul.mubr.bf16.vlgmr.msra.gmra.mxu0 %v7321_v37  ;;  %v8293_v10 = vrot.slane %v6675_v28, 4 }
 0x276   : > { %v2031_v7 = vrot.slane %v2021_v4, 4  ;;  %4060 = vmatpush2.bf16.msra.mxu1 %v4718_v18  ;;  %v2011_v44 = vpop.permute.xlu0 %2010  ;;  %v1069_v15 = vsel %vm1062_vm1, %v6661_v55, %v1068_v26  ;;  %4104 = vmatprep.mubr.bf16.mxu0 %v6693_v1  ;;  %v7338_v55 = vld [vmem:[%s7730_s3 + $0x8] ss:$16 sps:$4 sm:$0xff]   ;;  %vm8319_vm1 = vcmask 900096  }
 0x277   : > { %v2026_v47 = vrot.slane %v2011_v44, 4  ;;  %v4584_v61 = vcombine.low %v1069_v15, %v1077_v12  ;;  %v4585_v43 = vcombine.high %v1069_v15, %v1077_v12  ;;  %v8295_v12 = vld [vmem:[#allocation25_spill] sm:$0xff]  ;;  %v8297_v44 = vld [vmem:[#allocation28_spill] sm:$0xff] }
 0x278   : > { %v2047_v22 = vsel %vm619_vm0, %v8293_v10, %v2031_v7  ;;  %v8298_v15 = vrot.slane %v8297_v44, 4 }
 0x279   : > { %v2039_v5 = vsel %vm619_vm0, %v8294_v50, %v2026_v47  ;;  %4072 = vmatprep.subr.bf16.mxu0 %v4585_v43  ;;  %v987_v4 = vpop.permute.xlu1 %986  ;;  %v2048_v18 = vsel %vm2033_vm2, %v6675_v28, %v2047_v22  ;;  %4062 = vmatmul.mubr.bf16.vlgmr.msra.gmra.mxu1 %v7338_v55  ;;  %v8296_v28 = vrot.slane %v8295_v12, 4 }
 0x27a   : > { %v997_v1 = vrot.slane %v987_v4, 4  ;;  %4073 = vmatpush1.bf16.msra.mxu0 %v4584_v61  ;;  %v977_v52 = vpop.permute.xlu0 %976  ;;  %v2040_v38 = vsel %vm2033_vm2, %v6686_v58, %v2039_v5  ;;  %4147 = vmatprep.mubr.bf16.mxu1 %v6724_v16  ;;  %v8299_v4 = vrot.slane %v6737_v56, 4  ;;  %vm8320_vm2 = vmmov %vm8319_vm1 }
 0x27b   : > { %v992_v31 = vrot.slane %v977_v52, 4  ;;  %v4712_v40 = vcombine.low %v2040_v38, %v2048_v18  ;;  %v4713_v26 = vcombine.high %v2040_v38, %v2048_v18 }
 0x27c   : > { %v1013_v7 = vsel %vm619_vm0, %v8296_v28, %v997_v1  ;;  %v8300_v1 = vrot.slane %v6747_v21, 4 }
 0x27d   : > { %v1005_v47 = vsel %vm619_vm0, %v8298_v15, %v992_v31  ;;  %4115 = vmatprep.subr.bf16.mxu1 %v4713_v26  ;;  %v1958_v43 = vpop.permute.xlu1 %1957  ;;  %v1014_v61 = vsel %vm999_vm3, %v8295_v12, %v1013_v7  ;;  %v8301_v15 = vrot.slane %v6761_v23, 4 }
 0x27e   : > { %v1968_v10 = vrot.slane %v1958_v43, 4  ;;  %4116 = vmatpush1.bf16.msra.mxu1 %v4712_v40  ;;  %v1948_v58 = vpop.permute.xlu0 %1947  ;;  %v1006_v16 = vsel %vm999_vm3, %v8297_v44, %v1005_v47  ;;  %v8302_v43 = vrot.slane %v6771_v59, 4  ;;  %vm8323_vm3 = vcmask 957440  }
 0x27f   : > { %v1963_v22 = vrot.slane %v1948_v58, 4  ;;  %v4576_v50 = vcombine.low %v1006_v16, %v1014_v61  ;;  %v4577_v5 = vcombine.high %v1006_v16, %v1014_v61 }
 0x280   : > { %v1984_v18 = vsel %vm619_vm0, %v8299_v4, %v1968_v10  ;;  %v8303_v4 = vrot.slane %v6785_v29, 4 }
 0x281   : > { %v1976_v52 = vsel %vm619_vm0, %v8300_v1, %v1963_v22  ;;  %4074 = vmatprep.subr.bf16.mxu0 %v4577_v5  ;;  %v924_v38 = vpop.permute.xlu1 %923  ;;  %v1985_v31 = vsel %vm1970_vm4, %v6737_v56, %v1984_v18  ;;  %v8304_v1 = vrot.slane %v6795_v30, 4 }
 0x282   : > { %v934_v40 = vrot.slane %v924_v38, 4  ;;  %4075 = vmatpush1.bf16.msra.mxu0 %v4576_v50  ;;  %v914_v26 = vpop.permute.xlu0 %913  ;;  %v1977_v12 = vsel %vm1970_vm4, %v6747_v21, %v1976_v52  ;;  %vm8324_vm4 = vmmov %vm8323_vm3 }
 0x283   : > { %v929_v28 = vrot.slane %v914_v26, 4  ;;  %v4704_v7 = vcombine.low %v1977_v12, %v1985_v31  ;;  %v4705_v44 = vcombine.high %v1977_v12, %v1985_v31 }
 0x284   : > { %v950_v47 = vsel %vm619_vm0, %v8301_v15, %v934_v40  ;;  %v8306_v15 = vrot.slane %v6819_v3, 4 }
 0x285   : > { %v942_v61 = vsel %vm619_vm0, %v8302_v43, %v929_v28  ;;  %4117 = vmatprep.subr.bf16.mxu1 %v4705_v44  ;;  %v1895_v10 = vpop.permute.xlu1 %1894  ;;  %v951_v56 = vsel %vm936_vm5, %v6761_v23, %v950_v47 }
 0x286   : > { %v1905_v58 = vrot.slane %v1895_v10, 4  ;;  %4118 = vmatpush1.bf16.msra.mxu1 %v4704_v7  ;;  %v1885_v16 = vpop.permute.xlu0 %1884  ;;  %v943_v21 = vsel %vm936_vm5, %v6771_v59, %v942_v61  ;;  %v8305_v7 = vrot.slane %v6809_v33, 4  ;;  %vm8327_vm5 = vcmask 908288  }
 0x287   : > { %v1900_v22 = vrot.slane %v1885_v16, 4  ;;  %v4568_v50 = vcombine.low %v943_v21, %v951_v56  ;;  %v4569_v5 = vcombine.high %v943_v21, %v951_v56  ;;  %v8307_v21 = vrot.slane %v6833_v9, 4 }
 0x288   : > { %v1921_v18 = vsel %vm619_vm0, %v8303_v4, %v1905_v58 }
 0x289   : > { %v1913_v52 = vsel %vm619_vm0, %v8304_v1, %v1900_v22  ;;  %4076 = vmatprep.subr.bf16.mxu0 %v4569_v5  ;;  %v861_v38 = vpop.permute.xlu1 %860  ;;  %v1922_v23 = vsel %vm1907_vm6, %v6785_v29, %v1921_v18 }
 0x28a   : > { %v871_v31 = vrot.slane %v861_v38, 4  ;;  %4077 = vmatpush1.bf16.msra.mxu0 %v4568_v50  ;;  %v851_v40 = vpop.permute.xlu0 %850  ;;  %v1914_v59 = vsel %vm1907_vm6, %v6795_v30, %v1913_v52  ;;  %v8308_v50 = vrot.slane %v6843_v41, 4  ;;  %vm8328_vm6 = vmmov %vm8327_vm5 }
 0x28b   : > { %v866_v26 = vrot.slane %v851_v40, 4  ;;  %v4696_v12 = vcombine.low %v1914_v59, %v1922_v23  ;;  %v4697_v28 = vcombine.high %v1914_v59, %v1922_v23  ;;  %v8310_v59 = vrot.slane %v6867_v46, 4 }
 0x28c   : > { %v887_v44 = vsel %vm619_vm0, %v8305_v7, %v871_v31  ;;  %v8309_v31 = vrot.slane %v6857_v62, 4 }
 0x28d   : > { %v879_v47 = vsel %vm619_vm0, %v8306_v15, %v866_v26  ;;  %4119 = vmatprep.subr.bf16.mxu1 %v4697_v28  ;;  %v1832_v43 = vpop.permute.xlu1 %1831  ;;  %v888_v29 = vsel %vm873_vm7, %v6809_v33, %v887_v44 }
 0x28e   : > { %v1842_v61 = vrot.slane %v1832_v43, 4  ;;  %4120 = vmatpush1.bf16.msra.mxu1 %v4696_v12  ;;  %v1822_v10 = vpop.permute.xlu0 %1821  ;;  %v880_v30 = vsel %vm873_vm7, %v6819_v3, %v879_v47  ;;  %v8311_v43 = vrot.slane %v6881_v17, 4  ;;  %vm8331_vm7 = vcmask 965632  }
 0x28f   : > { %v1837_v56 = vrot.slane %v1822_v10, 4  ;;  %v4560_v58 = vcombine.low %v880_v30, %v888_v29  ;;  %v4561_v16 = vcombine.high %v880_v30, %v888_v29 }
 0x290   : > { %v1858_v22 = vsel %vm619_vm0, %v8307_v21, %v1842_v61  ;;  %v8312_v61 = vrot.slane %v6891_v24, 4 }
 0x291   : > { %v1850_v5 = vsel %vm619_vm0, %v8308_v50, %v1837_v56  ;;  %4078 = vmatprep.subr.bf16.mxu0 %v4561_v16  ;;  %v798_v4 = vpop.permute.xlu1 %797  ;;  %v1859_v33 = vsel %vm1844_vm8, %v6833_v9, %v1858_v22  ;;  %v8313_v50 = vrot.slane %v6905_v19, 4 }
 0x292   : > { %v808_v18 = vrot.slane %v798_v4, 4  ;;  %4079 = vmatpush1.bf16.msra.mxu0 %v4560_v58  ;;  %v788_v1 = vpop.permute.xlu0 %787  ;;  %v1851_v3 = vsel %vm1844_vm8, %v6843_v41, %v1850_v5  ;;  %v8314_v4 = vrot.slane %v6915_v11, 4  ;;  %vm8332_vm8 = vmmov %vm8331_vm7 }
 0x293   : > { %v803_v52 = vrot.slane %v788_v1, 4  ;;  %v4688_v38 = vcombine.low %v1851_v3, %v1859_v33  ;;  %v4689_v23 = vcombine.high %v1851_v3, %v1859_v33 }
 0x294   : > { %v824_v40 = vsel %vm619_vm0, %v8309_v31, %v808_v18  ;;  %v8315_v31 = vrot.slane %v6929_v6, 4 }
 0x295   : > { %v816_v26 = vsel %vm619_vm0, %v8310_v59, %v803_v52  ;;  %4121 = vmatprep.subr.bf16.mxu1 %v4689_v23  ;;  %v1769_v12 = vpop.permute.xlu1 %1768  ;;  %v825_v9 = vsel %vm810_vm9, %v6857_v62, %v824_v40  ;;  %v8316_v59 = vrot.slane %v6939_v32, 4 }
 0x296   : > { %v1779_v28 = vrot.slane %v1769_v12, 4  ;;  %4122 = vmatpush1.bf16.msra.mxu1 %v4688_v38  ;;  %v1759_v7 = vpop.permute.xlu0 %1758  ;;  %v817_v41 = vsel %vm810_vm9, %v6867_v46, %v816_v26  ;;  %vm8335_vm9 = vcmask 973824  }
 0x297   : > { %v1774_v44 = vrot.slane %v1759_v7, 4  ;;  %v4552_v15 = vcombine.low %v817_v41, %v825_v9  ;;  %v4553_v47 = vcombine.high %v817_v41, %v825_v9 }
 0x298   : > { %v1795_v29 = vsel %vm619_vm0, %v8311_v43, %v1779_v28  ;;  %v8318_v43 = vrot.slane %v6963_v63, 4 }
 0x299   : > { %v1787_v10 = vsel %vm619_vm0, %v8312_v61, %v1774_v44  ;;  %4080 = vmatprep.subr.bf16.mxu0 %v4553_v47  ;;  %v735_v30 = vpop.permute.xlu1 %734  ;;  %v1796_v62 = vsel %vm1781_vm10, %v6881_v17, %v1795_v29 }
 0x29a   : > { %v745_v56 = vrot.slane %v735_v30, 4  ;;  %4081 = vmatpush1.bf16.msra.mxu0 %v4552_v15  ;;  %v725_v58 = vpop.permute.xlu0 %724  ;;  %v1788_v46 = vsel %vm1781_vm10, %v6891_v24, %v1787_v10  ;;  %v8317_v15 = vrot.slane %v6953_v13, 4  ;;  %vm8336_vm10 = vmmov %vm8335_vm9 }
 0x29b   : > { %v740_v16 = vrot.slane %v725_v58, 4  ;;  %v4680_v21 = vcombine.low %v1788_v46, %v1796_v62  ;;  %v4681_v22 = vcombine.high %v1788_v46, %v1796_v62  ;;  %v8321_v46 = vrot.slane %v6977_v57, 4 }
 0x29c   : > { %v761_v5 = vsel %vm619_vm0, %v8313_v50, %v745_v56 }
 0x29d   : > { %v753_v33 = vsel %vm619_vm0, %v8314_v4, %v740_v16  ;;  %4123 = vmatprep.subr.bf16.mxu1 %v4681_v22  ;;  %v1706_v18 = vpop.permute.xlu1 %1705  ;;  %v762_v17 = vsel %vm747_vm11, %v6905_v19, %v761_v5 }
 0x29e   : > { %v1716_v1 = vrot.slane %v1706_v18, 4  ;;  %4124 = vmatpush1.bf16.msra.mxu1 %v4680_v21  ;;  %v1696_v3 = vpop.permute.xlu0 %1695  ;;  %v754_v24 = vsel %vm747_vm11, %v6915_v11, %v753_v33  ;;  %v8322_v21 = vrot.slane %v6987_v14, 4  ;;  %vm8341_vm11 = vcmask 1039360  }
 0x29f   : > { %v1711_v52 = vrot.slane %v1696_v3, 4  ;;  %v4544_v38 = vcombine.low %v754_v24, %v762_v17  ;;  %v4545_v23 = vcombine.high %v754_v24, %v762_v17  ;;  %v8326_v24 = vrot.slane %v7011_v0, 4 }
 0x2a0   : > { %v1732_v40 = vsel %vm619_vm0, %v8315_v31, %v1716_v1  ;;  %v8325_v1 = vrot.slane %v7001_v34, 4 }
 0x2a1   : > { %v1724_v26 = vsel %vm619_vm0, %v8316_v59, %v1711_v52  ;;  %4082 = vmatprep.subr.bf16.mxu0 %v4545_v23  ;;  %v672_v12 = vpop.permute.xlu1 %671  ;;  %v1733_v19 = vsel %vm1718_vm12, %v6929_v6, %v1732_v40 }
 0x2a2   : > { %v682_v9 = vrot.slane %v672_v12, 4  ;;  %4083 = vmatpush1.bf16.msra.mxu0 %v4544_v38  ;;  %v662_v28 = vpop.permute.xlu0 %661  ;;  %v1725_v11 = vsel %vm1718_vm12, %v6939_v32, %v1724_v26  ;;  %v8329_v12 = vrot.slane %v7025_v45, 4  ;;  %vm8342_vm12 = vmmov %vm8341_vm11 }
 0x2a3   : > { %v677_v7 = vrot.slane %v662_v28, 4  ;;  %v4672_v41 = vcombine.low %v1725_v11, %v1733_v19  ;;  %v4673_v44 = vcombine.high %v1725_v11, %v1733_v19 }
 0x2a4   : > { %v698_v47 = vsel %vm619_vm0, %v8317_v15, %v682_v9  ;;  %v8330_v9 = vrot.slane %v7035_v51, 4 }
 0x2a5   : > { %v690_v29 = vsel %vm619_vm0, %v8318_v43, %v677_v7  ;;  %4125 = vmatprep.subr.bf16.mxu1 %v4673_v44  ;;  %v1643_v61 = vpop.permute.xlu1 %1642  ;;  %v699_v6 = vsel %vm8319_vm1, %v6953_v13, %v698_v47  ;;  %v8333_v43 = vrot.slane %v7049_v39, 4  ;;  %vm8351_vm1 = vcmask 72704  }
 0x2a6   : > { %v1653_v10 = vrot.slane %v1643_v61, 4  ;;  %4126 = vmatpush1.bf16.msra.mxu1 %v4672_v41  ;;  %v1633_v30 = vpop.permute.xlu0 %1632  ;;  %v691_v32 = vsel %vm8320_vm2, %v6963_v63, %v690_v29  ;;  %v8334_v61 = vrot.slane %v7059_v2, 4  ;;  %vm8352_vm2 = vmmov %vm8351_vm1 }
 0x2a7   : > { %v1648_v62 = vrot.slane %v1633_v30, 4  ;;  %v4536_v56 = vcombine.low %v691_v32, %v699_v6  ;;  %v4537_v58 = vcombine.high %v691_v32, %v699_v6 }
 0x2a8   : > { %v1669_v16 = vsel %vm619_vm0, %v8321_v46, %v1653_v10  ;;  %v8337_v46 = vld [vmem:[#allocation27_spill] sm:$0xff] }
 0x2a9   : > { %v1661_v22 = vsel %vm619_vm0, %v8322_v21, %v1648_v62  ;;  %4084 = vmatprep.subr.bf16.mxu0 %v4537_v58  ;;  %v608_v50 = vpop.permute.xlu1 %607  ;;  %v1670_v13 = vsel %vm8323_vm3, %v6977_v57, %v1669_v16  ;;  %v8338_v16 = vrot.slane %v8337_v46, 4  ;;  %vm8355_vm3 = vcmask 80896  }
 0x2aa   : > { %v618_v5 = vrot.slane %v608_v50, 4  ;;  %4085 = vmatpush1.bf16.msra.mxu0 %v4536_v56  ;;  %v598_v4 = vpop.permute.xlu0 %597  ;;  %v1662_v63 = vsel %vm8324_vm4, %v6987_v14, %v1661_v22  ;;  %v8339_v22 = vld [vmem:[#allocation32_spill] sm:$0xff]  ;;  %vm8356_vm4 = vmmov %vm8355_vm3 }
 0x2ab   : > { %v613_v33 = vrot.slane %v598_v4, 4  ;;  %v4664_v18 = vcombine.low %v1662_v63, %v1670_v13  ;;  %v4665_v17 = vcombine.high %v1662_v63, %v1670_v13  ;;  %v8340_v50 = vrot.slane %v8339_v22, 4 }
 0x2ac   : > { %v635_v3 = vsel %vm619_vm0, %v8325_v1, %v618_v5  ;;  %v4957_v1 = vld [vmem:[%s5209_s13 + $0x38] sm:$0xff] }
 0x2ad   : > { %v627_v52 = vsel %vm619_vm0, %v8326_v24, %v613_v33  ;;  %4127 = vmatprep.subr.bf16.mxu1 %v4665_v17  ;;  %v1580_v38 = vpop.permute.xlu1 %1579  ;;  %v636_v57 = vsel %vm8327_vm5, %v7001_v34, %v635_v3  ;;  %v4958_v3 = vld [vmem:[%s5209_s13 + $0x18] sm:$0xff]  ;;  %vm8359_vm5 = vcmask 138240   ;;  %s8369_s13 = sld [smem:[#allocation13_spill]] }
 0x2ae   : > { %v1590_v23 = vrot.slane %v1580_v38, 4  ;;  %4128 = vmatpush1.bf16.msra.mxu1 %v4664_v18  ;;  %v1570_v31 = vpop.permute.xlu0 %1569  ;;  %v628_v14 = vsel %vm8328_vm6, %v7011_v0, %v627_v52  ;;  %v4633_v24 = vcombine.high %v4958_v3, %v4957_v1  ;;  %v8343_v52 = vld [vmem:[#allocation29_spill] sm:$0xff]  ;;  %vm8360_vm6 = vmmov %vm8359_vm5 }
 0x2af   : > { %v1585_v40 = vrot.slane %v1570_v31, 4  ;;  %v4528_v59 = vcombine.low %v628_v14, %v636_v57  ;;  %v4529_v26 = vcombine.high %v628_v14, %v636_v57  ;;  %v8344_v38 = vrot.slane %v8343_v52, 4 }
 0x2b0   : > { %v1606_v19 = vsel %vm619_vm0, %v8329_v12, %v1590_v23  ;;  %v8345_v23 = vld [vmem:[#allocation30_spill] sm:$0xff]  ;;  %v4632_v12 = vcombine.low %v4958_v3, %v4957_v1 }
 0x2b1   : > { %v1598_v28 = vsel %vm619_vm0, %v8330_v9, %v1585_v40  ;;  %4086 = vmatprep.subr.bf16.mxu0 %v4529_v26  ;;  %v1517_v11 = vpop.permute.xlu1 %1516  ;;  %v1607_v34 = vsel %vm8331_vm7, %v7025_v45, %v1606_v19  ;;  %v8346_v31 = vrot.slane %v8345_v23, 4  ;;  %vm8363_vm7 = vcmask 89088  }
 0x2b2   : > { %v1527_v7 = vrot.slane %v1517_v11, 4  ;;  %4087 = vmatpush1.bf16.msra.mxu0 %v4528_v59  ;;  %v1507_v41 = vpop.permute.xlu0 %1506  ;;  %v1599_v0 = vsel %vm8332_vm8, %v7035_v51, %v1598_v28  ;;  %v8349_v11 = vrot.slane %v7131_v49, 4  ;;  %vm8364_vm8 = vmmov %vm8363_vm7 }
 0x2b3   : > { %v1522_v44 = vrot.slane %v1507_v41, 4  ;;  %v4656_v15 = vcombine.low %v1599_v0, %v1607_v34  ;;  %v4657_v47 = vcombine.high %v1599_v0, %v1607_v34  ;;  %s4511_s16 = sshll.u32 %s8369_s13, 3 }
 0x2b4   : > { %v1543_v29 = vsel %vm619_vm0, %v8333_v43, %v1527_v7  ;;  %v8350_v7 = vrot.slane %v7135_v60, 4  ;;  %p489_p6 = scmp.lt.s32.totalorder %s4511_s16, 15 }
 0x2b5   : > { %v1535_v6 = vsel %vm619_vm0, %v8334_v61, %v1522_v44  ;;  %4129 = vmatprep.subr.bf16.mxu1 %v4657_v47  ;;  %v1454_v10 = vpop.permute.xlu1 %1453  ;;  %v1544_v45 = vsel %vm8335_vm9, %v7049_v39, %v1543_v29  ;;  %v7532_v61 = vpop.f32.mrf.mxu0  ;;  %vm8368_vm9 = vcmask 146432  }
 0x2b6   : > { %v1464_v30 = vrot.slane %v1454_v10, 4  ;;  %4130 = vmatpush1.bf16.msra.mxu1 %v4656_v15  ;;  %v1444_v32 = vpop.permute.xlu0 %1443  ;;  %v1536_v51 = vsel %vm8336_vm10, %v7059_v2, %v1535_v6  ;;  %v7535_v10 = vpop.f32.mrf.mxu1  ;;  %vm8370_vm10 = vmmov %vm8368_vm9  ;;  %s8401_s16 = smov (!%p489_p6, %s4511_s16), 15 }
 0x2b7   : > { %v1459_v62 = vrot.slane %v1444_v32, 4  ;;  %v4648_v56 = vcombine.low %v1536_v51, %v1544_v45  ;;  %v4649_v58 = vcombine.high %v1536_v51, %v1544_v45  ;;  %4131 = vmatprep.subr.bf16.mxu1 %v5746_v36  ;;  %v8353_v45 = vrot.slane %v7157_v48, 4  ;;  %s491_s10 = scalar_lea.vmem %s8380_s11, %s8401_s16 }
 0x2b8   : > { %v1480_v21 = vsel %vm619_vm0, %v8338_v16, %v1464_v30  ;;  %v8354_v51 = vrot.slane %v7161_v20, 4 }
 0x2b9   : > { %v1472_v39 = vsel %vm619_vm0, %v8340_v50, %v1459_v62  ;;  %4088 = vmatprep.subr.bf16.mxu0 %v4649_v58  ;;  %v1365_v13 = vpop.permute.xlu1 %1364  ;;  %v1481_v2 = vsel %vm8341_vm11, %v8337_v46, %v1480_v21  ;;  %v7548_v21 = vpop.f32.mrf.mxu0  ;;  %vm8374_vm11 = vcmask 728064  }
 0x2ba   : > { %v1375_v5 = vrot.slane %v1365_v13, 4  ;;  %4089 = vmatpush2.bf16.msra.mxu0 %v4648_v56  ;;  %4132 = vmatpush2.bf16.msra.mxu1 %v5756_v42  ;;  %v1355_v4 = vpop.permute.xlu0 %1354  ;;  %v1473_v63 = vsel %vm8342_vm12, %v8339_v22, %v1472_v39  ;;  %v7551_v50 = vpop.f32.mrf.mxu1  ;;  %v8357_v39 = vrot.slane %v7183_v27, 4  ;;  %vm8375_vm12 = vmmov %vm8374_vm11 }
 0x2bb   : > { %v1370_v33 = vrot.slane %v1355_v4, 4  ;;  %v4640_v18 = vcombine.low %v1473_v63, %v1481_v2  ;;  %v4641_v17 = vcombine.high %v1473_v63, %v1481_v2  ;;  %4133 = vmatprep.subr.bf16.mxu1 %v5746_v36 }
 0x2bc   : > { %v1391_v57 = vsel %vm619_vm0, %v8344_v38, %v1375_v5  ;;  %v8358_v5 = vrot.slane %v7187_v35, 4  ;;  %v8361_v38 = vrot.slane %v7209_v8, 4 }
 0x2bd   : > { %v1383_v14 = vsel %vm619_vm0, %v8346_v31, %v1370_v33  ;;  %4090 = vmatprep.subr.bf16.mxu0 %v4641_v17  ;;  %v1302_v40 = vpop.permute.xlu1 %1301  ;;  %v1392_v9 = vsel %vm8348_vm15, %v8343_v52, %v1391_v57  ;;  %v7564_v17 = vpop.f32.mrf.mxu0 }
 0x2be   : > { %v1312_v59 = vrot.slane %v1302_v40, 4  ;;  %4091 = vmatpush2.bf16.msra.mxu0 %v4640_v18  ;;  %4134 = vmatpush2.bf16.msra.mxu1 %v5756_v42  ;;  %v1292_v26 = vpop.permute.xlu0 %1291  ;;  %v1384_v19 = vsel %vm8347_vm13, %v8345_v23, %v1383_v14  ;;  %v7566_v52 = vpop.f32.mrf.mxu1  ;;  %v8362_v23 = vrot.slane %v7215_v25, 4 }
 0x2bf   : > { %v1307_v28 = vrot.slane %v1292_v26, 4  ;;  %4092 = vmatprep.subr.bf16.mxu0 %v4633_v24  ;;  %4135 = vmatprep.subr.bf16.mxu1 %v5746_v36  ;;  %v4625_v44 = vcombine.high %v1384_v19, %v1392_v9  ;;  %v4624_v32 = vcombine.low %v1384_v19, %v1392_v9  ;;  %v3854_v26 = vpop.f32.mrf.mxu0 }
 0x2c0   : > { %v1328_v34 = vsel %vm619_vm0, %v8349_v11, %v1312_v59  ;;  %v8365_v11 = vrot.slane %v7237_v54, 4 }
 0x2c1   : > { %v1320_v41 = vsel %vm619_vm0, %v8350_v7, %v1307_v28  ;;  %v1239_v0 = vpop.permute.xlu1 %1238  ;;  %v1329_v29 = vsel %vm8352_vm2, %v7131_v49, %v1328_v34  ;;  %v3897_v28 = vpop.f32.mrf.mxu1 }
 0x2c2   : > { %v1249_v15 = vrot.slane %v1239_v0, 4  ;;  %4093 = vmatpush2.bf16.msra.mxu0 %v4632_v12  ;;  %4136 = vmatpush2.bf16.msra.mxu1 %v5756_v42  ;;  %v1229_v47 = vpop.permute.xlu0 %1228  ;;  %v1321_v43 = vsel %vm8351_vm1, %v7135_v60, %v1320_v41  ;;  %v8366_v41 = vld [vmem:[#allocation31_spill] sm:$0xff] }
 0x2c3   : > { %v1244_v6 = vrot.slane %v1229_v47, 4  ;;  %4094 = vmatprep.subr.bf16.mxu0 %v4625_v44  ;;  %4137 = vmatprep.subr.bf16.mxu1 %v5746_v36  ;;  %v4617_v56 = vcombine.high %v1321_v43, %v1329_v29  ;;  %v4616_v2 = vcombine.low %v1321_v43, %v1329_v29  ;;  %v8367_v0 = vrot.slane %v8366_v41, 4 }
 0x2c4   : > { %v1265_v30 = vsel %vm619_vm0, %v8353_v45, %v1249_v15 }
 0x2c5   : > { %v1257_v60 = vsel %vm619_vm0, %v8354_v51, %v1244_v6  ;;  %v2210_v62 = vpop.permute.xlu1 %2209  ;;  %v1266_v16 = vsel %vm8356_vm4, %v7157_v48, %v1265_v30 }
 0x2c6   : > { %v2220_v49 = vrot.slane %v2210_v62, 4  ;;  %4095 = vmatpush2.bf16.msra.mxu0 %v4624_v32  ;;  %4138 = vmatpush2.bf16.msra.mxu1 %v5756_v42  ;;  %v2200_v58 = vpop.permute.xlu0 %2199  ;;  %v1258_v46 = vsel %vm8355_vm3, %v7161_v20, %v1257_v60  ;;  %v8371_v32 = vrot.slane %v7263_v53, 4 }
 0x2c7   : > { %v2215_v22 = vrot.slane %v2200_v58, 4  ;;  %4096 = vmatprep.subr.bf16.mxu0 %v4617_v56  ;;  %4139 = vmatprep.subr.bf16.mxu1 %v5746_v36  ;;  %v4609_v63 = vcombine.high %v1258_v46, %v1266_v16  ;;  %v4608_v57 = vcombine.low %v1258_v46, %v1266_v16  ;;  %v8372_v56 = vld [vmem:[#allocation17_spill] sm:$0xff] }
 0x2c8   : > { %v2236_v13 = vsel %vm619_vm0, %v8357_v39, %v2220_v49  ;;  %v8373_v49 = vrot.slane %v8372_v56, 4 }
 0x2c9   : > { %v2228_v20 = vsel %vm619_vm0, %v8358_v5, %v2215_v22  ;;  %v1176_v4 = vpop.permute.xlu1 %1175  ;;  %v2237_v48 = vsel %vm8359_vm5, %v7183_v27, %v2236_v13 }
 0x2ca   : > { %v1186_v33 = vrot.slane %v1176_v4, 4  ;;  %4097 = vmatpush2.bf16.msra.mxu0 %v4616_v2  ;;  %4140 = vmatpush2.bf16.msra.mxu1 %v5756_v42  ;;  %v1166_v36 = vpop.permute.xlu0 %1165  ;;  %v2229_v18 = vsel %vm8360_vm6, %v7187_v35, %v2228_v20  ;;  %v8376_v20 = vld [vmem:[#allocation18_spill] sm:$0xff] }
 0x2cb   : > { %v1181_v1 = vrot.slane %v1166_v36, 4  ;;  %4098 = vmatprep.subr.bf16.mxu0 %v4609_v63  ;;  %v4736_v3 = vcombine.low %v2229_v18, %v2237_v48  ;;  %v4737_v24 = vcombine.high %v2229_v18, %v2237_v48  ;;  %v8377_v4 = vrot.slane %v8376_v20, 4  ;;  %v8378_v36 = vld [vmem:[#allocation20_spill] sm:$0xff] }
 0x2cc   : > { %v1202_v27 = vsel %vm619_vm0, %v8361_v38, %v1186_v33  ;;  %v8379_v18 = vrot.slane %v8378_v36, 4 }
 0x2cd   : > { %v1194_v42 = vsel %vm619_vm0, %v8362_v23, %v1181_v1  ;;  %4141 = vmatprep.subr.bf16.mxu1 %v4737_v24  ;;  %v2147_v31 = vpop.permute.xlu1 %2146  ;;  %v1203_v35 = vsel %vm8363_vm7, %v7209_v8, %v1202_v27  ;;  %v3934_v7 = vpop.f32.mrf.mxu0  ;;  %v4232_v24 = vlaneseq }
 0x2ce   : > { %v2157_v14 = vrot.slane %v2147_v31, 4  ;;  %4099 = vmatpush2.bf16.msra.mxu0 %v4608_v57  ;;  %4142 = vmatpush2.bf16.msra.mxu1 %v4736_v3  ;;  %v2137_v40 = vpop.permute.xlu0 %2136  ;;  %v1195_v59 = vsel %vm8364_vm8, %v7215_v25, %v1194_v42  ;;  %v3896_v31 = vadd.f32 %v7566_v52, %v7564_v17 }
 0x2cf   : > { %v2152_v12 = vrot.slane %v2137_v40, 4  ;;  %v4600_v19 = vcombine.low %v1195_v59, %v1203_v35  ;;  %v4601_v9 = vcombine.high %v1195_v59, %v1203_v35  ;;  %v3936_v60 = vpop.f32.mrf.mxu0  ;;  %v7610_v42 = vshrl.u32 %v4232_v24, 7 }
 0x2d0   : > { %v2173_v34 = vsel %vm619_vm0, %v8365_v11, %v2157_v14  ;;  %v3898_v35 = vadd.f32 %v3897_v28, %v3854_v26  ;;  %v3892_v59 = vadd.f32 %v7535_v10, %v7532_v61 }
 0x2d1   : > { %v2165_v8 = vsel %vm619_vm0, %v8367_v0, %v2152_v12  ;;  %4100 = vmatprep.subr.bf16.mxu0 %v4601_v9  ;;  %v1113_v44 = vpop.permute.xlu1 %1112  ;;  %v2174_v15 = vsel %vm8368_vm9, %v7237_v54, %v2173_v34  ;;  %v3938_v48 = vpop.f32.mrf.mxu0  ;;  %v3894_v12 = vadd.f32 %v7551_v50, %v7548_v21  ;;  %v4234_v17 = vsub.s32 0, %v7610_v42  ;;  %v7630_v21 = vld [vmem:[%s491_s10] sm:$0xff] }
 0x2d2   : > { %v3977_v25 = vpop.f32.mrf.mxu1  ;;  %v1123_v47 = vrot.slane %v1113_v44, 4  ;;  %4101 = vmatpush2.bf16.msra.mxu0 %v4600_v19  ;;  %v1103_v43 = vpop.permute.xlu0 %1102  ;;  %v2166_v29 = vsel %vm8370_vm10, %v8366_v41, %v2165_v8  ;;  %v4238_v52 = vsub.s32 1, %v7610_v42  ;;  %v4242_v26 = vsub.s32 2, %v7610_v42 }
 0x2d3   : > { %v1118_v6 = vrot.slane %v1103_v43, 4  ;;  %v4728_v45 = vcombine.low %v2166_v29, %v2174_v15  ;;  %v4729_v30 = vcombine.high %v2166_v29, %v2174_v15  ;;  %v3940_v57 = vpop.f32.mrf.mxu0  ;;  %v4246_v61 = vsub.s32 3, %v7610_v42 }
 0x2d4   : > { %v1139_v51 = vsel %vm619_vm0, %v8371_v32, %v1123_v47  ;;  %v3979_v62 = vpop.f32.mrf.mxu1  ;;  %v4235_v8 = vrot.slane %v7630_v21, %v4234_v17  ;;  %v4239_v44 = vrot.slane %v7630_v21, %v4238_v52 }
 0x2d5   : > { %v1131_v54 = vsel %vm619_vm0, %v8373_v49, %v1118_v6  ;;  %4143 = vmatprep.subr.bf16.mxu1 %v4729_v30  ;;  %v2084_v58 = vpop.permute.xlu1 %2083  ;;  %v1140_v46 = vsel %vm8374_vm11, %v7263_v53, %v1139_v51  ;;  %v3980_v19 = vadd.f32 %v3979_v62, %v3936_v60  ;;  %v4247_v47 = vrot.slane %v7630_v21, %v4246_v61 }
 0x2d6   : > { %v2094_v16 = vrot.slane %v2084_v58, 4  ;;  %4144 = vmatpush2.bf16.msra.mxu1 %v4728_v45  ;;  %v2074_v22 = vpop.permute.xlu0 %2073  ;;  %v1132_v39 = vsel %vm8375_vm12, %v8372_v56, %v1131_v54  ;;  %v3981_v33 = vpop.f32.mrf.mxu1 }
 0x2d7   : > { %v2089_v13 = vrot.slane %v2074_v22, 4  ;;  %v4592_v2 = vcombine.low %v1132_v39, %v1140_v46  ;;  %v4593_v5 = vcombine.high %v1132_v39, %v1140_v46  ;;  %v3982_v14 = vadd.f32 %v3981_v33, %v3938_v48 }
 0x2d8   : > { %v2110_v63 = vsel %vm619_vm0, %v8377_v4, %v2094_v16  ;;  %v3983_v23 = vpop.f32.mrf.mxu1 }
 0x2d9   : > { %v2102_v53 = vsel %vm619_vm0, %v8379_v18, %v2089_v13  ;;  %4102 = vmatprep.subr.bf16.mxu0 %v4593_v5  ;;  %v2111_v1 = vsel %vm2096_vm14, %v8376_v20, %v2110_v63  ;;  %v3984_v40 = vadd.f32 %v3983_v23, %v3940_v57  ;;  %v4250_v23 = vsub.s32 4, %v7610_v42 }
 0x2da   : > { %4103 = vmatpush2.bf16.msra.mxu0 %v4592_v2  ;;  %v2103_v3 = vsel %vm2096_vm14, %v8378_v36, %v2102_v53 }
 0x2db   : > { %v4720_v38 = vcombine.low %v2103_v3, %v2111_v1  ;;  %v4721_v27 = vcombine.high %v2103_v3, %v2111_v1 }
 0x2dd   : > { %4105 = vmatmul.mubr.bf16.vlgmr.msra.gmra.mxu0 %v7321_v37  ;;  %4145 = vmatprep.subr.bf16.mxu1 %v4721_v27  ;;  %v3978_v37 = vadd.f32 %v3977_v25, %v3934_v7  ;;  %v4243_v25 = vrot.slane %v7630_v21, %v4242_v26 }
 0x2de   : > { %4146 = vmatpush2.bf16.msra.mxu1 %v4720_v38 }
 0x2df   : > { %v7622_v9 = vpop.permute.xlu1 %4167 }
 0x2e0   : > { %v7628_v10 = vpop.permute.xlu0 %4162  ;;  %v4178_v50 = vmul.f32 %v7622_v9, %v3896_v31  ;;  %v4179_v28 = vmul.f32 %v7622_v9, %v3898_v35  ;;  %v4181_v11 = vmul.f32 %v7622_v9, %v3984_v40  ;;  %v4254_v35 = vsub.s32 5, %v7610_v42 }
 0x2e1   : > { %4148 = vmatmul.mubr.bf16.vlgmr.msra.gmra.mxu1 %v7338_v55  ;;  %v4180_v55 = vmul.f32 %v7622_v9, %v3982_v14  ;;  %v4170_v34 = vmul.f32 %v7628_v10, %v3892_v59  ;;  %v4171_v7 = vmul.f32 %v7628_v10, %v3894_v12  ;;  %v4172_v41 = vmul.f32 %v7628_v10, %v3978_v37 }
 0x2e2   : > { %v4173_v0 = vmul.f32 %v7628_v10, %v3980_v19  ;;  %v4251_v19 = vrot.slane %v7630_v21, %v4250_v23  ;;  %v4255_v26 = vrot.slane %v7630_v21, %v4254_v35 }
 0x2e3   : > { %v7642_v15 = vpop.permute.xlu1 %4190 }
 0x2e4   : > { %v4198_v43 = vadd.f32 %v7642_v15, %v4170_v34  ;;  %v4199_v29 = vadd.f32 %v7642_v15, %v4171_v7  ;;  %v7648_v6 = vpop.permute.xlu0 %4195  ;;  %v4200_v45 = vadd.f32 %v7642_v15, %v4172_v41  ;;  %v4201_v30 = vadd.f32 %v7642_v15, %v4173_v0 }
 0x2e5   : > { %v4206_v32 = vadd.f32 %v7648_v6, %v4178_v50  ;;  %v4207_v51 = vadd.f32 %v7648_v6, %v4179_v28  ;;  %v4208_v60 = vadd.f32 %v7648_v6, %v4180_v55  ;;  %v4209_v62 = vadd.f32 %v7648_v6, %v4181_v11 }
 0x2e6   : > { %v4214_v56 = vmax.f32 %v4198_v43, 0.0  ;;  %v4215_v49 = vmax.f32 %v4199_v29, 0.0  ;;  %v4216_v54 = vmax.f32 %v4200_v45, 0.0  ;;  %v4217_v58 = vmax.f32 %v4201_v30, 0.0 }
 0x2e7   : > { %v4222_v46 = vmax.f32 %v4206_v32, 0.0  ;;  %v4223_v16 = vmax.f32 %v4207_v51, 0.0  ;;  %v4224_v22 = vmax.f32 %v4208_v60, 0.0  ;;  %v4225_v39 = vmax.f32 %v4209_v62, 0.0 }
 0x2e8   : > { %v4272_v13 = vmul.f32 %v4235_v8, %v4214_v56  ;;  %v4273_v2 = vmul.f32 %v4239_v44, %v4215_v49  ;;  %v4274_v5 = vmul.f32 %v4243_v25, %v4216_v54  ;;  %v4275_v20 = vmul.f32 %v4247_v47, %v4217_v58 }
 0x2e9   : > { %v4280_v4 = vmul.f32 %v4235_v8, %v4222_v46  ;;  %v4281_v63 = vmul.f32 %v4239_v44, %v4223_v16  ;;  %v4282_v48 = vmul.f32 %v4243_v25, %v4224_v22  ;;  %v4283_v33 = vmul.f32 %v4247_v47, %v4225_v39 }
 0x2ea   : > { %v4830_v36 = vpack.c.bf16 %v4273_v2, %v4272_v13  ;;  %v4831_v18 = vpack.c.bf16 %v4275_v20, %v4274_v5  ;;  %v4258_v49 = vsub.s32 6, %v7610_v42  ;;  %v4262_v58 = vsub.s32 7, %v7610_v42 }
 0x2eb   : > { %v4834_v53 = vpack.c.bf16 %v4281_v63, %v4280_v4  ;;  %v4835_v1 = vpack.c.bf16 %v4283_v33, %v4282_v48 }
 0x2ec   : > { %4336 = vst [vmem:[%s7657_s19] sm:$0xff] %v4830_v36  ;;  %4337 = vst [vmem:[%s7657_s19 + $0x8] sm:$0xff] %v4831_v18  ;;  %v4259_v5 = vrot.slane %v7630_v21, %v4258_v49  ;;  %v4263_v4 = vrot.slane %v7630_v21, %v4262_v58 }
 0x2ed   : > { %4340 = vst [vmem:[%s7657_s19 + $0x20] sm:$0xff] %v4834_v53  ;;  %4341 = vst [vmem:[%s7657_s19 + $0x28] sm:$0xff] %v4835_v1 }
 0x335   : > { %v4020_v3 = vpop.f32.mrf.mxu0 }
 0x337   : > { %v4022_v24 = vpop.f32.mrf.mxu0 }
 0x339   : > { %v4063_v38 = vpop.f32.mrf.mxu1  ;;  %v4024_v27 = vpop.f32.mrf.mxu0 }
 0x33a   : > { %v4064_v57 = vadd.f32 %v4063_v38, %v4020_v3 }
 0x33b   : > { %v4065_v31 = vpop.f32.mrf.mxu1  ;;  %v4026_v12 = vpop.f32.mrf.mxu0 }
 0x33c   : > { %v4174_v14 = vmul.f32 %v7628_v10, %v4064_v57  ;;  %v4066_v40 = vadd.f32 %v4065_v31, %v4022_v24 }
 0x33d   : > { %v4067_v59 = vpop.f32.mrf.mxu1 }
 0x33e   : > { %v4202_v37 = vadd.f32 %v7642_v15, %v4174_v14  ;;  %v4175_v17 = vmul.f32 %v7628_v10, %v4066_v40  ;;  %v4068_v52 = vadd.f32 %v4067_v59, %v4024_v27  ;;  %v4374_v14 = vld [vmem:[%s7657_s19 + $0x20] sm:$0xff] (%p5171_p0)  ;;  %v4376_v40 = vld [vmem:[%s7657_s19 + $0x28] sm:$0xff] (%p5171_p0) }
 0x33f   : > { %v4069_v61 = vpop.f32.mrf.mxu1  ;;  %4375 = vst [vmem:[%s4353_s30 + $0x40] sm:$0xff] (%p5171_p0), %v4374_v14  ;;  %4377 = vst [vmem:[%s4353_s30 + $0x48] sm:$0xff] (%p5171_p0), %v4376_v40 }
 0x340   : > { %v4218_v50 = vmax.f32 %v4202_v37, 0.0  ;;  %v4203_v28 = vadd.f32 %v7642_v15, %v4175_v17  ;;  %v4182_v55 = vmul.f32 %v7622_v9, %v4068_v52  ;;  %v4070_v11 = vadd.f32 %v4069_v61, %v4026_v12 }
 0x342   : > { %v4276_v34 = vmul.f32 %v4251_v19, %v4218_v50  ;;  %v4219_v7 = vmax.f32 %v4203_v28, 0.0  ;;  %v4210_v41 = vadd.f32 %v7648_v6, %v4182_v55  ;;  %v4183_v0 = vmul.f32 %v7622_v9, %v4070_v11 }
 0x344   : > { %v4277_v8 = vmul.f32 %v4255_v26, %v4219_v7  ;;  %v4226_v44 = vmax.f32 %v4210_v41, 0.0  ;;  %v4211_v25 = vadd.f32 %v7648_v6, %v4183_v0 }
 0x346   : > { %v4832_v47 = vpack.c.bf16 %v4277_v8, %v4276_v34  ;;  %v4284_v43 = vmul.f32 %v4251_v19, %v4226_v44  ;;  %v4227_v29 = vmax.f32 %v4211_v25, 0.0 }
 0x348   : > { %4338 = vst [vmem:[%s7657_s19 + $0x10] sm:$0xff] %v4832_v47  ;;  %v4285_v45 = vmul.f32 %v4255_v26, %v4227_v29 }
 0x34a   : > { %v4836_v30 = vpack.c.bf16 %v4285_v45, %v4284_v43 }
 0x34c   : > { %4342 = vst [vmem:[%s7657_s19 + $0x30] sm:$0xff] %v4836_v30 }
 0x34f   : > { %v4370_v31 = vld [vmem:[%s7657_s19 + $0x10] sm:$0xff] (%p5171_p0) }
 0x350   : > { %4371 = vst [vmem:[%s4353_s30 + $0x10] sm:$0xff] (%p5171_p0), %v4370_v31 }
 0x353   : > { %v4378_v59 = vld [vmem:[%s7657_s19 + $0x30] sm:$0xff] (%p5171_p0) }
 0x354   : > { %4379 = vst [vmem:[%s4353_s30 + $0x50] sm:$0xff] (%p5171_p0), %v4378_v59 }
 0x39d   : > { %v4106_v32 = vpop.f32.mrf.mxu0 }
 0x39f   : > { %v4108_v51 = vpop.f32.mrf.mxu0 }
 0x3a1   : > { %v4149_v60 = vpop.f32.mrf.mxu1  ;;  %v4110_v56 = vpop.f32.mrf.mxu0 }
 0x3a2   : > { %v4150_v62 = vadd.f32 %v4149_v60, %v4106_v32 }
 0x3a3   : > { %v4151_v54 = vpop.f32.mrf.mxu1  ;;  %v4112_v20 = vpop.f32.mrf.mxu0 }
 0x3a4   : > { %v4176_v46 = vmul.f32 %v7628_v10, %v4150_v62  ;;  %v4152_v16 = vadd.f32 %v4151_v54, %v4108_v51 }
 0x3a5   : > { %v4153_v22 = vpop.f32.mrf.mxu1 }
 0x3a6   : > { %v4204_v39 = vadd.f32 %v7642_v15, %v4176_v46  ;;  %v4177_v13 = vmul.f32 %v7628_v10, %v4152_v16  ;;  %v4154_v2 = vadd.f32 %v4153_v22, %v4110_v56 }
 0x3a7   : > { %v4155_v63 = vpop.f32.mrf.mxu1 }
 0x3a8   : > { %v4220_v48 = vmax.f32 %v4204_v39, 0.0  ;;  %v4205_v33 = vadd.f32 %v7642_v15, %v4177_v13  ;;  %v4184_v42 = vmul.f32 %v7622_v9, %v4154_v2  ;;  %v4156_v36 = vadd.f32 %v4155_v63, %v4112_v20 }
 0x3aa   : > { %v4221_v18 = vmax.f32 %v4205_v33, 0.0  ;;  %v4212_v53 = vadd.f32 %v7648_v6, %v4184_v42  ;;  %v4185_v10 = vmul.f32 %v7622_v9, %v4156_v36  ;;  %v4278_v1 = vmul.f32 %v4259_v5, %v4220_v48  ;;  %v4366_v9 = vld [vmem:[%s7657_s19] sm:$0xff] (%p5171_p0) }
 0x3ab   : > { %4367 = vst [vmem:[%s4353_s30] sm:$0xff] (%p5171_p0), %v4366_v9 }
 0x3ac   : > { %v4279_v3 = vmul.f32 %v4263_v4, %v4221_v18  ;;  %v4228_v24 = vmax.f32 %v4212_v53, 0.0  ;;  %v4213_v38 = vadd.f32 %v7648_v6, %v4185_v10  ;;  %v4368_v6 = vld [vmem:[%s7657_s19 + $0x8] sm:$0xff] (%p5171_p0) }
 0x3ad   : > { %4369 = vst [vmem:[%s4353_s30 + $0x8] sm:$0xff] (%p5171_p0), %v4368_v6 }
 0x3ae   : > { %v4833_v27 = vpack.c.bf16 %v4279_v3, %v4278_v1  ;;  %v4229_v21 = vmax.f32 %v4213_v38, 0.0  ;;  %v4286_v57 = vmul.f32 %v4259_v5, %v4228_v24 }
 0x3b0   : > { %4339 = vst [vmem:[%s7657_s19 + $0x18] sm:$0xff] %v4833_v27  ;;  %v4287_v23 = vmul.f32 %v4263_v4, %v4229_v21  ;;  %4350 = sbr.rel (!%p5171_p0) target bundleno = 957 (0x3bd), region = 157 }
 0x3b2   : > { %v4837_v15 = vpack.c.bf16 %v4287_v23, %v4286_v57 }
 0x3b4   : > { %4343 = vst [vmem:[%s7657_s19 + $0x38] sm:$0xff] %v4837_v15 }
 0x3b7   : > { %v4372_v35 = vld [vmem:[%s7657_s19 + $0x18] sm:$0xff] }
 0x3b8   : > { %4373 = vst [vmem:[%s4353_s30 + $0x18] sm:$0xff] %v4372_v35 }
 0x3bb   : > { %v4380_v12 = vld [vmem:[%s7657_s19 + $0x38] sm:$0xff] }
 0x3bc   : > { %4381 = vst [vmem:[%s4353_s30 + $0x58] sm:$0xff] %v4380_v12 }
 0x3bd PF: > { %s8385_s30 = sld [smem:[#allocation10_spill]] }
 0x3be   : > { %s8386_s24 = sld [smem:[#allocation7_spill]] }
 0x3bf   : > { %s8387_s25 = sld [smem:[#allocation15_spill]] }
 0x3c0   : > { %s8388_s26 = sld [smem:[#allocation8_spill]] }
 0x3c1   : > { %s8389_s27 = sld [smem:[#allocation12_spill]] }
 0x3c2   : > { %s8390_s28 = sld [smem:[#allocation9_spill]] }
 0x3c3   : > { %s8391_s29 = sld [smem:[#allocation11_spill]]  ;;  %p14_p7 = scmp.ge.s32.totalorder %s8385_s30, 4  }
 0x3c5   :  { %16 = sbr.rel (!%p14_p7) target bundleno = 10 (0xa), region = 230 }

</bundles_post_ra>
